<compile_context>
chip_gen: v7x
topology: tpu7x:2x2x1
jax: 0.10.0
libtpu: 0.0.40
codegen_flags: <defaults>
</compile_context>

<pallas_src>
import jax
import jax.numpy as jnp
from jax import lax
from jax.experimental import pallas as pl
from jax.experimental.pallas import tpu as pltpu


def word_encoder_kernel(
    xp_ref,                      # (T, B, H)  bf16   e2i-folded embeddings, time-major
    len_ref,                     # (B, 1)     int32  valid lengths
    wi_all_ref, bi_all_ref,      # (H, 6H) bf16 / (1, 6H) f32   [r|z|n]_fwd ++ [r|z|n]_bwd
    wh_f_ref, bh_f_ref,          # (H, 3H) bf16 / (1, 3H) f32
    wh_b_ref, bh_b_ref,          # (H, 3H) bf16 / (1, 3H) f32
    wo_f_ref, wo_b_ref, bo_ref,  # (H, O) bf16 x2 / (1, O) f32   h2o split fwd/bwd
    uw_ref,                      # (1, O) f32
    out_ref,                     # (1, B, 2H) f32
    gi_ref, outf_ref, outb_ref,  # scratch: (T,B,6H) f32, (T,B,H) f32 x2
):
  T, B, H = xp_ref.shape         # H is the lane-padded hidden width (x128)
  H3 = 3 * H
  O = wo_f_ref.shape[1]

  # ---- (1) input-side gate projections for BOTH directions, hoisted out of
  # the recurrence into one large MXU matmul (bf16 operands, f32 accumulate).
  gi = jnp.dot(xp_ref[...].reshape(T * B, H), wi_all_ref[...],
               preferred_element_type=jnp.float32) + bi_all_ref[...]
  gi_ref[...] = gi.reshape(T, B, 6 * H)

  lens = len_ref[...]                                  # (B, 1) int32
  wh_f = wh_f_ref[...]
  bh_f = bh_f_ref[...]
  wh_b = wh_b_ref[...]
  bh_b = bh_b_ref[...]

  def gru_step(h, gi_t, wh, bh):
    # One fused (B,H)@(H,3H) hidden-path matmul per step; gates on VPU/EUP.
    gh = jnp.dot(h.astype(wh.dtype), wh, preferred_element_type=jnp.float32) + bh
    r = jax.nn.sigmoid(gi_t[:, :H] + gh[:, :H])
    z = jax.nn.sigmoid(gi_t[:, H:2 * H] + gh[:, H:2 * H])
    n = jnp.tanh(gi_t[:, 2 * H:] + r * gh[:, 2 * H:])  # b_hn stays inside r*()
    return (1.0 - z) * n + z * h

  h0 = jnp.zeros((B, H), jnp.float32)

  # ---- (2) forward + backward recurrences interleaved in one unrolled loop.
  def body(s, carry):
    h_f, h_b = carry
    t_f = s
    t_b = T - 1 - s
    gi_f = gi_ref[t_f, :, :H3]
    gi_b = gi_ref[t_b, :, H3:]
    hn_f = gru_step(h_f, gi_f, wh_f, bh_f)
    hn_b = gru_step(h_b, gi_b, wh_b, bh_b)
    # Store raw outputs: invalid timesteps get exactly-zero attention weight
    # below, so per-step zeroing is redundant.  Only the carry is masked.
    outf_ref[t_f] = hn_f
    outb_ref[t_b] = hn_b
    h_f = jnp.where(t_f < lens, hn_f, h_f)
    h_b = jnp.where(t_b < lens, hn_b, h_b)
    return (h_f, h_b)

  lax.fori_loop(0, T, body, (h0, h0), unroll=True)

  # ---- (3) h2o + tanh + masked softmax attention (no h_cat concatenation) --
  outf = outf_ref[...]                                 # (T, B, H) f32
  outb = outb_ref[...]
  y = jnp.tanh(
      jnp.dot(outf.reshape(T * B, H).astype(wo_f_ref.dtype), wo_f_ref[...],
              preferred_element_type=jnp.float32)
      + jnp.dot(outb.reshape(T * B, H).astype(wo_b_ref.dtype), wo_b_ref[...],
                preferred_element_type=jnp.float32)
      + bo_ref[...])                                   # (T*B, O) f32
  scores = jnp.sum(y.reshape(T, B, O) * uw_ref[...].reshape(1, 1, O),
                   axis=-1, keepdims=True)             # (T, B, 1)

  valid = lax.broadcasted_iota(jnp.int32, (T, B, 1), 0) < lens.reshape(1, B, 1)
  s_m = jnp.where(valid, scores, -1e30)
  m = jnp.max(s_m, axis=0, keepdims=True)
  e = jnp.exp(s_m - m) * valid.astype(jnp.float32)
  denom = jnp.sum(e, axis=0, keepdims=True)
  # Guard: zero-length (and batch-padding) columns produce attn == 0, not NaN.
  attn = e * pl.reciprocal(jnp.maximum(denom, 1e-30), approx=True)   # (T, B, 1)

  # Weighted sums over the (non-minor) time axis: cheap VPU accumulation.
  y1_f = jnp.sum(attn * outf, axis=0)                  # (B, H)
  y1_b = jnp.sum(attn * outb, axis=0)                  # (B, H)
  out_ref[:, :, :H] = y1_f[None]
  out_ref[:, :, H:] = y1_b[None]


def _round_up(x, m):
  return ((x + m - 1) // m) * m


def _pad2(a, rows, cols):
  return jnp.zeros((rows, cols), a.dtype).at[:a.shape[0], :a.shape[1]].set(a)


def word_encoder_forward(tokens, lengths, params, *, b_block=16):
  """tokens: (B, T) int32, lengths: (B,) int32.  Returns (1, B, 2*hidden) f32."""
  B, T = tokens.shape
  H = params["w_e2i"].shape[1]
  O = params["w_h2o"].shape[1]

  Hp = _round_up(H, 128)        # lane-dense hidden width
  Op = _round_up(O, 128)        # lane-dense attention-projection width
  Bp = _round_up(B, b_block)    # sublane-dense (and bf16-pack friendly) batch

  f32, bf16 = jnp.float32, jnp.bfloat16

  # ---- fold embedding -> e2i into one lookup table (weights reused across
  # calls), gather directly in time-major order: no slab transpose, no
  # in-kernel e2i matmul.  Zero-padded hidden lanes stay exactly zero.
  table = params["embedding"].astype(f32) @ params["w_e2i"] + params["b_e2i"]
  table = _pad2(table, table.shape[0], Hp).astype(bf16)            # (V, Hp)

  tok_p = jnp.zeros((Bp, T), jnp.int32).at[:B, :].set(tokens.astype(jnp.int32))
  len_p = jnp.zeros((Bp, 1), jnp.int32).at[:B, 0].set(lengths.astype(jnp.int32))
  xp_tm = table[tok_p.T]                                           # (T, Bp, Hp) bf16

  # ---- fused, lane-padded gate weights: columns are [r | z | n] blocks ----
  def gate_cat(prefixes, d, rows):
    return jnp.concatenate(
        [_pad2(params[f"{p}_{d}"], rows, Hp) for p in prefixes], axis=1)

  wi_all = jnp.concatenate(
      [gate_cat(("w_ir", "w_iz", "w_in"), "f", Hp),
       gate_cat(("w_ir", "w_iz", "w_in"), "b", Hp)], axis=1).astype(bf16)   # (Hp, 6Hp)
  bi_all = jnp.concatenate(
      [gate_cat(("b_ir", "b_iz", "b_in"), "f", 1),
       gate_cat(("b_ir", "b_iz", "b_in"), "b", 1)], axis=1).astype(f32)     # (1, 6Hp)
  wh_f = gate_cat(("w_hr", "w_hz", "w_hn"), "f", Hp).astype(bf16)           # (Hp, 3Hp)
  bh_f = gate_cat(("b_hr", "b_hz", "b_hn"), "f", 1).astype(f32)
  wh_b = gate_cat(("w_hr", "w_hz", "w_hn"), "b", Hp).astype(bf16)
  bh_b = gate_cat(("b_hr", "b_hz", "b_hn"), "b", 1).astype(f32)

  # h2o split into forward/backward halves (removes the h_cat concatenation).
  wo_f = _pad2(params["w_h2o"][:H], Hp, Op).astype(bf16)
  wo_b = _pad2(params["w_h2o"][H:], Hp, Op).astype(bf16)
  bo = _pad2(params["b_h2o"], 1, Op).astype(f32)
  uw = _pad2(params["u_w"], 1, Op).astype(f32)

  const = lambda b: (0, 0)
  out_p = pl.pallas_call(
      word_encoder_kernel,
      out_shape=jax.ShapeDtypeStruct((1, Bp, 2 * Hp), jnp.float32),
      grid_spec=pltpu.PrefetchScalarGridSpec(
          num_scalar_prefetch=0,
          grid=(Bp // b_block,),
          in_specs=[
              pl.BlockSpec((T, b_block, Hp), lambda b: (0, b, 0)),   # xp
              pl.BlockSpec((b_block, 1), lambda b: (b, 0)),          # lengths
              pl.BlockSpec((Hp, 6 * Hp), const),                     # wi_all
              pl.BlockSpec((1, 6 * Hp), const),                      # bi_all
              pl.BlockSpec((Hp, 3 * Hp), const),                     # wh_f
              pl.BlockSpec((1, 3 * Hp), const),                      # bh_f
              pl.BlockSpec((Hp, 3 * Hp), const),                     # wh_b
              pl.BlockSpec((1, 3 * Hp), const),                      # bh_b
              pl.BlockSpec((Hp, Op), const),                         # wo_f
              pl.BlockSpec((Hp, Op), const),                         # wo_b
              pl.BlockSpec((1, Op), const),                          # bo
              pl.BlockSpec((1, Op), const),                          # u_w
          ],
          out_specs=pl.BlockSpec((1, b_block, 2 * Hp), lambda b: (0, b, 0)),
          scratch_shapes=[
              pltpu.VMEM((T, b_block, 6 * Hp), jnp.float32),   # hoisted gate inputs
              pltpu.VMEM((T, b_block, Hp), jnp.float32),       # forward GRU outputs
              pltpu.VMEM((T, b_block, Hp), jnp.float32),       # backward GRU outputs
          ]),
      compiler_params=pltpu.CompilerParams(
          dimension_semantics=("parallel",),
          vmem_limit_bytes=32 * 1024 * 1024),
  )(xp_tm, len_p, wi_all, bi_all, wh_f, bh_f, wh_b, bh_b, wo_f, wo_b, bo, uw)

  # Strip batch / lane padding; re-assemble [fwd | bwd] hidden halves.
  return jnp.concatenate([out_p[:, :B, :H], out_p[:, :B, Hp:Hp + H]], axis=-1)


def init_params(key, vocab, E, H, O, padding_idx):
  keys = iter(jax.random.split(key, 32))

  def nrm(shape, scale=0.1):
    return (jax.random.normal(next(keys), shape) * scale).astype(jnp.float32)

  params = {}
  emb = nrm((vocab, E), 0.5)
  params["embedding"] = emb.at[padding_idx].set(0.0)       # nn.Embedding padding_idx
  params["w_e2i"], params["b_e2i"] = nrm((E, H)), nrm((1, H))
  for d in ("f", "b"):
    for n in ("w_ir", "w_iz", "w_in", "w_hr", "w_hz", "w_hn"):
      params[f"{n}_{d}"] = nrm((H, H))
    for n in ("b_ir", "b_iz", "b_in", "b_hr", "b_hz", "b_hn"):
      params[f"{n}_{d}"] = nrm((1, H))
  params["w_h2o"], params["b_h2o"] = nrm((2 * H, O)), nrm((1, O))
  params["u_w"] = jax.random.uniform(next(keys), (1, O)).astype(jnp.float32)  # torch.rand
  return params


def reference_forward(tokens, lengths, params):
  """Plain-JAX (f32) mirror of the PyTorch forward, for validation."""
  B, T = tokens.shape
  H = params["w_e2i"].shape[1]
  x = params["embedding"][tokens]                          # (B, T, E)
  xp = x @ params["w_e2i"] + params["b_e2i"]               # (B, T, H)

  def cell(xt, h, d):
    p = params
    r = jax.nn.sigmoid(xt @ p[f"w_ir_{d}"] + p[f"b_ir_{d}"] + h @ p[f"w_hr_{d}"] + p[f"b_hr_{d}"])
    z = jax.nn.sigmoid(xt @ p[f"w_iz_{d}"] + p[f"b_iz_{d}"] + h @ p[f"w_hz_{d}"] + p[f"b_hz_{d}"])
    n = jnp.tanh(xt @ p[f"w_in_{d}"] + p[f"b_in_{d}"] + r * (h @ p[f"w_hn_{d}"] + p[f"b_hn_{d}"]))
    return (1.0 - z) * n + z * h

  outf, h = [], jnp.zeros((B, H), jnp.float32)
  for t in range(T):
    hn = cell(xp[:, t], h, "f")
    mask = (t < lengths)[:, None]
    outf.append(jnp.where(mask, hn, 0.0))
    h = jnp.where(mask, hn, h)
  outb, h = [None] * T, jnp.zeros((B, H), jnp.float32)
  for t in range(T - 1, -1, -1):
    hn = cell(xp[:, t], h, "b")
    mask = (t < lengths)[:, None]
    outb[t] = jnp.where(mask, hn, 0.0)
    h = jnp.where(mask, hn, h)

  h_cat = jnp.concatenate([jnp.stack(outf, 1), jnp.stack(outb, 1)], axis=-1)  # (B, T, 2H)
  y = jnp.tanh(h_cat @ params["w_h2o"] + params["b_h2o"])                     # (B, T, O)
  outs = []
  for i in range(B):
    L = int(lengths[i])
    a = jax.nn.softmax(jnp.sum(y[i, :L] * params["u_w"][0], axis=1))
    outs.append(jnp.sum(h_cat[i, :L] * a[:, None], axis=0))
  return jnp.stack(outs, axis=0)[None]                                        # (1, B, 2H)


if __name__ == "__main__":
  vocab, E, H, O, pad = 32, 16, 16, 8, 0
  B, T = 3, 8

  key = jax.random.PRNGKey(0)
  kp, kt = jax.random.split(key)
  params = init_params(kp, vocab, E, H, O, pad)

  lengths = jnp.array([8, 6, 3], dtype=jnp.int32)          # sorted descending (packed-seq req.)
  tokens = jax.random.randint(kt, (B, T), 1, vocab)
  tmask = jnp.arange(T)[None, :] < lengths[:, None]
  tokens = jnp.where(tmask, tokens, pad).astype(jnp.int32)

  out = word_encoder_forward(tokens, lengths, params)
  out = jax.block_until_ready(out)

  ref = reference_forward(tokens, lengths, params)
  assert out.shape == (1, B, 2 * H), out.shape
  err = float(jnp.max(jnp.abs(out - ref)))
  # bf16 matmul operands (f32 accumulation / f32 hidden carry) -> looser tol.
  assert jnp.allclose(out, ref, atol=2e-2, rtol=2e-2), err
  print("KERNEL_OK")
</pallas_src>

<mosaic_0001>
module attributes {stable_mosaic.version = 11 : i64} {
  func.func @word_encoder_kernel(%arg0: i32, %arg1: memref<8x16x128xbf16, #tpu.memory_space<vmem>>, %arg2: memref<16x1xi32, #tpu.memory_space<vmem>>, %arg3: memref<128x768xbf16, #tpu.memory_space<vmem>>, %arg4: memref<1x768xf32, #tpu.memory_space<vmem>>, %arg5: memref<128x384xbf16, #tpu.memory_space<vmem>>, %arg6: memref<1x384xf32, #tpu.memory_space<vmem>>, %arg7: memref<128x384xbf16, #tpu.memory_space<vmem>>, %arg8: memref<1x384xf32, #tpu.memory_space<vmem>>, %arg9: memref<128x128xbf16, #tpu.memory_space<vmem>>, %arg10: memref<128x128xbf16, #tpu.memory_space<vmem>>, %arg11: memref<1x128xf32, #tpu.memory_space<vmem>>, %arg12: memref<1x128xf32, #tpu.memory_space<vmem>>, %arg13: memref<1x16x256xf32, #tpu.memory_space<vmem>>, %arg14: memref<8x16x768xf32, #tpu.memory_space<vmem>>, %arg15: memref<8x16x128xf32, #tpu.memory_space<vmem>>, %arg16: memref<8x16x128xf32, #tpu.memory_space<vmem>>) attributes {dimension_semantics = [#tpu.dimension_semantics<parallel>], iteration_bounds = array<i64: 1>, scalar_prefetch = 0 : i64, scratch_operands = 3 : i64, tpu.core_type = #tpu.core_type<tc>, window_params = [{transform_indices = @transform_0, window_bounds = array<i64: 8, 16, 128>}, {transform_indices = @transform_1, window_bounds = array<i64: 16, 1>}, {pipeline_mode = #tpu.pipeline_mode<synchronous>, transform_indices = @transform_2, window_bounds = array<i64: 128, 768>}, {pipeline_mode = #tpu.pipeline_mode<synchronous>, transform_indices = @transform_3, window_bounds = array<i64: 1, 768>}, {pipeline_mode = #tpu.pipeline_mode<synchronous>, transform_indices = @transform_4, window_bounds = array<i64: 128, 384>}, {pipeline_mode = #tpu.pipeline_mode<synchronous>, transform_indices = @transform_5, window_bounds = array<i64: 1, 384>}, {pipeline_mode = #tpu.pipeline_mode<synchronous>, transform_indices = @transform_6, window_bounds = array<i64: 128, 384>}, {pipeline_mode = #tpu.pipeline_mode<synchronous>, transform_indices = @transform_7, window_bounds = array<i64: 1, 384>}, {pipeline_mode = #tpu.pipeline_mode<synchronous>, transform_indices = @transform_8, window_bounds = array<i64: 128, 128>}, {pipeline_mode = #tpu.pipeline_mode<synchronous>, transform_indices = @transform_9, window_bounds = array<i64: 128, 128>}, {pipeline_mode = #tpu.pipeline_mode<synchronous>, transform_indices = @transform_10, window_bounds = array<i64: 1, 128>}, {pipeline_mode = #tpu.pipeline_mode<synchronous>, transform_indices = @transform_11, window_bounds = array<i64: 1, 128>}, {transform_indices = @transform_12, window_bounds = array<i64: 1, 16, 256>}]} {
    %c0 = arith.constant 0 : index
    %c0_0 = arith.constant 0 : index
    %c0_1 = arith.constant 0 : index
    %0 = vector.load %arg1[%c0, %c0_0, %c0_1] : memref<8x16x128xbf16, #tpu.memory_space<vmem>>, vector<8x16x128xbf16>
    %1 = vector.shape_cast %0 : vector<8x16x128xbf16> to vector<128x128xbf16>
    %c0_2 = arith.constant 0 : index
    %c0_3 = arith.constant 0 : index
    %2 = vector.load %arg3[%c0_2, %c0_3] : memref<128x768xbf16, #tpu.memory_space<vmem>>, vector<128x768xbf16>
    %cst = arith.constant dense<0.000000e+00> : vector<128x768xf32>
    %3 = tpu.matmul %1, %2, %cst {dimension_numbers = #tpu.dot_dimension_numbers<[1], [0], [0], [1], [0, 0, 1, 1], [], []>} : vector<128x128xbf16>, vector<128x768xbf16>, vector<128x768xf32> -> vector<128x768xf32>
    %c0_4 = arith.constant 0 : index
    %c0_5 = arith.constant 0 : index
    %4 = vector.load %arg4[%c0_4, %c0_5] : memref<1x768xf32, #tpu.memory_space<vmem>>, vector<1x768xf32>
    %5 = vector.broadcast %4 : vector<1x768xf32> to vector<128x768xf32>
    %6 = arith.addf %3, %5 : vector<128x768xf32>
    %7 = vector.shape_cast %6 : vector<128x768xf32> to vector<8x16x768xf32>
    %c0_6 = arith.constant 0 : index
    %c0_7 = arith.constant 0 : index
    %c0_8 = arith.constant 0 : index
    %8 = vector.load %arg14[%c0_6, %c0_7, %c0_8] : memref<8x16x768xf32, #tpu.memory_space<vmem>>, vector<8x16x768xf32>
    tpu.vector_store %arg14[%c0_6, %c0_7, %c0_8], %7 {strides = array<i32>} : memref<8x16x768xf32, #tpu.memory_space<vmem>>, vector<8x16x768xf32>,
    %c0_9 = arith.constant 0 : index
    %c0_10 = arith.constant 0 : index
    %9 = vector.load %arg2[%c0_9, %c0_10] : memref<16x1xi32, #tpu.memory_space<vmem>>, vector<16x1xi32>
    %c0_11 = arith.constant 0 : index
    %c0_12 = arith.constant 0 : index
    %10 = vector.load %arg5[%c0_11, %c0_12] : memref<128x384xbf16, #tpu.memory_space<vmem>>, vector<128x384xbf16>
    %c0_13 = arith.constant 0 : index
    %c0_14 = arith.constant 0 : index
    %11 = vector.load %arg6[%c0_13, %c0_14] : memref<1x384xf32, #tpu.memory_space<vmem>>, vector<1x384xf32>
    %c0_15 = arith.constant 0 : index
    %c0_16 = arith.constant 0 : index
    %12 = vector.load %arg7[%c0_15, %c0_16] : memref<128x384xbf16, #tpu.memory_space<vmem>>, vector<128x384xbf16>
    %c0_17 = arith.constant 0 : index
    %c0_18 = arith.constant 0 : index
    %13 = vector.load %arg8[%c0_17, %c0_18] : memref<1x384xf32, #tpu.memory_space<vmem>>, vector<1x384xf32>
    %cst_19 = arith.constant 0.000000e+00 : f32
    %14 = vector.broadcast %cst_19 : f32 to vector<16x128xf32>
    %c0_i32 = arith.constant 0 : i32
    %c7_i32 = arith.constant 7 : i32
    %15 = arith.subi %c7_i32, %c0_i32 : i32
    %16 = arith.index_cast %c0_i32 : i32 to index
    %c0_20 = arith.constant 0 : index
    %c0_21 = arith.constant 0 : index
    %17 = vector.load %arg14[%16, %c0_20, %c0_21] : memref<8x16x768xf32, #tpu.memory_space<vmem>>, vector<1x16x384xf32>
    %18 = vector.shape_cast %17 : vector<1x16x384xf32> to vector<16x384xf32>
    %19 = arith.index_cast %15 : i32 to index
    %c0_22 = arith.constant 0 : index
    %c384 = arith.constant 384 : index
    %20 = vector.load %arg14[%19, %c0_22, %c384] : memref<8x16x768xf32, #tpu.memory_space<vmem>>, vector<1x16x384xf32>
    %21 = vector.shape_cast %20 : vector<1x16x384xf32> to vector<16x384xf32>
    %22 = arith.truncf %14 : vector<16x128xf32> to vector<16x128xbf16>
    %cst_23 = arith.constant dense<0.000000e+00> : vector<16x384xf32>
    %23 = tpu.matmul %22, %10, %cst_23 {dimension_numbers = #tpu.dot_dimension_numbers<[1], [0], [0], [1], [0, 0, 1, 1], [], []>} : vector<16x128xbf16>, vector<128x384xbf16>, vector<16x384xf32> -> vector<16x384xf32>
    %24 = vector.broadcast %11 : vector<1x384xf32> to vector<16x384xf32>
    %25 = arith.addf %23, %24 : vector<16x384xf32>
    %26 = vector.extract_strided_slice %18 {offsets = [0, 0], sizes = [16, 128], strides = [1, 1]} : vector<16x384xf32> to vector<16x128xf32>
    %27 = vector.extract_strided_slice %25 {offsets = [0, 0], sizes = [16, 128], strides = [1, 1]} : vector<16x384xf32> to vector<16x128xf32>
    %28 = arith.addf %26, %27 : vector<16x128xf32>
    %29 = arith.negf %28 : vector<16x128xf32>
    %30 = math.exp %29 : vector<16x128xf32>
    %cst_24 = arith.constant 1.000000e+00 : f32
    %31 = vector.broadcast %cst_24 : f32 to vector<16x128xf32>
    %32 = arith.addf %31, %30 : vector<16x128xf32>
    %33 = arith.divf %31, %32 : vector<16x128xf32>
    %34 = vector.extract_strided_slice %18 {offsets = [0, 128], sizes = [16, 128], strides = [1, 1]} : vector<16x384xf32> to vector<16x128xf32>
    %35 = vector.extract_strided_slice %25 {offsets = [0, 128], sizes = [16, 128], strides = [1, 1]} : vector<16x384xf32> to vector<16x128xf32>
    %36 = arith.addf %34, %35 : vector<16x128xf32>
    %37 = arith.negf %36 : vector<16x128xf32>
    %38 = math.exp %37 : vector<16x128xf32>
    %cst_25 = arith.constant 1.000000e+00 : f32
    %39 = vector.broadcast %cst_25 : f32 to vector<16x128xf32>
    %40 = arith.addf %39, %38 : vector<16x128xf32>
    %41 = arith.divf %39, %40 : vector<16x128xf32>
    %42 = vector.extract_strided_slice %18 {offsets = [0, 256], sizes = [16, 128], strides = [1, 1]} : vector<16x384xf32> to vector<16x128xf32>
    %43 = vector.extract_strided_slice %25 {offsets = [0, 256], sizes = [16, 128], strides = [1, 1]} : vector<16x384xf32> to vector<16x128xf32>
    %44 = arith.mulf %33, %43 : vector<16x128xf32>
    %45 = arith.addf %42, %44 : vector<16x128xf32>
    %46 = math.tanh %45 : vector<16x128xf32>
    %cst_26 = arith.constant 1.000000e+00 : f32
    %47 = vector.broadcast %cst_26 : f32 to vector<16x128xf32>
    %48 = arith.subf %47, %41 : vector<16x128xf32>
    %49 = arith.mulf %48, %46 : vector<16x128xf32>
    %50 = arith.mulf %41, %14 : vector<16x128xf32>
    %51 = arith.addf %49, %50 : vector<16x128xf32>
    %52 = arith.truncf %14 : vector<16x128xf32> to vector<16x128xbf16>
    %cst_27 = arith.constant dense<0.000000e+00> : vector<16x384xf32>
    %53 = tpu.matmul %52, %12, %cst_27 {dimension_numbers = #tpu.dot_dimension_numbers<[1], [0], [0], [1], [0, 0, 1, 1], [], []>} : vector<16x128xbf16>, vector<128x384xbf16>, vector<16x384xf32> -> vector<16x384xf32>
    %54 = vector.broadcast %13 : vector<1x384xf32> to vector<16x384xf32>
    %55 = arith.addf %53, %54 : vector<16x384xf32>
    %56 = vector.extract_strided_slice %21 {offsets = [0, 0], sizes = [16, 128], strides = [1, 1]} : vector<16x384xf32> to vector<16x128xf32>
    %57 = vector.extract_strided_slice %55 {offsets = [0, 0], sizes = [16, 128], strides = [1, 1]} : vector<16x384xf32> to vector<16x128xf32>
    %58 = arith.addf %56, %57 : vector<16x128xf32>
    %59 = arith.negf %58 : vector<16x128xf32>
    %60 = math.exp %59 : vector<16x128xf32>
    %cst_28 = arith.constant 1.000000e+00 : f32
    %61 = vector.broadcast %cst_28 : f32 to vector<16x128xf32>
    %62 = arith.addf %61, %60 : vector<16x128xf32>
    %63 = arith.divf %61, %62 : vector<16x128xf32>
    %64 = vector.extract_strided_slice %21 {offsets = [0, 128], sizes = [16, 128], strides = [1, 1]} : vector<16x384xf32> to vector<16x128xf32>
    %65 = vector.extract_strided_slice %55 {offsets = [0, 128], sizes = [16, 128], strides = [1, 1]} : vector<16x384xf32> to vector<16x128xf32>
    %66 = arith.addf %64, %65 : vector<16x128xf32>
    %67 = arith.negf %66 : vector<16x128xf32>
    %68 = math.exp %67 : vector<16x128xf32>
    %cst_29 = arith.constant 1.000000e+00 : f32
    %69 = vector.broadcast %cst_29 : f32 to vector<16x128xf32>
    %70 = arith.addf %69, %68 : vector<16x128xf32>
    %71 = arith.divf %69, %70 : vector<16x128xf32>
    %72 = vector.extract_strided_slice %21 {offsets = [0, 256], sizes = [16, 128], strides = [1, 1]} : vector<16x384xf32> to vector<16x128xf32>
    %73 = vector.extract_strided_slice %55 {offsets = [0, 256], sizes = [16, 128], strides = [1, 1]} : vector<16x384xf32> to vector<16x128xf32>
    %74 = arith.mulf %63, %73 : vector<16x128xf32>
    %75 = arith.addf %72, %74 : vector<16x128xf32>
    %76 = math.tanh %75 : vector<16x128xf32>
    %cst_30 = arith.constant 1.000000e+00 : f32
    %77 = vector.broadcast %cst_30 : f32 to vector<16x128xf32>
    %78 = arith.subf %77, %71 : vector<16x128xf32>
    %79 = arith.mulf %78, %76 : vector<16x128xf32>
    %80 = arith.mulf %71, %14 : vector<16x128xf32>
    %81 = arith.addf %79, %80 : vector<16x128xf32>
    %82 = arith.index_cast %c0_i32 : i32 to index
    %c0_31 = arith.constant 0 : index
    %c0_32 = arith.constant 0 : index
    %83 = vector.load %arg15[%82, %c0_31, %c0_32] : memref<8x16x128xf32, #tpu.memory_space<vmem>>, vector<1x16x128xf32>
    %84 = vector.shape_cast %83 : vector<1x16x128xf32> to vector<16x128xf32>
    %85 = vector.shape_cast %51 : vector<16x128xf32> to vector<1x16x128xf32>
    tpu.vector_store %arg15[%82, %c0_31, %c0_32], %85 {strides = array<i32>} : memref<8x16x128xf32, #tpu.memory_space<vmem>>, vector<1x16x128xf32>,
    %86 = arith.index_cast %15 : i32 to index
    %c0_33 = arith.constant 0 : index
    %c0_34 = arith.constant 0 : index
    %87 = vector.load %arg16[%86, %c0_33, %c0_34] : memref<8x16x128xf32, #tpu.memory_space<vmem>>, vector<1x16x128xf32>
    %88 = vector.shape_cast %87 : vector<1x16x128xf32> to vector<16x128xf32>
    %89 = vector.shape_cast %81 : vector<16x128xf32> to vector<1x16x128xf32>
    tpu.vector_store %arg16[%86, %c0_33, %c0_34], %89 {strides = array<i32>} : memref<8x16x128xf32, #tpu.memory_space<vmem>>, vector<1x16x128xf32>,
    %90 = vector.broadcast %c0_i32 : i32 to vector<16x1xi32>
    %91 = arith.cmpi slt, %90, %9 : vector<16x1xi32>
    %92 = vector.shape_cast %91 : vector<16x1xi1> to vector<16x1xi1>
    %93 = vector.broadcast %92 : vector<16x1xi1> to vector<16x128xi1>
    %94 = arith.select %93, %51, %14 : vector<16x128xi1>, vector<16x128xf32>
    %95 = vector.broadcast %15 : i32 to vector<16x1xi32>
    %96 = arith.cmpi slt, %95, %9 : vector<16x1xi32>
    %97 = vector.shape_cast %96 : vector<16x1xi1> to vector<16x1xi1>
    %98 = vector.broadcast %97 : vector<16x1xi1> to vector<16x128xi1>
    %99 = arith.select %98, %81, %14 : vector<16x128xi1>, vector<16x128xf32>
    %c1_i32 = arith.constant 1 : i32
    %c7_i32_35 = arith.constant 7 : i32
    %100 = arith.subi %c7_i32_35, %c1_i32 : i32
    %101 = arith.index_cast %c1_i32 : i32 to index
    %c0_36 = arith.constant 0 : index
    %c0_37 = arith.constant 0 : index
    %102 = vector.load %arg14[%101, %c0_36, %c0_37] : memref<8x16x768xf32, #tpu.memory_space<vmem>>, vector<1x16x384xf32>
    %103 = vector.shape_cast %102 : vector<1x16x384xf32> to vector<16x384xf32>
    %104 = arith.index_cast %100 : i32 to index
    %c0_38 = arith.constant 0 : index
    %c384_39 = arith.constant 384 : index
    %105 = vector.load %arg14[%104, %c0_38, %c384_39] : memref<8x16x768xf32, #tpu.memory_space<vmem>>, vector<1x16x384xf32>
    %106 = vector.shape_cast %105 : vector<1x16x384xf32> to vector<16x384xf32>
    %107 = arith.truncf %94 : vector<16x128xf32> to vector<16x128xbf16>
    %cst_40 = arith.constant dense<0.000000e+00> : vector<16x384xf32>
    %108 = tpu.matmul %107, %10, %cst_40 {dimension_numbers = #tpu.dot_dimension_numbers<[1], [0], [0], [1], [0, 0, 1, 1], [], []>} : vector<16x128xbf16>, vector<128x384xbf16>, vector<16x384xf32> -> vector<16x384xf32>
    %109 = vector.broadcast %11 : vector<1x384xf32> to vector<16x384xf32>
    %110 = arith.addf %108, %109 : vector<16x384xf32>
    %111 = vector.extract_strided_slice %103 {offsets = [0, 0], sizes = [16, 128], strides = [1, 1]} : vector<16x384xf32> to vector<16x128xf32>
    %112 = vector.extract_strided_slice %110 {offsets = [0, 0], sizes = [16, 128], strides = [1, 1]} : vector<16x384xf32> to vector<16x128xf32>
    %113 = arith.addf %111, %112 : vector<16x128xf32>
    %114 = arith.negf %113 : vector<16x128xf32>
    %115 = math.exp %114 : vector<16x128xf32>
    %cst_41 = arith.constant 1.000000e+00 : f32
    %116 = vector.broadcast %cst_41 : f32 to vector<16x128xf32>
    %117 = arith.addf %116, %115 : vector<16x128xf32>
    %118 = arith.divf %116, %117 : vector<16x128xf32>
    %119 = vector.extract_strided_slice %103 {offsets = [0, 128], sizes = [16, 128], strides = [1, 1]} : vector<16x384xf32> to vector<16x128xf32>
    %120 = vector.extract_strided_slice %110 {offsets = [0, 128], sizes = [16, 128], strides = [1, 1]} : vector<16x384xf32> to vector<16x128xf32>
    %121 = arith.addf %119, %120 : vector<16x128xf32>
    %122 = arith.negf %121 : vector<16x128xf32>
    %123 = math.exp %122 : vector<16x128xf32>
    %cst_42 = arith.constant 1.000000e+00 : f32
    %124 = vector.broadcast %cst_42 : f32 to vector<16x128xf32>
    %125 = arith.addf %124, %123 : vector<16x128xf32>
    %126 = arith.divf %124, %125 : vector<16x128xf32>
    %127 = vector.extract_strided_slice %103 {offsets = [0, 256], sizes = [16, 128], strides = [1, 1]} : vector<16x384xf32> to vector<16x128xf32>
    %128 = vector.extract_strided_slice %110 {offsets = [0, 256], sizes = [16, 128], strides = [1, 1]} : vector<16x384xf32> to vector<16x128xf32>
    %129 = arith.mulf %118, %128 : vector<16x128xf32>
    %130 = arith.addf %127, %129 : vector<16x128xf32>
    %131 = math.tanh %130 : vector<16x128xf32>
    %cst_43 = arith.constant 1.000000e+00 : f32
    %132 = vector.broadcast %cst_43 : f32 to vector<16x128xf32>
    %133 = arith.subf %132, %126 : vector<16x128xf32>
    %134 = arith.mulf %133, %131 : vector<16x128xf32>
    %135 = arith.mulf %126, %94 : vector<16x128xf32>
    %136 = arith.addf %134, %135 : vector<16x128xf32>
    %137 = arith.truncf %99 : vector<16x128xf32> to vector<16x128xbf16>
    %cst_44 = arith.constant dense<0.000000e+00> : vector<16x384xf32>
    %138 = tpu.matmul %137, %12, %cst_44 {dimension_numbers = #tpu.dot_dimension_numbers<[1], [0], [0], [1], [0, 0, 1, 1], [], []>} : vector<16x128xbf16>, vector<128x384xbf16>, vector<16x384xf32> -> vector<16x384xf32>
    %139 = vector.broadcast %13 : vector<1x384xf32> to vector<16x384xf32>
    %140 = arith.addf %138, %139 : vector<16x384xf32>
    %141 = vector.extract_strided_slice %106 {offsets = [0, 0], sizes = [16, 128], strides = [1, 1]} : vector<16x384xf32> to vector<16x128xf32>
    %142 = vector.extract_strided_slice %140 {offsets = [0, 0], sizes = [16, 128], strides = [1, 1]} : vector<16x384xf32> to vector<16x128xf32>
    %143 = arith.addf %141, %142 : vector<16x128xf32>
    %144 = arith.negf %143 : vector<16x128xf32>
    %145 = math.exp %144 : vector<16x128xf32>
    %cst_45 = arith.constant 1.000000e+00 : f32
    %146 = vector.broadcast %cst_45 : f32 to vector<16x128xf32>
    %147 = arith.addf %146, %145 : vector<16x128xf32>
    %148 = arith.divf %146, %147 : vector<16x128xf32>
    %149 = vector.extract_strided_slice %106 {offsets = [0, 128], sizes = [16, 128], strides = [1, 1]} : vector<16x384xf32> to vector<16x128xf32>
    %150 = vector.extract_strided_slice %140 {offsets = [0, 128], sizes = [16, 128], strides = [1, 1]} : vector<16x384xf32> to vector<16x128xf32>
    %151 = arith.addf %149, %150 : vector<16x128xf32>
    %152 = arith.negf %151 : vector<16x128xf32>
    %153 = math.exp %152 : vector<16x128xf32>
    %cst_46 = arith.constant 1.000000e+00 : f32
    %154 = vector.broadcast %cst_46 : f32 to vector<16x128xf32>
    %155 = arith.addf %154, %153 : vector<16x128xf32>
    %156 = arith.divf %154, %155 : vector<16x128xf32>
    %157 = vector.extract_strided_slice %106 {offsets = [0, 256], sizes = [16, 128], strides = [1, 1]} : vector<16x384xf32> to vector<16x128xf32>
    %158 = vector.extract_strided_slice %140 {offsets = [0, 256], sizes = [16, 128], strides = [1, 1]} : vector<16x384xf32> to vector<16x128xf32>
    %159 = arith.mulf %148, %158 : vector<16x128xf32>
    %160 = arith.addf %157, %159 : vector<16x128xf32>
    %161 = math.tanh %160 : vector<16x128xf32>
    %cst_47 = arith.constant 1.000000e+00 : f32
    %162 = vector.broadcast %cst_47 : f32 to vector<16x128xf32>
    %163 = arith.subf %162, %156 : vector<16x128xf32>
    %164 = arith.mulf %163, %161 : vector<16x128xf32>
    %165 = arith.mulf %156, %99 : vector<16x128xf32>
    %166 = arith.addf %164, %165 : vector<16x128xf32>
    %167 = arith.index_cast %c1_i32 : i32 to index
    %c0_48 = arith.constant 0 : index
    %c0_49 = arith.constant 0 : index
    %168 = vector.load %arg15[%167, %c0_48, %c0_49] : memref<8x16x128xf32, #tpu.memory_space<vmem>>, vector<1x16x128xf32>
    %169 = vector.shape_cast %168 : vector<1x16x128xf32> to vector<16x128xf32>
    %170 = vector.shape_cast %136 : vector<16x128xf32> to vector<1x16x128xf32>
    tpu.vector_store %arg15[%167, %c0_48, %c0_49], %170 {strides = array<i32>} : memref<8x16x128xf32, #tpu.memory_space<vmem>>, vector<1x16x128xf32>,
    %171 = arith.index_cast %100 : i32 to index
    %c0_50 = arith.constant 0 : index
    %c0_51 = arith.constant 0 : index
    %172 = vector.load %arg16[%171, %c0_50, %c0_51] : memref<8x16x128xf32, #tpu.memory_space<vmem>>, vector<1x16x128xf32>
    %173 = vector.shape_cast %172 : vector<1x16x128xf32> to vector<16x128xf32>
    %174 = vector.shape_cast %166 : vector<16x128xf32> to vector<1x16x128xf32>
    tpu.vector_store %arg16[%171, %c0_50, %c0_51], %174 {strides = array<i32>} : memref<8x16x128xf32, #tpu.memory_space<vmem>>, vector<1x16x128xf32>,
    %175 = vector.broadcast %c1_i32 : i32 to vector<16x1xi32>
    %176 = arith.cmpi slt, %175, %9 : vector<16x1xi32>
    %177 = vector.shape_cast %176 : vector<16x1xi1> to vector<16x1xi1>
    %178 = vector.broadcast %177 : vector<16x1xi1> to vector<16x128xi1>
    %179 = arith.select %178, %136, %94 : vector<16x128xi1>, vector<16x128xf32>
    %180 = vector.broadcast %100 : i32 to vector<16x1xi32>
    %181 = arith.cmpi slt, %180, %9 : vector<16x1xi32>
    %182 = vector.shape_cast %181 : vector<16x1xi1> to vector<16x1xi1>
    %183 = vector.broadcast %182 : vector<16x1xi1> to vector<16x128xi1>
    %184 = arith.select %183, %166, %99 : vector<16x128xi1>, vector<16x128xf32>
    %c2_i32 = arith.constant 2 : i32
    %c7_i32_52 = arith.constant 7 : i32
    %185 = arith.subi %c7_i32_52, %c2_i32 : i32
    %186 = arith.index_cast %c2_i32 : i32 to index
    %c0_53 = arith.constant 0 : index
    %c0_54 = arith.constant 0 : index
    %187 = vector.load %arg14[%186, %c0_53, %c0_54] : memref<8x16x768xf32, #tpu.memory_space<vmem>>, vector<1x16x384xf32>
    %188 = vector.shape_cast %187 : vector<1x16x384xf32> to vector<16x384xf32>
    %189 = arith.index_cast %185 : i32 to index
    %c0_55 = arith.constant 0 : index
    %c384_56 = arith.constant 384 : index
    %190 = vector.load %arg14[%189, %c0_55, %c384_56] : memref<8x16x768xf32, #tpu.memory_space<vmem>>, vector<1x16x384xf32>
    %191 = vector.shape_cast %190 : vector<1x16x384xf32> to vector<16x384xf32>
    %192 = arith.truncf %179 : vector<16x128xf32> to vector<16x128xbf16>
    %cst_57 = arith.constant dense<0.000000e+00> : vector<16x384xf32>
    %193 = tpu.matmul %192, %10, %cst_57 {dimension_numbers = #tpu.dot_dimension_numbers<[1], [0], [0], [1], [0, 0, 1, 1], [], []>} : vector<16x128xbf16>, vector<128x384xbf16>, vector<16x384xf32> -> vector<16x384xf32>
    %194 = vector.broadcast %11 : vector<1x384xf32> to vector<16x384xf32>
    %195 = arith.addf %193, %194 : vector<16x384xf32>
    %196 = vector.extract_strided_slice %188 {offsets = [0, 0], sizes = [16, 128], strides = [1, 1]} : vector<16x384xf32> to vector<16x128xf32>
    %197 = vector.extract_strided_slice %195 {offsets = [0, 0], sizes = [16, 128], strides = [1, 1]} : vector<16x384xf32> to vector<16x128xf32>
    %198 = arith.addf %196, %197 : vector<16x128xf32>
    %199 = arith.negf %198 : vector<16x128xf32>
    %200 = math.exp %199 : vector<16x128xf32>
    %cst_58 = arith.constant 1.000000e+00 : f32
    %201 = vector.broadcast %cst_58 : f32 to vector<16x128xf32>
    %202 = arith.addf %201, %200 : vector<16x128xf32>
    %203 = arith.divf %201, %202 : vector<16x128xf32>
    %204 = vector.extract_strided_slice %188 {offsets = [0, 128], sizes = [16, 128], strides = [1, 1]} : vector<16x384xf32> to vector<16x128xf32>
    %205 = vector.extract_strided_slice %195 {offsets = [0, 128], sizes = [16, 128], strides = [1, 1]} : vector<16x384xf32> to vector<16x128xf32>
    %206 = arith.addf %204, %205 : vector<16x128xf32>
    %207 = arith.negf %206 : vector<16x128xf32>
    %208 = math.exp %207 : vector<16x128xf32>
    %cst_59 = arith.constant 1.000000e+00 : f32
    %209 = vector.broadcast %cst_59 : f32 to vector<16x128xf32>
    %210 = arith.addf %209, %208 : vector<16x128xf32>
    %211 = arith.divf %209, %210 : vector<16x128xf32>
    %212 = vector.extract_strided_slice %188 {offsets = [0, 256], sizes = [16, 128], strides = [1, 1]} : vector<16x384xf32> to vector<16x128xf32>
    %213 = vector.extract_strided_slice %195 {offsets = [0, 256], sizes = [16, 128], strides = [1, 1]} : vector<16x384xf32> to vector<16x128xf32>
    %214 = arith.mulf %203, %213 : vector<16x128xf32>
    %215 = arith.addf %212, %214 : vector<16x128xf32>
    %216 = math.tanh %215 : vector<16x128xf32>
    %cst_60 = arith.constant 1.000000e+00 : f32
    %217 = vector.broadcast %cst_60 : f32 to vector<16x128xf32>
    %218 = arith.subf %217, %211 : vector<16x128xf32>
    %219 = arith.mulf %218, %216 : vector<16x128xf32>
    %220 = arith.mulf %211, %179 : vector<16x128xf32>
    %221 = arith.addf %219, %220 : vector<16x128xf32>
    %222 = arith.truncf %184 : vector<16x128xf32> to vector<16x128xbf16>
    %cst_61 = arith.constant dense<0.000000e+00> : vector<16x384xf32>
    %223 = tpu.matmul %222, %12, %cst_61 {dimension_numbers = #tpu.dot_dimension_numbers<[1], [0], [0], [1], [0, 0, 1, 1], [], []>} : vector<16x128xbf16>, vector<128x384xbf16>, vector<16x384xf32> -> vector<16x384xf32>
    %224 = vector.broadcast %13 : vector<1x384xf32> to vector<16x384xf32>
    %225 = arith.addf %223, %224 : vector<16x384xf32>
    %226 = vector.extract_strided_slice %191 {offsets = [0, 0], sizes = [16, 128], strides = [1, 1]} : vector<16x384xf32> to vector<16x128xf32>
    %227 = vector.extract_strided_slice %225 {offsets = [0, 0], sizes = [16, 128], strides = [1, 1]} : vector<16x384xf32> to vector<16x128xf32>
    %228 = arith.addf %226, %227 : vector<16x128xf32>
    %229 = arith.negf %228 : vector<16x128xf32>
    %230 = math.exp %229 : vector<16x128xf32>
    %cst_62 = arith.constant 1.000000e+00 : f32
    %231 = vector.broadcast %cst_62 : f32 to vector<16x128xf32>
    %232 = arith.addf %231, %230 : vector<16x128xf32>
    %233 = arith.divf %231, %232 : vector<16x128xf32>
    %234 = vector.extract_strided_slice %191 {offsets = [0, 128], sizes = [16, 128], strides = [1, 1]} : vector<16x384xf32> to vector<16x128xf32>
    %235 = vector.extract_strided_slice %225 {offsets = [0, 128], sizes = [16, 128], strides = [1, 1]} : vector<16x384xf32> to vector<16x128xf32>
    %236 = arith.addf %234, %235 : vector<16x128xf32>
    %237 = arith.negf %236 : vector<16x128xf32>
    %238 = math.exp %237 : vector<16x128xf32>
    %cst_63 = arith.constant 1.000000e+00 : f32
    %239 = vector.broadcast %cst_63 : f32 to vector<16x128xf32>
    %240 = arith.addf %239, %238 : vector<16x128xf32>
    %241 = arith.divf %239, %240 : vector<16x128xf32>
    %242 = vector.extract_strided_slice %191 {offsets = [0, 256], sizes = [16, 128], strides = [1, 1]} : vector<16x384xf32> to vector<16x128xf32>
    %243 = vector.extract_strided_slice %225 {offsets = [0, 256], sizes = [16, 128], strides = [1, 1]} : vector<16x384xf32> to vector<16x128xf32>
    %244 = arith.mulf %233, %243 : vector<16x128xf32>
    %245 = arith.addf %242, %244 : vector<16x128xf32>
    %246 = math.tanh %245 : vector<16x128xf32>
    %cst_64 = arith.constant 1.000000e+00 : f32
    %247 = vector.broadcast %cst_64 : f32 to vector<16x128xf32>
    %248 = arith.subf %247, %241 : vector<16x128xf32>
    %249 = arith.mulf %248, %246 : vector<16x128xf32>
    %250 = arith.mulf %241, %184 : vector<16x128xf32>
    %251 = arith.addf %249, %250 : vector<16x128xf32>
    %252 = arith.index_cast %c2_i32 : i32 to index
    %c0_65 = arith.constant 0 : index
    %c0_66 = arith.constant 0 : index
    %253 = vector.load %arg15[%252, %c0_65, %c0_66] : memref<8x16x128xf32, #tpu.memory_space<vmem>>, vector<1x16x128xf32>
    %254 = vector.shape_cast %253 : vector<1x16x128xf32> to vector<16x128xf32>
    %255 = vector.shape_cast %221 : vector<16x128xf32> to vector<1x16x128xf32>
    tpu.vector_store %arg15[%252, %c0_65, %c0_66], %255 {strides = array<i32>} : memref<8x16x128xf32, #tpu.memory_space<vmem>>, vector<1x16x128xf32>,
    %256 = arith.index_cast %185 : i32 to index
    %c0_67 = arith.constant 0 : index
    %c0_68 = arith.constant 0 : index
    %257 = vector.load %arg16[%256, %c0_67, %c0_68] : memref<8x16x128xf32, #tpu.memory_space<vmem>>, vector<1x16x128xf32>
    %258 = vector.shape_cast %257 : vector<1x16x128xf32> to vector<16x128xf32>
    %259 = vector.shape_cast %251 : vector<16x128xf32> to vector<1x16x128xf32>
    tpu.vector_store %arg16[%256, %c0_67, %c0_68], %259 {strides = array<i32>} : memref<8x16x128xf32, #tpu.memory_space<vmem>>, vector<1x16x128xf32>,
    %260 = vector.broadcast %c2_i32 : i32 to vector<16x1xi32>
    %261 = arith.cmpi slt, %260, %9 : vector<16x1xi32>
    %262 = vector.shape_cast %261 : vector<16x1xi1> to vector<16x1xi1>
    %263 = vector.broadcast %262 : vector<16x1xi1> to vector<16x128xi1>
    %264 = arith.select %263, %221, %179 : vector<16x128xi1>, vector<16x128xf32>
    %265 = vector.broadcast %185 : i32 to vector<16x1xi32>
    %266 = arith.cmpi slt, %265, %9 : vector<16x1xi32>
    %267 = vector.shape_cast %266 : vector<16x1xi1> to vector<16x1xi1>
    %268 = vector.broadcast %267 : vector<16x1xi1> to vector<16x128xi1>
    %269 = arith.select %268, %251, %184 : vector<16x128xi1>, vector<16x128xf32>
    %c3_i32 = arith.constant 3 : i32
    %c7_i32_69 = arith.constant 7 : i32
    %270 = arith.subi %c7_i32_69, %c3_i32 : i32
    %271 = arith.index_cast %c3_i32 : i32 to index
    %c0_70 = arith.constant 0 : index
    %c0_71 = arith.constant 0 : index
    %272 = vector.load %arg14[%271, %c0_70, %c0_71] : memref<8x16x768xf32, #tpu.memory_space<vmem>>, vector<1x16x384xf32>
    %273 = vector.shape_cast %272 : vector<1x16x384xf32> to vector<16x384xf32>
    %274 = arith.index_cast %270 : i32 to index
    %c0_72 = arith.constant 0 : index
    %c384_73 = arith.constant 384 : index
    %275 = vector.load %arg14[%274, %c0_72, %c384_73] : memref<8x16x768xf32, #tpu.memory_space<vmem>>, vector<1x16x384xf32>
    %276 = vector.shape_cast %275 : vector<1x16x384xf32> to vector<16x384xf32>
    %277 = arith.truncf %264 : vector<16x128xf32> to vector<16x128xbf16>
    %cst_74 = arith.constant dense<0.000000e+00> : vector<16x384xf32>
    %278 = tpu.matmul %277, %10, %cst_74 {dimension_numbers = #tpu.dot_dimension_numbers<[1], [0], [0], [1], [0, 0, 1, 1], [], []>} : vector<16x128xbf16>, vector<128x384xbf16>, vector<16x384xf32> -> vector<16x384xf32>
    %279 = vector.broadcast %11 : vector<1x384xf32> to vector<16x384xf32>
    %280 = arith.addf %278, %279 : vector<16x384xf32>
    %281 = vector.extract_strided_slice %273 {offsets = [0, 0], sizes = [16, 128], strides = [1, 1]} : vector<16x384xf32> to vector<16x128xf32>
    %282 = vector.extract_strided_slice %280 {offsets = [0, 0], sizes = [16, 128], strides = [1, 1]} : vector<16x384xf32> to vector<16x128xf32>
    %283 = arith.addf %281, %282 : vector<16x128xf32>
    %284 = arith.negf %283 : vector<16x128xf32>
    %285 = math.exp %284 : vector<16x128xf32>
    %cst_75 = arith.constant 1.000000e+00 : f32
    %286 = vector.broadcast %cst_75 : f32 to vector<16x128xf32>
    %287 = arith.addf %286, %285 : vector<16x128xf32>
    %288 = arith.divf %286, %287 : vector<16x128xf32>
    %289 = vector.extract_strided_slice %273 {offsets = [0, 128], sizes = [16, 128], strides = [1, 1]} : vector<16x384xf32> to vector<16x128xf32>
    %290 = vector.extract_strided_slice %280 {offsets = [0, 128], sizes = [16, 128], strides = [1, 1]} : vector<16x384xf32> to vector<16x128xf32>
    %291 = arith.addf %289, %290 : vector<16x128xf32>
    %292 = arith.negf %291 : vector<16x128xf32>
    %293 = math.exp %292 : vector<16x128xf32>
    %cst_76 = arith.constant 1.000000e+00 : f32
    %294 = vector.broadcast %cst_76 : f32 to vector<16x128xf32>
    %295 = arith.addf %294, %293 : vector<16x128xf32>
    %296 = arith.divf %294, %295 : vector<16x128xf32>
    %297 = vector.extract_strided_slice %273 {offsets = [0, 256], sizes = [16, 128], strides = [1, 1]} : vector<16x384xf32> to vector<16x128xf32>
    %298 = vector.extract_strided_slice %280 {offsets = [0, 256], sizes = [16, 128], strides = [1, 1]} : vector<16x384xf32> to vector<16x128xf32>
    %299 = arith.mulf %288, %298 : vector<16x128xf32>
    %300 = arith.addf %297, %299 : vector<16x128xf32>
    %301 = math.tanh %300 : vector<16x128xf32>
    %cst_77 = arith.constant 1.000000e+00 : f32
    %302 = vector.broadcast %cst_77 : f32 to vector<16x128xf32>
    %303 = arith.subf %302, %296 : vector<16x128xf32>
    %304 = arith.mulf %303, %301 : vector<16x128xf32>
    %305 = arith.mulf %296, %264 : vector<16x128xf32>
    %306 = arith.addf %304, %305 : vector<16x128xf32>
    %307 = arith.truncf %269 : vector<16x128xf32> to vector<16x128xbf16>
    %cst_78 = arith.constant dense<0.000000e+00> : vector<16x384xf32>
    %308 = tpu.matmul %307, %12, %cst_78 {dimension_numbers = #tpu.dot_dimension_numbers<[1], [0], [0], [1], [0, 0, 1, 1], [], []>} : vector<16x128xbf16>, vector<128x384xbf16>, vector<16x384xf32> -> vector<16x384xf32>
    %309 = vector.broadcast %13 : vector<1x384xf32> to vector<16x384xf32>
    %310 = arith.addf %308, %309 : vector<16x384xf32>
    %311 = vector.extract_strided_slice %276 {offsets = [0, 0], sizes = [16, 128], strides = [1, 1]} : vector<16x384xf32> to vector<16x128xf32>
    %312 = vector.extract_strided_slice %310 {offsets = [0, 0], sizes = [16, 128], strides = [1, 1]} : vector<16x384xf32> to vector<16x128xf32>
    %313 = arith.addf %311, %312 : vector<16x128xf32>
    %314 = arith.negf %313 : vector<16x128xf32>
    %315 = math.exp %314 : vector<16x128xf32>
    %cst_79 = arith.constant 1.000000e+00 : f32
    %316 = vector.broadcast %cst_79 : f32 to vector<16x128xf32>
    %317 = arith.addf %316, %315 : vector<16x128xf32>
    %318 = arith.divf %316, %317 : vector<16x128xf32>
    %319 = vector.extract_strided_slice %276 {offsets = [0, 128], sizes = [16, 128], strides = [1, 1]} : vector<16x384xf32> to vector<16x128xf32>
    %320 = vector.extract_strided_slice %310 {offsets = [0, 128], sizes = [16, 128], strides = [1, 1]} : vector<16x384xf32> to vector<16x128xf32>
    %321 = arith.addf %319, %320 : vector<16x128xf32>
    %322 = arith.negf %321 : vector<16x128xf32>
    %323 = math.exp %322 : vector<16x128xf32>
    %cst_80 = arith.constant 1.000000e+00 : f32
    %324 = vector.broadcast %cst_80 : f32 to vector<16x128xf32>
    %325 = arith.addf %324, %323 : vector<16x128xf32>
    %326 = arith.divf %324, %325 : vector<16x128xf32>
    %327 = vector.extract_strided_slice %276 {offsets = [0, 256], sizes = [16, 128], strides = [1, 1]} : vector<16x384xf32> to vector<16x128xf32>
    %328 = vector.extract_strided_slice %310 {offsets = [0, 256], sizes = [16, 128], strides = [1, 1]} : vector<16x384xf32> to vector<16x128xf32>
    %329 = arith.mulf %318, %328 : vector<16x128xf32>
    %330 = arith.addf %327, %329 : vector<16x128xf32>
    %331 = math.tanh %330 : vector<16x128xf32>
    %cst_81 = arith.constant 1.000000e+00 : f32
    %332 = vector.broadcast %cst_81 : f32 to vector<16x128xf32>
    %333 = arith.subf %332, %326 : vector<16x128xf32>
    %334 = arith.mulf %333, %331 : vector<16x128xf32>
    %335 = arith.mulf %326, %269 : vector<16x128xf32>
    %336 = arith.addf %334, %335 : vector<16x128xf32>
    %337 = arith.index_cast %c3_i32 : i32 to index
    %c0_82 = arith.constant 0 : index
    %c0_83 = arith.constant 0 : index
    %338 = vector.load %arg15[%337, %c0_82, %c0_83] : memref<8x16x128xf32, #tpu.memory_space<vmem>>, vector<1x16x128xf32>
    %339 = vector.shape_cast %338 : vector<1x16x128xf32> to vector<16x128xf32>
    %340 = vector.shape_cast %306 : vector<16x128xf32> to vector<1x16x128xf32>
    tpu.vector_store %arg15[%337, %c0_82, %c0_83], %340 {strides = array<i32>} : memref<8x16x128xf32, #tpu.memory_space<vmem>>, vector<1x16x128xf32>,
    %341 = arith.index_cast %270 : i32 to index
    %c0_84 = arith.constant 0 : index
    %c0_85 = arith.constant 0 : index
    %342 = vector.load %arg16[%341, %c0_84, %c0_85] : memref<8x16x128xf32, #tpu.memory_space<vmem>>, vector<1x16x128xf32>
    %343 = vector.shape_cast %342 : vector<1x16x128xf32> to vector<16x128xf32>
    %344 = vector.shape_cast %336 : vector<16x128xf32> to vector<1x16x128xf32>
    tpu.vector_store %arg16[%341, %c0_84, %c0_85], %344 {strides = array<i32>} : memref<8x16x128xf32, #tpu.memory_space<vmem>>, vector<1x16x128xf32>,
    %345 = vector.broadcast %c3_i32 : i32 to vector<16x1xi32>
    %346 = arith.cmpi slt, %345, %9 : vector<16x1xi32>
    %347 = vector.shape_cast %346 : vector<16x1xi1> to vector<16x1xi1>
    %348 = vector.broadcast %347 : vector<16x1xi1> to vector<16x128xi1>
    %349 = arith.select %348, %306, %264 : vector<16x128xi1>, vector<16x128xf32>
    %350 = vector.broadcast %270 : i32 to vector<16x1xi32>
    %351 = arith.cmpi slt, %350, %9 : vector<16x1xi32>
    %352 = vector.shape_cast %351 : vector<16x1xi1> to vector<16x1xi1>
    %353 = vector.broadcast %352 : vector<16x1xi1> to vector<16x128xi1>
    %354 = arith.select %353, %336, %269 : vector<16x128xi1>, vector<16x128xf32>
    %c4_i32 = arith.constant 4 : i32
    %c7_i32_86 = arith.constant 7 : i32
    %355 = arith.subi %c7_i32_86, %c4_i32 : i32
    %356 = arith.index_cast %c4_i32 : i32 to index
    %c0_87 = arith.constant 0 : index
    %c0_88 = arith.constant 0 : index
    %357 = vector.load %arg14[%356, %c0_87, %c0_88] : memref<8x16x768xf32, #tpu.memory_space<vmem>>, vector<1x16x384xf32>
    %358 = vector.shape_cast %357 : vector<1x16x384xf32> to vector<16x384xf32>
    %359 = arith.index_cast %355 : i32 to index
    %c0_89 = arith.constant 0 : index
    %c384_90 = arith.constant 384 : index
    %360 = vector.load %arg14[%359, %c0_89, %c384_90] : memref<8x16x768xf32, #tpu.memory_space<vmem>>, vector<1x16x384xf32>
    %361 = vector.shape_cast %360 : vector<1x16x384xf32> to vector<16x384xf32>
    %362 = arith.truncf %349 : vector<16x128xf32> to vector<16x128xbf16>
    %cst_91 = arith.constant dense<0.000000e+00> : vector<16x384xf32>
    %363 = tpu.matmul %362, %10, %cst_91 {dimension_numbers = #tpu.dot_dimension_numbers<[1], [0], [0], [1], [0, 0, 1, 1], [], []>} : vector<16x128xbf16>, vector<128x384xbf16>, vector<16x384xf32> -> vector<16x384xf32>
    %364 = vector.broadcast %11 : vector<1x384xf32> to vector<16x384xf32>
    %365 = arith.addf %363, %364 : vector<16x384xf32>
    %366 = vector.extract_strided_slice %358 {offsets = [0, 0], sizes = [16, 128], strides = [1, 1]} : vector<16x384xf32> to vector<16x128xf32>
    %367 = vector.extract_strided_slice %365 {offsets = [0, 0], sizes = [16, 128], strides = [1, 1]} : vector<16x384xf32> to vector<16x128xf32>
    %368 = arith.addf %366, %367 : vector<16x128xf32>
    %369 = arith.negf %368 : vector<16x128xf32>
    %370 = math.exp %369 : vector<16x128xf32>
    %cst_92 = arith.constant 1.000000e+00 : f32
    %371 = vector.broadcast %cst_92 : f32 to vector<16x128xf32>
    %372 = arith.addf %371, %370 : vector<16x128xf32>
    %373 = arith.divf %371, %372 : vector<16x128xf32>
    %374 = vector.extract_strided_slice %358 {offsets = [0, 128], sizes = [16, 128], strides = [1, 1]} : vector<16x384xf32> to vector<16x128xf32>
    %375 = vector.extract_strided_slice %365 {offsets = [0, 128], sizes = [16, 128], strides = [1, 1]} : vector<16x384xf32> to vector<16x128xf32>
    %376 = arith.addf %374, %375 : vector<16x128xf32>
    %377 = arith.negf %376 : vector<16x128xf32>
    %378 = math.exp %377 : vector<16x128xf32>
    %cst_93 = arith.constant 1.000000e+00 : f32
    %379 = vector.broadcast %cst_93 : f32 to vector<16x128xf32>
    %380 = arith.addf %379, %378 : vector<16x128xf32>
    %381 = arith.divf %379, %380 : vector<16x128xf32>
    %382 = vector.extract_strided_slice %358 {offsets = [0, 256], sizes = [16, 128], strides = [1, 1]} : vector<16x384xf32> to vector<16x128xf32>
    %383 = vector.extract_strided_slice %365 {offsets = [0, 256], sizes = [16, 128], strides = [1, 1]} : vector<16x384xf32> to vector<16x128xf32>
    %384 = arith.mulf %373, %383 : vector<16x128xf32>
    %385 = arith.addf %382, %384 : vector<16x128xf32>
    %386 = math.tanh %385 : vector<16x128xf32>
    %cst_94 = arith.constant 1.000000e+00 : f32
    %387 = vector.broadcast %cst_94 : f32 to vector<16x128xf32>
    %388 = arith.subf %387, %381 : vector<16x128xf32>
    %389 = arith.mulf %388, %386 : vector<16x128xf32>
    %390 = arith.mulf %381, %349 : vector<16x128xf32>
    %391 = arith.addf %389, %390 : vector<16x128xf32>
    %392 = arith.truncf %354 : vector<16x128xf32> to vector<16x128xbf16>
    %cst_95 = arith.constant dense<0.000000e+00> : vector<16x384xf32>
    %393 = tpu.matmul %392, %12, %cst_95 {dimension_numbers = #tpu.dot_dimension_numbers<[1], [0], [0], [1], [0, 0, 1, 1], [], []>} : vector<16x128xbf16>, vector<128x384xbf16>, vector<16x384xf32> -> vector<16x384xf32>
    %394 = vector.broadcast %13 : vector<1x384xf32> to vector<16x384xf32>
    %395 = arith.addf %393, %394 : vector<16x384xf32>
    %396 = vector.extract_strided_slice %361 {offsets = [0, 0], sizes = [16, 128], strides = [1, 1]} : vector<16x384xf32> to vector<16x128xf32>
    %397 = vector.extract_strided_slice %395 {offsets = [0, 0], sizes = [16, 128], strides = [1, 1]} : vector<16x384xf32> to vector<16x128xf32>
    %398 = arith.addf %396, %397 : vector<16x128xf32>
    %399 = arith.negf %398 : vector<16x128xf32>
    %400 = math.exp %399 : vector<16x128xf32>
    %cst_96 = arith.constant 1.000000e+00 : f32
    %401 = vector.broadcast %cst_96 : f32 to vector<16x128xf32>
    %402 = arith.addf %401, %400 : vector<16x128xf32>
    %403 = arith.divf %401, %402 : vector<16x128xf32>
    %404 = vector.extract_strided_slice %361 {offsets = [0, 128], sizes = [16, 128], strides = [1, 1]} : vector<16x384xf32> to vector<16x128xf32>
    %405 = vector.extract_strided_slice %395 {offsets = [0, 128], sizes = [16, 128], strides = [1, 1]} : vector<16x384xf32> to vector<16x128xf32>
    %406 = arith.addf %404, %405 : vector<16x128xf32>
    %407 = arith.negf %406 : vector<16x128xf32>
    %408 = math.exp %407 : vector<16x128xf32>
    %cst_97 = arith.constant 1.000000e+00 : f32
    %409 = vector.broadcast %cst_97 : f32 to vector<16x128xf32>
    %410 = arith.addf %409, %408 : vector<16x128xf32>
    %411 = arith.divf %409, %410 : vector<16x128xf32>
    %412 = vector.extract_strided_slice %361 {offsets = [0, 256], sizes = [16, 128], strides = [1, 1]} : vector<16x384xf32> to vector<16x128xf32>
    %413 = vector.extract_strided_slice %395 {offsets = [0, 256], sizes = [16, 128], strides = [1, 1]} : vector<16x384xf32> to vector<16x128xf32>
    %414 = arith.mulf %403, %413 : vector<16x128xf32>
    %415 = arith.addf %412, %414 : vector<16x128xf32>
    %416 = math.tanh %415 : vector<16x128xf32>
    %cst_98 = arith.constant 1.000000e+00 : f32
    %417 = vector.broadcast %cst_98 : f32 to vector<16x128xf32>
    %418 = arith.subf %417, %411 : vector<16x128xf32>
    %419 = arith.mulf %418, %416 : vector<16x128xf32>
    %420 = arith.mulf %411, %354 : vector<16x128xf32>
    %421 = arith.addf %419, %420 : vector<16x128xf32>
    %422 = arith.index_cast %c4_i32 : i32 to index
    %c0_99 = arith.constant 0 : index
    %c0_100 = arith.constant 0 : index
    %423 = vector.load %arg15[%422, %c0_99, %c0_100] : memref<8x16x128xf32, #tpu.memory_space<vmem>>, vector<1x16x128xf32>
    %424 = vector.shape_cast %423 : vector<1x16x128xf32> to vector<16x128xf32>
    %425 = vector.shape_cast %391 : vector<16x128xf32> to vector<1x16x128xf32>
    tpu.vector_store %arg15[%422, %c0_99, %c0_100], %425 {strides = array<i32>} : memref<8x16x128xf32, #tpu.memory_space<vmem>>, vector<1x16x128xf32>,
    %426 = arith.index_cast %355 : i32 to index
    %c0_101 = arith.constant 0 : index
    %c0_102 = arith.constant 0 : index
    %427 = vector.load %arg16[%426, %c0_101, %c0_102] : memref<8x16x128xf32, #tpu.memory_space<vmem>>, vector<1x16x128xf32>
    %428 = vector.shape_cast %427 : vector<1x16x128xf32> to vector<16x128xf32>
    %429 = vector.shape_cast %421 : vector<16x128xf32> to vector<1x16x128xf32>
    tpu.vector_store %arg16[%426, %c0_101, %c0_102], %429 {strides = array<i32>} : memref<8x16x128xf32, #tpu.memory_space<vmem>>, vector<1x16x128xf32>,
    %430 = vector.broadcast %c4_i32 : i32 to vector<16x1xi32>
    %431 = arith.cmpi slt, %430, %9 : vector<16x1xi32>
    %432 = vector.shape_cast %431 : vector<16x1xi1> to vector<16x1xi1>
    %433 = vector.broadcast %432 : vector<16x1xi1> to vector<16x128xi1>
    %434 = arith.select %433, %391, %349 : vector<16x128xi1>, vector<16x128xf32>
    %435 = vector.broadcast %355 : i32 to vector<16x1xi32>
    %436 = arith.cmpi slt, %435, %9 : vector<16x1xi32>
    %437 = vector.shape_cast %436 : vector<16x1xi1> to vector<16x1xi1>
    %438 = vector.broadcast %437 : vector<16x1xi1> to vector<16x128xi1>
    %439 = arith.select %438, %421, %354 : vector<16x128xi1>, vector<16x128xf32>
    %c5_i32 = arith.constant 5 : i32
    %c7_i32_103 = arith.constant 7 : i32
    %440 = arith.subi %c7_i32_103, %c5_i32 : i32
    %441 = arith.index_cast %c5_i32 : i32 to index
    %c0_104 = arith.constant 0 : index
    %c0_105 = arith.constant 0 : index
    %442 = vector.load %arg14[%441, %c0_104, %c0_105] : memref<8x16x768xf32, #tpu.memory_space<vmem>>, vector<1x16x384xf32>
    %443 = vector.shape_cast %442 : vector<1x16x384xf32> to vector<16x384xf32>
    %444 = arith.index_cast %440 : i32 to index
    %c0_106 = arith.constant 0 : index
    %c384_107 = arith.constant 384 : index
    %445 = vector.load %arg14[%444, %c0_106, %c384_107] : memref<8x16x768xf32, #tpu.memory_space<vmem>>, vector<1x16x384xf32>
    %446 = vector.shape_cast %445 : vector<1x16x384xf32> to vector<16x384xf32>
    %447 = arith.truncf %434 : vector<16x128xf32> to vector<16x128xbf16>
    %cst_108 = arith.constant dense<0.000000e+00> : vector<16x384xf32>
    %448 = tpu.matmul %447, %10, %cst_108 {dimension_numbers = #tpu.dot_dimension_numbers<[1], [0], [0], [1], [0, 0, 1, 1], [], []>} : vector<16x128xbf16>, vector<128x384xbf16>, vector<16x384xf32> -> vector<16x384xf32>
    %449 = vector.broadcast %11 : vector<1x384xf32> to vector<16x384xf32>
    %450 = arith.addf %448, %449 : vector<16x384xf32>
    %451 = vector.extract_strided_slice %443 {offsets = [0, 0], sizes = [16, 128], strides = [1, 1]} : vector<16x384xf32> to vector<16x128xf32>
    %452 = vector.extract_strided_slice %450 {offsets = [0, 0], sizes = [16, 128], strides = [1, 1]} : vector<16x384xf32> to vector<16x128xf32>
    %453 = arith.addf %451, %452 : vector<16x128xf32>
    %454 = arith.negf %453 : vector<16x128xf32>
    %455 = math.exp %454 : vector<16x128xf32>
    %cst_109 = arith.constant 1.000000e+00 : f32
    %456 = vector.broadcast %cst_109 : f32 to vector<16x128xf32>
    %457 = arith.addf %456, %455 : vector<16x128xf32>
    %458 = arith.divf %456, %457 : vector<16x128xf32>
    %459 = vector.extract_strided_slice %443 {offsets = [0, 128], sizes = [16, 128], strides = [1, 1]} : vector<16x384xf32> to vector<16x128xf32>
    %460 = vector.extract_strided_slice %450 {offsets = [0, 128], sizes = [16, 128], strides = [1, 1]} : vector<16x384xf32> to vector<16x128xf32>
    %461 = arith.addf %459, %460 : vector<16x128xf32>
    %462 = arith.negf %461 : vector<16x128xf32>
    %463 = math.exp %462 : vector<16x128xf32>
    %cst_110 = arith.constant 1.000000e+00 : f32
    %464 = vector.broadcast %cst_110 : f32 to vector<16x128xf32>
    %465 = arith.addf %464, %463 : vector<16x128xf32>
    %466 = arith.divf %464, %465 : vector<16x128xf32>
    %467 = vector.extract_strided_slice %443 {offsets = [0, 256], sizes = [16, 128], strides = [1, 1]} : vector<16x384xf32> to vector<16x128xf32>
    %468 = vector.extract_strided_slice %450 {offsets = [0, 256], sizes = [16, 128], strides = [1, 1]} : vector<16x384xf32> to vector<16x128xf32>
    %469 = arith.mulf %458, %468 : vector<16x128xf32>
    %470 = arith.addf %467, %469 : vector<16x128xf32>
    %471 = math.tanh %470 : vector<16x128xf32>
    %cst_111 = arith.constant 1.000000e+00 : f32
    %472 = vector.broadcast %cst_111 : f32 to vector<16x128xf32>
    %473 = arith.subf %472, %466 : vector<16x128xf32>
    %474 = arith.mulf %473, %471 : vector<16x128xf32>
    %475 = arith.mulf %466, %434 : vector<16x128xf32>
    %476 = arith.addf %474, %475 : vector<16x128xf32>
    %477 = arith.truncf %439 : vector<16x128xf32> to vector<16x128xbf16>
    %cst_112 = arith.constant dense<0.000000e+00> : vector<16x384xf32>
    %478 = tpu.matmul %477, %12, %cst_112 {dimension_numbers = #tpu.dot_dimension_numbers<[1], [0], [0], [1], [0, 0, 1, 1], [], []>} : vector<16x128xbf16>, vector<128x384xbf16>, vector<16x384xf32> -> vector<16x384xf32>
    %479 = vector.broadcast %13 : vector<1x384xf32> to vector<16x384xf32>
    %480 = arith.addf %478, %479 : vector<16x384xf32>
    %481 = vector.extract_strided_slice %446 {offsets = [0, 0], sizes = [16, 128], strides = [1, 1]} : vector<16x384xf32> to vector<16x128xf32>
    %482 = vector.extract_strided_slice %480 {offsets = [0, 0], sizes = [16, 128], strides = [1, 1]} : vector<16x384xf32> to vector<16x128xf32>
    %483 = arith.addf %481, %482 : vector<16x128xf32>
    %484 = arith.negf %483 : vector<16x128xf32>
    %485 = math.exp %484 : vector<16x128xf32>
    %cst_113 = arith.constant 1.000000e+00 : f32
    %486 = vector.broadcast %cst_113 : f32 to vector<16x128xf32>
    %487 = arith.addf %486, %485 : vector<16x128xf32>
    %488 = arith.divf %486, %487 : vector<16x128xf32>
    %489 = vector.extract_strided_slice %446 {offsets = [0, 128], sizes = [16, 128], strides = [1, 1]} : vector<16x384xf32> to vector<16x128xf32>
    %490 = vector.extract_strided_slice %480 {offsets = [0, 128], sizes = [16, 128], strides = [1, 1]} : vector<16x384xf32> to vector<16x128xf32>
    %491 = arith.addf %489, %490 : vector<16x128xf32>
    %492 = arith.negf %491 : vector<16x128xf32>
    %493 = math.exp %492 : vector<16x128xf32>
    %cst_114 = arith.constant 1.000000e+00 : f32
    %494 = vector.broadcast %cst_114 : f32 to vector<16x128xf32>
    %495 = arith.addf %494, %493 : vector<16x128xf32>
    %496 = arith.divf %494, %495 : vector<16x128xf32>
    %497 = vector.extract_strided_slice %446 {offsets = [0, 256], sizes = [16, 128], strides = [1, 1]} : vector<16x384xf32> to vector<16x128xf32>
    %498 = vector.extract_strided_slice %480 {offsets = [0, 256], sizes = [16, 128], strides = [1, 1]} : vector<16x384xf32> to vector<16x128xf32>
    %499 = arith.mulf %488, %498 : vector<16x128xf32>
    %500 = arith.addf %497, %499 : vector<16x128xf32>
    %501 = math.tanh %500 : vector<16x128xf32>
    %cst_115 = arith.constant 1.000000e+00 : f32
    %502 = vector.broadcast %cst_115 : f32 to vector<16x128xf32>
    %503 = arith.subf %502, %496 : vector<16x128xf32>
    %504 = arith.mulf %503, %501 : vector<16x128xf32>
    %505 = arith.mulf %496, %439 : vector<16x128xf32>
    %506 = arith.addf %504, %505 : vector<16x128xf32>
    %507 = arith.index_cast %c5_i32 : i32 to index
    %c0_116 = arith.constant 0 : index
    %c0_117 = arith.constant 0 : index
    %508 = vector.load %arg15[%507, %c0_116, %c0_117] : memref<8x16x128xf32, #tpu.memory_space<vmem>>, vector<1x16x128xf32>
    %509 = vector.shape_cast %508 : vector<1x16x128xf32> to vector<16x128xf32>
    %510 = vector.shape_cast %476 : vector<16x128xf32> to vector<1x16x128xf32>
    tpu.vector_store %arg15[%507, %c0_116, %c0_117], %510 {strides = array<i32>} : memref<8x16x128xf32, #tpu.memory_space<vmem>>, vector<1x16x128xf32>,
    %511 = arith.index_cast %440 : i32 to index
    %c0_118 = arith.constant 0 : index
    %c0_119 = arith.constant 0 : index
    %512 = vector.load %arg16[%511, %c0_118, %c0_119] : memref<8x16x128xf32, #tpu.memory_space<vmem>>, vector<1x16x128xf32>
    %513 = vector.shape_cast %512 : vector<1x16x128xf32> to vector<16x128xf32>
    %514 = vector.shape_cast %506 : vector<16x128xf32> to vector<1x16x128xf32>
    tpu.vector_store %arg16[%511, %c0_118, %c0_119], %514 {strides = array<i32>} : memref<8x16x128xf32, #tpu.memory_space<vmem>>, vector<1x16x128xf32>,
    %515 = vector.broadcast %c5_i32 : i32 to vector<16x1xi32>
    %516 = arith.cmpi slt, %515, %9 : vector<16x1xi32>
    %517 = vector.shape_cast %516 : vector<16x1xi1> to vector<16x1xi1>
    %518 = vector.broadcast %517 : vector<16x1xi1> to vector<16x128xi1>
    %519 = arith.select %518, %476, %434 : vector<16x128xi1>, vector<16x128xf32>
    %520 = vector.broadcast %440 : i32 to vector<16x1xi32>
    %521 = arith.cmpi slt, %520, %9 : vector<16x1xi32>
    %522 = vector.shape_cast %521 : vector<16x1xi1> to vector<16x1xi1>
    %523 = vector.broadcast %522 : vector<16x1xi1> to vector<16x128xi1>
    %524 = arith.select %523, %506, %439 : vector<16x128xi1>, vector<16x128xf32>
    %c6_i32 = arith.constant 6 : i32
    %c7_i32_120 = arith.constant 7 : i32
    %525 = arith.subi %c7_i32_120, %c6_i32 : i32
    %526 = arith.index_cast %c6_i32 : i32 to index
    %c0_121 = arith.constant 0 : index
    %c0_122 = arith.constant 0 : index
    %527 = vector.load %arg14[%526, %c0_121, %c0_122] : memref<8x16x768xf32, #tpu.memory_space<vmem>>, vector<1x16x384xf32>
    %528 = vector.shape_cast %527 : vector<1x16x384xf32> to vector<16x384xf32>
    %529 = arith.index_cast %525 : i32 to index
    %c0_123 = arith.constant 0 : index
    %c384_124 = arith.constant 384 : index
    %530 = vector.load %arg14[%529, %c0_123, %c384_124] : memref<8x16x768xf32, #tpu.memory_space<vmem>>, vector<1x16x384xf32>
    %531 = vector.shape_cast %530 : vector<1x16x384xf32> to vector<16x384xf32>
    %532 = arith.truncf %519 : vector<16x128xf32> to vector<16x128xbf16>
    %cst_125 = arith.constant dense<0.000000e+00> : vector<16x384xf32>
    %533 = tpu.matmul %532, %10, %cst_125 {dimension_numbers = #tpu.dot_dimension_numbers<[1], [0], [0], [1], [0, 0, 1, 1], [], []>} : vector<16x128xbf16>, vector<128x384xbf16>, vector<16x384xf32> -> vector<16x384xf32>
    %534 = vector.broadcast %11 : vector<1x384xf32> to vector<16x384xf32>
    %535 = arith.addf %533, %534 : vector<16x384xf32>
    %536 = vector.extract_strided_slice %528 {offsets = [0, 0], sizes = [16, 128], strides = [1, 1]} : vector<16x384xf32> to vector<16x128xf32>
    %537 = vector.extract_strided_slice %535 {offsets = [0, 0], sizes = [16, 128], strides = [1, 1]} : vector<16x384xf32> to vector<16x128xf32>
    %538 = arith.addf %536, %537 : vector<16x128xf32>
    %539 = arith.negf %538 : vector<16x128xf32>
    %540 = math.exp %539 : vector<16x128xf32>
    %cst_126 = arith.constant 1.000000e+00 : f32
    %541 = vector.broadcast %cst_126 : f32 to vector<16x128xf32>
    %542 = arith.addf %541, %540 : vector<16x128xf32>
    %543 = arith.divf %541, %542 : vector<16x128xf32>
    %544 = vector.extract_strided_slice %528 {offsets = [0, 128], sizes = [16, 128], strides = [1, 1]} : vector<16x384xf32> to vector<16x128xf32>
    %545 = vector.extract_strided_slice %535 {offsets = [0, 128], sizes = [16, 128], strides = [1, 1]} : vector<16x384xf32> to vector<16x128xf32>
    %546 = arith.addf %544, %545 : vector<16x128xf32>
    %547 = arith.negf %546 : vector<16x128xf32>
    %548 = math.exp %547 : vector<16x128xf32>
    %cst_127 = arith.constant 1.000000e+00 : f32
    %549 = vector.broadcast %cst_127 : f32 to vector<16x128xf32>
    %550 = arith.addf %549, %548 : vector<16x128xf32>
    %551 = arith.divf %549, %550 : vector<16x128xf32>
    %552 = vector.extract_strided_slice %528 {offsets = [0, 256], sizes = [16, 128], strides = [1, 1]} : vector<16x384xf32> to vector<16x128xf32>
    %553 = vector.extract_strided_slice %535 {offsets = [0, 256], sizes = [16, 128], strides = [1, 1]} : vector<16x384xf32> to vector<16x128xf32>
    %554 = arith.mulf %543, %553 : vector<16x128xf32>
    %555 = arith.addf %552, %554 : vector<16x128xf32>
    %556 = math.tanh %555 : vector<16x128xf32>
    %cst_128 = arith.constant 1.000000e+00 : f32
    %557 = vector.broadcast %cst_128 : f32 to vector<16x128xf32>
    %558 = arith.subf %557, %551 : vector<16x128xf32>
    %559 = arith.mulf %558, %556 : vector<16x128xf32>
    %560 = arith.mulf %551, %519 : vector<16x128xf32>
    %561 = arith.addf %559, %560 : vector<16x128xf32>
    %562 = arith.truncf %524 : vector<16x128xf32> to vector<16x128xbf16>
    %cst_129 = arith.constant dense<0.000000e+00> : vector<16x384xf32>
    %563 = tpu.matmul %562, %12, %cst_129 {dimension_numbers = #tpu.dot_dimension_numbers<[1], [0], [0], [1], [0, 0, 1, 1], [], []>} : vector<16x128xbf16>, vector<128x384xbf16>, vector<16x384xf32> -> vector<16x384xf32>
    %564 = vector.broadcast %13 : vector<1x384xf32> to vector<16x384xf32>
    %565 = arith.addf %563, %564 : vector<16x384xf32>
    %566 = vector.extract_strided_slice %531 {offsets = [0, 0], sizes = [16, 128], strides = [1, 1]} : vector<16x384xf32> to vector<16x128xf32>
    %567 = vector.extract_strided_slice %565 {offsets = [0, 0], sizes = [16, 128], strides = [1, 1]} : vector<16x384xf32> to vector<16x128xf32>
    %568 = arith.addf %566, %567 : vector<16x128xf32>
    %569 = arith.negf %568 : vector<16x128xf32>
    %570 = math.exp %569 : vector<16x128xf32>
    %cst_130 = arith.constant 1.000000e+00 : f32
    %571 = vector.broadcast %cst_130 : f32 to vector<16x128xf32>
    %572 = arith.addf %571, %570 : vector<16x128xf32>
    %573 = arith.divf %571, %572 : vector<16x128xf32>
    %574 = vector.extract_strided_slice %531 {offsets = [0, 128], sizes = [16, 128], strides = [1, 1]} : vector<16x384xf32> to vector<16x128xf32>
    %575 = vector.extract_strided_slice %565 {offsets = [0, 128], sizes = [16, 128], strides = [1, 1]} : vector<16x384xf32> to vector<16x128xf32>
    %576 = arith.addf %574, %575 : vector<16x128xf32>
    %577 = arith.negf %576 : vector<16x128xf32>
    %578 = math.exp %577 : vector<16x128xf32>
    %cst_131 = arith.constant 1.000000e+00 : f32
    %579 = vector.broadcast %cst_131 : f32 to vector<16x128xf32>
    %580 = arith.addf %579, %578 : vector<16x128xf32>
    %581 = arith.divf %579, %580 : vector<16x128xf32>
    %582 = vector.extract_strided_slice %531 {offsets = [0, 256], sizes = [16, 128], strides = [1, 1]} : vector<16x384xf32> to vector<16x128xf32>
    %583 = vector.extract_strided_slice %565 {offsets = [0, 256], sizes = [16, 128], strides = [1, 1]} : vector<16x384xf32> to vector<16x128xf32>
    %584 = arith.mulf %573, %583 : vector<16x128xf32>
    %585 = arith.addf %582, %584 : vector<16x128xf32>
    %586 = math.tanh %585 : vector<16x128xf32>
    %cst_132 = arith.constant 1.000000e+00 : f32
    %587 = vector.broadcast %cst_132 : f32 to vector<16x128xf32>
    %588 = arith.subf %587, %581 : vector<16x128xf32>
    %589 = arith.mulf %588, %586 : vector<16x128xf32>
    %590 = arith.mulf %581, %524 : vector<16x128xf32>
    %591 = arith.addf %589, %590 : vector<16x128xf32>
    %592 = arith.index_cast %c6_i32 : i32 to index
    %c0_133 = arith.constant 0 : index
    %c0_134 = arith.constant 0 : index
    %593 = vector.load %arg15[%592, %c0_133, %c0_134] : memref<8x16x128xf32, #tpu.memory_space<vmem>>, vector<1x16x128xf32>
    %594 = vector.shape_cast %593 : vector<1x16x128xf32> to vector<16x128xf32>
    %595 = vector.shape_cast %561 : vector<16x128xf32> to vector<1x16x128xf32>
    tpu.vector_store %arg15[%592, %c0_133, %c0_134], %595 {strides = array<i32>} : memref<8x16x128xf32, #tpu.memory_space<vmem>>, vector<1x16x128xf32>,
    %596 = arith.index_cast %525 : i32 to index
    %c0_135 = arith.constant 0 : index
    %c0_136 = arith.constant 0 : index
    %597 = vector.load %arg16[%596, %c0_135, %c0_136] : memref<8x16x128xf32, #tpu.memory_space<vmem>>, vector<1x16x128xf32>
    %598 = vector.shape_cast %597 : vector<1x16x128xf32> to vector<16x128xf32>
    %599 = vector.shape_cast %591 : vector<16x128xf32> to vector<1x16x128xf32>
    tpu.vector_store %arg16[%596, %c0_135, %c0_136], %599 {strides = array<i32>} : memref<8x16x128xf32, #tpu.memory_space<vmem>>, vector<1x16x128xf32>,
    %600 = vector.broadcast %c6_i32 : i32 to vector<16x1xi32>
    %601 = arith.cmpi slt, %600, %9 : vector<16x1xi32>
    %602 = vector.shape_cast %601 : vector<16x1xi1> to vector<16x1xi1>
    %603 = vector.broadcast %602 : vector<16x1xi1> to vector<16x128xi1>
    %604 = arith.select %603, %561, %519 : vector<16x128xi1>, vector<16x128xf32>
    %605 = vector.broadcast %525 : i32 to vector<16x1xi32>
    %606 = arith.cmpi slt, %605, %9 : vector<16x1xi32>
    %607 = vector.shape_cast %606 : vector<16x1xi1> to vector<16x1xi1>
    %608 = vector.broadcast %607 : vector<16x1xi1> to vector<16x128xi1>
    %609 = arith.select %608, %591, %524 : vector<16x128xi1>, vector<16x128xf32>
    %c7_i32_137 = arith.constant 7 : i32
    %c7_i32_138 = arith.constant 7 : i32
    %610 = arith.subi %c7_i32_138, %c7_i32_137 : i32
    %611 = arith.index_cast %c7_i32_137 : i32 to index
    %c0_139 = arith.constant 0 : index
    %c0_140 = arith.constant 0 : index
    %612 = vector.load %arg14[%611, %c0_139, %c0_140] : memref<8x16x768xf32, #tpu.memory_space<vmem>>, vector<1x16x384xf32>
    %613 = vector.shape_cast %612 : vector<1x16x384xf32> to vector<16x384xf32>
    %614 = arith.index_cast %610 : i32 to index
    %c0_141 = arith.constant 0 : index
    %c384_142 = arith.constant 384 : index
    %615 = vector.load %arg14[%614, %c0_141, %c384_142] : memref<8x16x768xf32, #tpu.memory_space<vmem>>, vector<1x16x384xf32>
    %616 = vector.shape_cast %615 : vector<1x16x384xf32> to vector<16x384xf32>
    %617 = arith.truncf %604 : vector<16x128xf32> to vector<16x128xbf16>
    %cst_143 = arith.constant dense<0.000000e+00> : vector<16x384xf32>
    %618 = tpu.matmul %617, %10, %cst_143 {dimension_numbers = #tpu.dot_dimension_numbers<[1], [0], [0], [1], [0, 0, 1, 1], [], []>} : vector<16x128xbf16>, vector<128x384xbf16>, vector<16x384xf32> -> vector<16x384xf32>
    %619 = vector.broadcast %11 : vector<1x384xf32> to vector<16x384xf32>
    %620 = arith.addf %618, %619 : vector<16x384xf32>
    %621 = vector.extract_strided_slice %613 {offsets = [0, 0], sizes = [16, 128], strides = [1, 1]} : vector<16x384xf32> to vector<16x128xf32>
    %622 = vector.extract_strided_slice %620 {offsets = [0, 0], sizes = [16, 128], strides = [1, 1]} : vector<16x384xf32> to vector<16x128xf32>
    %623 = arith.addf %621, %622 : vector<16x128xf32>
    %624 = arith.negf %623 : vector<16x128xf32>
    %625 = math.exp %624 : vector<16x128xf32>
    %cst_144 = arith.constant 1.000000e+00 : f32
    %626 = vector.broadcast %cst_144 : f32 to vector<16x128xf32>
    %627 = arith.addf %626, %625 : vector<16x128xf32>
    %628 = arith.divf %626, %627 : vector<16x128xf32>
    %629 = vector.extract_strided_slice %613 {offsets = [0, 128], sizes = [16, 128], strides = [1, 1]} : vector<16x384xf32> to vector<16x128xf32>
    %630 = vector.extract_strided_slice %620 {offsets = [0, 128], sizes = [16, 128], strides = [1, 1]} : vector<16x384xf32> to vector<16x128xf32>
    %631 = arith.addf %629, %630 : vector<16x128xf32>
    %632 = arith.negf %631 : vector<16x128xf32>
    %633 = math.exp %632 : vector<16x128xf32>
    %cst_145 = arith.constant 1.000000e+00 : f32
    %634 = vector.broadcast %cst_145 : f32 to vector<16x128xf32>
    %635 = arith.addf %634, %633 : vector<16x128xf32>
    %636 = arith.divf %634, %635 : vector<16x128xf32>
    %637 = vector.extract_strided_slice %613 {offsets = [0, 256], sizes = [16, 128], strides = [1, 1]} : vector<16x384xf32> to vector<16x128xf32>
    %638 = vector.extract_strided_slice %620 {offsets = [0, 256], sizes = [16, 128], strides = [1, 1]} : vector<16x384xf32> to vector<16x128xf32>
    %639 = arith.mulf %628, %638 : vector<16x128xf32>
    %640 = arith.addf %637, %639 : vector<16x128xf32>
    %641 = math.tanh %640 : vector<16x128xf32>
    %cst_146 = arith.constant 1.000000e+00 : f32
    %642 = vector.broadcast %cst_146 : f32 to vector<16x128xf32>
    %643 = arith.subf %642, %636 : vector<16x128xf32>
    %644 = arith.mulf %643, %641 : vector<16x128xf32>
    %645 = arith.mulf %636, %604 : vector<16x128xf32>
    %646 = arith.addf %644, %645 : vector<16x128xf32>
    %647 = arith.truncf %609 : vector<16x128xf32> to vector<16x128xbf16>
    %cst_147 = arith.constant dense<0.000000e+00> : vector<16x384xf32>
    %648 = tpu.matmul %647, %12, %cst_147 {dimension_numbers = #tpu.dot_dimension_numbers<[1], [0], [0], [1], [0, 0, 1, 1], [], []>} : vector<16x128xbf16>, vector<128x384xbf16>, vector<16x384xf32> -> vector<16x384xf32>
    %649 = vector.broadcast %13 : vector<1x384xf32> to vector<16x384xf32>
    %650 = arith.addf %648, %649 : vector<16x384xf32>
    %651 = vector.extract_strided_slice %616 {offsets = [0, 0], sizes = [16, 128], strides = [1, 1]} : vector<16x384xf32> to vector<16x128xf32>
    %652 = vector.extract_strided_slice %650 {offsets = [0, 0], sizes = [16, 128], strides = [1, 1]} : vector<16x384xf32> to vector<16x128xf32>
    %653 = arith.addf %651, %652 : vector<16x128xf32>
    %654 = arith.negf %653 : vector<16x128xf32>
    %655 = math.exp %654 : vector<16x128xf32>
    %cst_148 = arith.constant 1.000000e+00 : f32
    %656 = vector.broadcast %cst_148 : f32 to vector<16x128xf32>
    %657 = arith.addf %656, %655 : vector<16x128xf32>
    %658 = arith.divf %656, %657 : vector<16x128xf32>
    %659 = vector.extract_strided_slice %616 {offsets = [0, 128], sizes = [16, 128], strides = [1, 1]} : vector<16x384xf32> to vector<16x128xf32>
    %660 = vector.extract_strided_slice %650 {offsets = [0, 128], sizes = [16, 128], strides = [1, 1]} : vector<16x384xf32> to vector<16x128xf32>
    %661 = arith.addf %659, %660 : vector<16x128xf32>
    %662 = arith.negf %661 : vector<16x128xf32>
    %663 = math.exp %662 : vector<16x128xf32>
    %cst_149 = arith.constant 1.000000e+00 : f32
    %664 = vector.broadcast %cst_149 : f32 to vector<16x128xf32>
    %665 = arith.addf %664, %663 : vector<16x128xf32>
    %666 = arith.divf %664, %665 : vector<16x128xf32>
    %667 = vector.extract_strided_slice %616 {offsets = [0, 256], sizes = [16, 128], strides = [1, 1]} : vector<16x384xf32> to vector<16x128xf32>
    %668 = vector.extract_strided_slice %650 {offsets = [0, 256], sizes = [16, 128], strides = [1, 1]} : vector<16x384xf32> to vector<16x128xf32>
    %669 = arith.mulf %658, %668 : vector<16x128xf32>
    %670 = arith.addf %667, %669 : vector<16x128xf32>
    %671 = math.tanh %670 : vector<16x128xf32>
    %cst_150 = arith.constant 1.000000e+00 : f32
    %672 = vector.broadcast %cst_150 : f32 to vector<16x128xf32>
    %673 = arith.subf %672, %666 : vector<16x128xf32>
    %674 = arith.mulf %673, %671 : vector<16x128xf32>
    %675 = arith.mulf %666, %609 : vector<16x128xf32>
    %676 = arith.addf %674, %675 : vector<16x128xf32>
    %677 = arith.index_cast %c7_i32_137 : i32 to index
    %c0_151 = arith.constant 0 : index
    %c0_152 = arith.constant 0 : index
    %678 = vector.load %arg15[%677, %c0_151, %c0_152] : memref<8x16x128xf32, #tpu.memory_space<vmem>>, vector<1x16x128xf32>
    %679 = vector.shape_cast %678 : vector<1x16x128xf32> to vector<16x128xf32>
    %680 = vector.shape_cast %646 : vector<16x128xf32> to vector<1x16x128xf32>
    tpu.vector_store %arg15[%677, %c0_151, %c0_152], %680 {strides = array<i32>} : memref<8x16x128xf32, #tpu.memory_space<vmem>>, vector<1x16x128xf32>,
    %681 = arith.index_cast %610 : i32 to index
    %c0_153 = arith.constant 0 : index
    %c0_154 = arith.constant 0 : index
    %682 = vector.load %arg16[%681, %c0_153, %c0_154] : memref<8x16x128xf32, #tpu.memory_space<vmem>>, vector<1x16x128xf32>
    %683 = vector.shape_cast %682 : vector<1x16x128xf32> to vector<16x128xf32>
    %684 = vector.shape_cast %676 : vector<16x128xf32> to vector<1x16x128xf32>
    tpu.vector_store %arg16[%681, %c0_153, %c0_154], %684 {strides = array<i32>} : memref<8x16x128xf32, #tpu.memory_space<vmem>>, vector<1x16x128xf32>,
    %685 = vector.broadcast %c7_i32_137 : i32 to vector<16x1xi32>
    %686 = arith.cmpi slt, %685, %9 : vector<16x1xi32>
    %687 = vector.shape_cast %686 : vector<16x1xi1> to vector<16x1xi1>
    %688 = vector.broadcast %687 : vector<16x1xi1> to vector<16x128xi1>
    %689 = arith.select %688, %646, %604 : vector<16x128xi1>, vector<16x128xf32>
    %690 = vector.broadcast %610 : i32 to vector<16x1xi32>
    %691 = arith.cmpi slt, %690, %9 : vector<16x1xi32>
    %692 = vector.shape_cast %691 : vector<16x1xi1> to vector<16x1xi1>
    %693 = vector.broadcast %692 : vector<16x1xi1> to vector<16x128xi1>
    %694 = arith.select %693, %676, %609 : vector<16x128xi1>, vector<16x128xf32>
    %c8_i32 = arith.constant 8 : i32
    %c0_155 = arith.constant 0 : index
    %c0_156 = arith.constant 0 : index
    %c0_157 = arith.constant 0 : index
    %695 = vector.load %arg15[%c0_155, %c0_156, %c0_157] : memref<8x16x128xf32, #tpu.memory_space<vmem>>, vector<8x16x128xf32>
    %c0_158 = arith.constant 0 : index
    %c0_159 = arith.constant 0 : index
    %c0_160 = arith.constant 0 : index
    %696 = vector.load %arg16[%c0_158, %c0_159, %c0_160] : memref<8x16x128xf32, #tpu.memory_space<vmem>>, vector<8x16x128xf32>
    %697 = vector.shape_cast %695 : vector<8x16x128xf32> to vector<128x128xf32>
    %698 = arith.truncf %697 : vector<128x128xf32> to vector<128x128xbf16>
    %c0_161 = arith.constant 0 : index
    %c0_162 = arith.constant 0 : index
    %699 = vector.load %arg9[%c0_161, %c0_162] : memref<128x128xbf16, #tpu.memory_space<vmem>>, vector<128x128xbf16>
    %cst_163 = arith.constant dense<0.000000e+00> : vector<128x128xf32>
    %700 = tpu.matmul %698, %699, %cst_163 {dimension_numbers = #tpu.dot_dimension_numbers<[1], [0], [0], [1], [0, 0, 1, 1], [], []>} : vector<128x128xbf16>, vector<128x128xbf16>, vector<128x128xf32> -> vector<128x128xf32>
    %701 = vector.shape_cast %696 : vector<8x16x128xf32> to vector<128x128xf32>
    %702 = arith.truncf %701 : vector<128x128xf32> to vector<128x128xbf16>
    %c0_164 = arith.constant 0 : index
    %c0_165 = arith.constant 0 : index
    %703 = vector.load %arg10[%c0_164, %c0_165] : memref<128x128xbf16, #tpu.memory_space<vmem>>, vector<128x128xbf16>
    %cst_166 = arith.constant dense<0.000000e+00> : vector<128x128xf32>
    %704 = tpu.matmul %702, %703, %cst_166 {dimension_numbers = #tpu.dot_dimension_numbers<[1], [0], [0], [1], [0, 0, 1, 1], [], []>} : vector<128x128xbf16>, vector<128x128xbf16>, vector<128x128xf32> -> vector<128x128xf32>
    %705 = arith.addf %700, %704 : vector<128x128xf32>
    %c0_167 = arith.constant 0 : index
    %c0_168 = arith.constant 0 : index
    %706 = vector.load %arg11[%c0_167, %c0_168] : memref<1x128xf32, #tpu.memory_space<vmem>>, vector<1x128xf32>
    %707 = vector.broadcast %706 : vector<1x128xf32> to vector<128x128xf32>
    %708 = arith.addf %705, %707 : vector<128x128xf32>
    %709 = math.tanh %708 : vector<128x128xf32>
    %710 = vector.shape_cast %709 : vector<128x128xf32> to vector<8x16x128xf32>
    %c0_169 = arith.constant 0 : index
    %c0_170 = arith.constant 0 : index
    %711 = vector.load %arg12[%c0_169, %c0_170] : memref<1x128xf32, #tpu.memory_space<vmem>>, vector<1x128xf32>
    %712 = vector.shape_cast %711 : vector<1x128xf32> to vector<1x1x128xf32>
    %713 = vector.broadcast %712 : vector<1x1x128xf32> to vector<8x16x128xf32>
    %714 = arith.mulf %710, %713 : vector<8x16x128xf32>
    %cst_171 = arith.constant dense<0.000000e+00> : vector<8x16xf32>
    %715 = vector.multi_reduction <add>, %714, %cst_171 [2] : vector<8x16x128xf32> to vector<8x16xf32>
    %716 = vector.shape_cast %715 : vector<8x16xf32> to vector<8x16x1xf32>
    %717 = tpu.iota {dimensions = array<i32: 0>} : vector<8x16x1xi32>
    %718 = vector.shape_cast %9 : vector<16x1xi32> to vector<1x16x1xi32>
    %719 = vector.broadcast %718 : vector<1x16x1xi32> to vector<8x16x1xi32>
    %720 = arith.cmpi slt, %717, %719 : vector<8x16x1xi32>
    %cst_172 = arith.constant -1.000000e+30 : f32
    %721 = vector.broadcast %cst_172 : f32 to vector<8x16x1xf32>
    %722 = arith.select %720, %716, %721 : vector<8x16x1xi1>, vector<8x16x1xf32>
    %cst_173 = arith.constant dense<0xFF800000> : vector<16x1xf32>
    %723 = vector.multi_reduction <maximumf>, %722, %cst_173 [0] : vector<8x16x1xf32> to vector<16x1xf32>
    %724 = vector.shape_cast %723 : vector<16x1xf32> to vector<1x16x1xf32>
    %725 = vector.broadcast %724 : vector<1x16x1xf32> to vector<8x16x1xf32>
    %726 = arith.subf %722, %725 : vector<8x16x1xf32>
    %727 = math.exp %726 : vector<8x16x1xf32>
    %728 = arith.extui %720 : vector<8x16x1xi1> to vector<8x16x1xi32>
    %729 = arith.sitofp %728 : vector<8x16x1xi32> to vector<8x16x1xf32>
    %730 = arith.mulf %727, %729 : vector<8x16x1xf32>
    %cst_174 = arith.constant dense<0.000000e+00> : vector<16x1xf32>
    %731 = vector.multi_reduction <add>, %730, %cst_174 [0] : vector<8x16x1xf32> to vector<16x1xf32>
    %732 = vector.shape_cast %731 : vector<16x1xf32> to vector<1x16x1xf32>
    %cst_175 = arith.constant 1.000000e-30 : f32
    %733 = vector.broadcast %cst_175 : f32 to vector<1x16x1xf32>
    %734 = arith.maximumf %732, %733 : vector<1x16x1xf32>
    %735 = tpu.reciprocal %734 {approx = true} : vector<1x16x1xf32> -> vector<1x16x1xf32>
    %736 = vector.broadcast %735 : vector<1x16x1xf32> to vector<8x16x1xf32>
    %737 = arith.mulf %730, %736 : vector<8x16x1xf32>
    %738 = vector.broadcast %737 : vector<8x16x1xf32> to vector<8x16x128xf32>
    %739 = arith.mulf %738, %695 : vector<8x16x128xf32>
    %cst_176 = arith.constant dense<0.000000e+00> : vector<16x128xf32>
    %740 = vector.multi_reduction <add>, %739, %cst_176 [0] : vector<8x16x128xf32> to vector<16x128xf32>
    %741 = vector.broadcast %737 : vector<8x16x1xf32> to vector<8x16x128xf32>
    %742 = arith.mulf %741, %696 : vector<8x16x128xf32>
    %cst_177 = arith.constant dense<0.000000e+00> : vector<16x128xf32>
    %743 = vector.multi_reduction <add>, %742, %cst_177 [0] : vector<8x16x128xf32> to vector<16x128xf32>
    %744 = vector.shape_cast %740 : vector<16x128xf32> to vector<1x16x128xf32>
    %c0_178 = arith.constant 0 : index
    %c0_179 = arith.constant 0 : index
    %c0_180 = arith.constant 0 : index
    %745 = vector.load %arg13[%c0_178, %c0_179, %c0_180] : memref<1x16x256xf32, #tpu.memory_space<vmem>>, vector<1x16x128xf32>
    tpu.vector_store %arg13[%c0_178, %c0_179, %c0_180], %744 {strides = array<i32>} : memref<1x16x256xf32, #tpu.memory_space<vmem>>, vector<1x16x128xf32>,
    %746 = vector.shape_cast %743 : vector<16x128xf32> to vector<1x16x128xf32>
    %c0_181 = arith.constant 0 : index
    %c0_182 = arith.constant 0 : index
    %c128 = arith.constant 128 : index
    %747 = vector.load %arg13[%c0_181, %c0_182, %c128] : memref<1x16x256xf32, #tpu.memory_space<vmem>>, vector<1x16x128xf32>
    tpu.vector_store %arg13[%c0_181, %c0_182, %c128], %746 {strides = array<i32>} : memref<1x16x256xf32, #tpu.memory_space<vmem>>, vector<1x16x128xf32>,
    return
  }
  func.func @transform_0(%arg0: i32) -> (i32, i32, i32) {
    %c0_i32 = arith.constant 0 : i32
    %c0_i32_0 = arith.constant 0 : i32
    %c0_i32_1 = arith.constant 0 : i32
    return %c0_i32, %arg0, %c0_i32_0 : i32, i32, i32
  }
  func.func @transform_1(%arg0: i32) -> (i32, i32) {
    %c0_i32 = arith.constant 0 : i32
    %c0_i32_0 = arith.constant 0 : i32
    return %arg0, %c0_i32 : i32, i32
  }
  func.func @transform_2(%arg0: i32) -> (i32, i32) {
    %c0_i32 = arith.constant 0 : i32
    %c0_i32_0 = arith.constant 0 : i32
    %c0_i32_1 = arith.constant 0 : i32
    return %c0_i32, %c0_i32_0 : i32, i32
  }
  func.func @transform_3(%arg0: i32) -> (i32, i32) {
    %c0_i32 = arith.constant 0 : i32
    %c0_i32_0 = arith.constant 0 : i32
    %c0_i32_1 = arith.constant 0 : i32
    return %c0_i32, %c0_i32_0 : i32, i32
  }
  func.func @transform_4(%arg0: i32) -> (i32, i32) {
    %c0_i32 = arith.constant 0 : i32
    %c0_i32_0 = arith.constant 0 : i32
    %c0_i32_1 = arith.constant 0 : i32
    return %c0_i32, %c0_i32_0 : i32, i32
  }
  func.func @transform_5(%arg0: i32) -> (i32, i32) {
    %c0_i32 = arith.constant 0 : i32
    %c0_i32_0 = arith.constant 0 : i32
    %c0_i32_1 = arith.constant 0 : i32
    return %c0_i32, %c0_i32_0 : i32, i32
  }
  func.func @transform_6(%arg0: i32) -> (i32, i32) {
    %c0_i32 = arith.constant 0 : i32
    %c0_i32_0 = arith.constant 0 : i32
    %c0_i32_1 = arith.constant 0 : i32
    return %c0_i32, %c0_i32_0 : i32, i32
  }
  func.func @transform_7(%arg0: i32) -> (i32, i32) {
    %c0_i32 = arith.constant 0 : i32
    %c0_i32_0 = arith.constant 0 : i32
    %c0_i32_1 = arith.constant 0 : i32
    return %c0_i32, %c0_i32_0 : i32, i32
  }
  func.func @transform_8(%arg0: i32) -> (i32, i32) {
    %c0_i32 = arith.constant 0 : i32
    %c0_i32_0 = arith.constant 0 : i32
    %c0_i32_1 = arith.constant 0 : i32
    return %c0_i32, %c0_i32_0 : i32, i32
  }
  func.func @transform_9(%arg0: i32) -> (i32, i32) {
    %c0_i32 = arith.constant 0 : i32
    %c0_i32_0 = arith.constant 0 : i32
    %c0_i32_1 = arith.constant 0 : i32
    return %c0_i32, %c0_i32_0 : i32, i32
  }
  func.func @transform_10(%arg0: i32) -> (i32, i32) {
    %c0_i32 = arith.constant 0 : i32
    %c0_i32_0 = arith.constant 0 : i32
    %c0_i32_1 = arith.constant 0 : i32
    return %c0_i32, %c0_i32_0 : i32, i32
  }
  func.func @transform_11(%arg0: i32) -> (i32, i32) {
    %c0_i32 = arith.constant 0 : i32
    %c0_i32_0 = arith.constant 0 : i32
    %c0_i32_1 = arith.constant 0 : i32
    return %c0_i32, %c0_i32_0 : i32, i32
  }
  func.func @transform_12(%arg0: i32) -> (i32, i32, i32) {
    %c0_i32 = arith.constant 0 : i32
    %c0_i32_0 = arith.constant 0 : i32
    %c0_i32_1 = arith.constant 0 : i32
    return %c0_i32, %arg0, %c0_i32_0 : i32, i32, i32
  }
}

</mosaic_0001>

<bundles_post_ra>
// kernel: tpu_custom_call.1
= control target key start
LH: loop header
LB: loop body
LE: loop exit
PB: predicated region body
PF: predicated region fallthrough
CT: control target
= control target key end

     0   :  { %17 = vsyncpa [#allocation6], 0  ;;  %s8457_s0 = inlined_call_operand.hbm [shape: bf16[8,16,128], index: 0, kind: input, shape index: {}]   ;;  %s8458_s1 = inlined_call_operand.vmem [shape: s32[16,1], index: 1, kind: input, shape index: {}]   ;;  %s8459_s2 = inlined_call_operand.hbm [shape: bf16[128,768], index: 2, kind: input, shape index: {}]   ;;  %s8460_s3 = inlined_call_operand.vmem [shape: f32[1,768], index: 3, kind: input, shape index: {}]   ;;  %s8461_s4 = inlined_call_operand.hbm [shape: bf16[128,384], index: 4, kind: input, shape index: {}]   ;;  %s8462_s5 = inlined_call_operand.vmem [shape: f32[1,384], index: 5, kind: input, shape index: {}]   ;;  %s8463_s6 = inlined_call_operand.hbm [shape: bf16[128,384], index: 6, kind: input, shape index: {}]   ;;  %s8464_s7 = inlined_call_operand.vmem [shape: f32[1,384], index: 7, kind: input, shape index: {}]   ;;  %s8465_s8 = inlined_call_operand.hbm [shape: bf16[128,128], index: 8, kind: input, shape index: {}]   ;;  %s8466_s9 = inlined_call_operand.hbm [shape: bf16[128,128], index: 9, kind: input, shape index: {}]   ;;  %s8467_s10 = inlined_call_operand.vmem [shape: f32[1,128], index: 10, kind: input, shape index: {}]   ;;  %s8468_s11 = inlined_call_operand.vmem [shape: f32[1,128], index: 11, kind: input, shape index: {}]   ;;  %s8469_s12 = inlined_call_operand.hbm [shape: f32[1,16,256], index: 12, kind: output, shape index: {}]  }
   0x1   :  { %18 = vsyncpa [#allocation9], 0 }
   0x2   :  { %19 = vsyncpa [#allocation12], 0 }
   0x3   :  { %20 = vsyncpa [#allocation15], 0 }
   0x4   :  { %21 = vsyncpa [#allocation7], 0  ;;  %s6138_s21 = smov [#allocation8]   ;;  %s5974_s25 = scalar_lea.hbm %s8459_s2, 6144 }
   0x5   :  { %s41_s22 = sshll.u32 %s6138_s21, 4  ;;  %p5975_p0 = scmp.ne.s32.totalorder %s8459_s2, %s5974_s25  ;;  %s42_s22 = int_to_ptr.vmem [resolvable:$true] %s41_s22 }
   0x6   :  { %p5978_p1 = scmp.lt.u32.totalorder %s5974_s25, %s8459_s2 }
   0x8   :  { %p5980_p2 = pnand %p5978_p1, %p5975_p0 }
   0xa   :  { %5983 = shalt.err (!%p5980_p2)
}
   0xb   :  { %s5984_s30 = scalar_lea.vmem %s42_s22, 6144  ;;  %p5989_p4 = scmp.lt.s32.totalorder %s42_s22, %s42_s22 }
   0xc   :  { %p5985_p3 = scmp.ne.s32.totalorder %s42_s22, %s5984_s30  ;;  %p5990_p5 = scmp.lt.s32.totalorder %s5984_s30, %s5984_s30 }
   0xe   :  { %p5991_p6 = por %p5990_p5, %p5989_p4 }
  0x10   :  { %p5992_p7 = pnand %p5991_p6, %p5985_p3 }
  0x12   :  { %5995 = shalt.err (!%p5992_p7)
}
  0x13   :  { %s6139_s13 = smov 384   ;;  %s6140_s14 = smov 24  }
  0x14   :  { %47 = dma.hbm_to_vmem [thread:$0]  %s8459_s2, 6144, %s42_s22, [#allocation9], %s6139_s13, %s6139_s13, %s6140_s14  }
  0x15   :  { %s6141_s17 = smov [#allocation11]   ;;  %s6142_s19 = smov [#allocation5]  }
  0x16   :  { %s69_s18 = sshll.u32 %s6141_s17, 4  ;;  %s27_s20 = sshll.u32 %s6142_s19, 4  ;;  %s70_s18 = int_to_ptr.vmem [resolvable:$true] %s69_s18  ;;  %s28_s20 = int_to_ptr.vmem [resolvable:$true] %s27_s20 }
  0x17   :  { %s5996_s24 = scalar_lea.hbm %s8463_s6, 3072 }
  0x18   :  { %p5997_p8 = scmp.ne.s32.totalorder %s8463_s6, %s5996_s24  ;;  %p6000_p9 = scmp.lt.u32.totalorder %s5996_s24, %s8463_s6 }
  0x1a   :  { %p6002_p10 = pnand %p6000_p9, %p5997_p8 }
  0x1c   :  { %6005 = shalt.err (!%p6002_p10)
}
  0x1d   :  { %s6006_s2 = scalar_lea.vmem %s70_s18, 3072  ;;  %p6011_p12 = scmp.lt.s32.totalorder %s70_s18, %s70_s18 }
  0x1e   :  { %p6007_p11 = scmp.ne.s32.totalorder %s70_s18, %s6006_s2  ;;  %p6012_p13 = scmp.lt.s32.totalorder %s6006_s2, %s6006_s2 }
  0x20   :  { %p6013_p0 = por %p6012_p13, %p6011_p12 }
  0x22   :  { %p6014_p1 = pnand %p6013_p0, %p6007_p11 }
  0x24   :  { %6017 = shalt.err (!%p6014_p1)
}
  0x25   :  { %s6143_s22 = smov 192   ;;  %s6144_s29 = smov 12  }
  0x26   :  { %75 = dma.hbm_to_vmem [thread:$0]  %s8463_s6, 3072, %s70_s18, [#allocation12], %s6143_s22, %s6143_s22, %s6144_s29  }
  0x27   :  { %s6018_s16 = scalar_lea.hbm %s8457_s0, 1024 }
  0x28   :  { %p6019_p2 = scmp.ne.s32.totalorder %s8457_s0, %s6018_s16  ;;  %p6022_p3 = scmp.lt.u32.totalorder %s6018_s16, %s8457_s0 }
  0x2a   :  { %p6024_p4 = pnand %p6022_p3, %p6019_p2 }
  0x2c   :  { %6027 = shalt.err (!%p6024_p4)
}
  0x2d   :  { %s6028_s24 = scalar_lea.vmem %s28_s20, 1024  ;;  %p6033_p6 = scmp.lt.s32.totalorder %s28_s20, %s28_s20 }
  0x2e   :  { %p6029_p5 = scmp.ne.s32.totalorder %s28_s20, %s6028_s24  ;;  %p6034_p7 = scmp.lt.s32.totalorder %s6028_s24, %s6028_s24 }
  0x30   :  { %p6035_p8 = por %p6034_p7, %p6033_p6 }
  0x32   :  { %p6036_p9 = pnand %p6035_p8, %p6029_p5 }
  0x34   :  { %6039 = shalt.err (!%p6036_p9)
}
  0x35   :  { %s6145_s6 = smov 64   ;;  %s6146_s18 = smov 4  }
  0x36   :  { %33 = dma.hbm_to_vmem [thread:$0]  %s8457_s0, 1024, %s28_s20, [#allocation6], %s6145_s6, %s6145_s6, %s6146_s18  }
  0x37   :  { %s6147_s27 = smov [#allocation10]   ;;  %s6148_s2 = smov [#allocation13]  }
  0x38   :  { %s55_s28 = sshll.u32 %s6147_s27, 4  ;;  %s83_s30 = sshll.u32 %s6148_s2, 4  ;;  %s56_s28 = int_to_ptr.vmem [resolvable:$true] %s55_s28  ;;  %s84_s30 = int_to_ptr.vmem [resolvable:$true] %s83_s30 }
  0x39   :  { %s6040_s15 = scalar_lea.hbm %s8461_s4, 3072 }
  0x3a   :  { %p6041_p10 = scmp.ne.s32.totalorder %s8461_s4, %s6040_s15  ;;  %p6044_p11 = scmp.lt.u32.totalorder %s6040_s15, %s8461_s4 }
  0x3c   :  { %p6046_p12 = pnand %p6044_p11, %p6041_p10 }
  0x3e   :  { %6049 = shalt.err (!%p6046_p12)
}
  0x3f   :  { %s6050_s0 = scalar_lea.vmem %s56_s28, 3072  ;;  %p6055_p0 = scmp.lt.s32.totalorder %s56_s28, %s56_s28 }
  0x40   :  { %p6051_p13 = scmp.ne.s32.totalorder %s56_s28, %s6050_s0  ;;  %p6056_p1 = scmp.lt.s32.totalorder %s6050_s0, %s6050_s0 }
  0x42   :  { %p6057_p2 = por %p6056_p1, %p6055_p0 }
  0x44   :  { %p6058_p3 = pnand %p6057_p2, %p6051_p13 }
  0x46   :  { %6061 = shalt.err (!%p6058_p3)
}
  0x47   :  { %61 = dma.hbm_to_vmem [thread:$0]  %s8461_s4, 3072, %s56_s28, [#allocation9], %s6143_s22, %s6143_s22, %s6144_s29  }
  0x48   :  { %s6062_s26 = scalar_lea.hbm %s8465_s8, 1024 }
  0x49   :  { %p6063_p4 = scmp.ne.s32.totalorder %s8465_s8, %s6062_s26  ;;  %p6066_p5 = scmp.lt.u32.totalorder %s6062_s26, %s8465_s8 }
  0x4b   :  { %p6068_p6 = pnand %p6066_p5, %p6063_p4 }
  0x4d   :  { %6071 = shalt.err (!%p6068_p6)
}
  0x4e   :  { %s6072_s15 = scalar_lea.vmem %s84_s30, 1024  ;;  %p6077_p8 = scmp.lt.s32.totalorder %s84_s30, %s84_s30 }
  0x4f   :  { %p6073_p7 = scmp.ne.s32.totalorder %s84_s30, %s6072_s15  ;;  %p6078_p9 = scmp.lt.s32.totalorder %s6072_s15, %s6072_s15 }
  0x51   :  { %p6079_p10 = por %p6078_p9, %p6077_p8 }
  0x53   :  { %p6080_p11 = pnand %p6079_p10, %p6073_p7 }
  0x55   :  { %6083 = shalt.err (!%p6080_p11)
}
  0x56   :  { %89 = dma.hbm_to_vmem [thread:$0]  %s8465_s8, 1024, %s84_s30, [#allocation12], %s6145_s6, %s6145_s6, %s6146_s18  }
  0x57   :  { %s6149_s29 = smov [#allocation14]   ;;  %s6084_s19 = scalar_lea.hbm %s8466_s9, 1024 }
  0x58   :  { %s95_s28 = sshll.u32 %s6149_s29, 4  ;;  %p6085_p12 = scmp.ne.s32.totalorder %s8466_s9, %s6084_s19  ;;  %s96_s28 = int_to_ptr.vmem [resolvable:$true] %s95_s28 }
  0x59   :  { %p6088_p13 = scmp.lt.u32.totalorder %s6084_s19, %s8466_s9 }
  0x5b   :  { %p6090_p0 = pnand %p6088_p13, %p6085_p12 }
  0x5d   :  { %6093 = shalt.err (!%p6090_p0)
}
  0x5e   :  { %s6094_s24 = scalar_lea.vmem %s96_s28, 1024  ;;  %p6099_p2 = scmp.lt.s32.totalorder %s96_s28, %s96_s28 }
  0x5f   :  { %p6095_p1 = scmp.ne.s32.totalorder %s96_s28, %s6094_s24  ;;  %p6100_p3 = scmp.lt.s32.totalorder %s6094_s24, %s6094_s24 }
  0x61   :  { %p6101_p4 = por %p6100_p3, %p6099_p2 }
  0x63   :  { %p6102_p5 = pnand %p6101_p4, %p6095_p1 }
  0x65   :  { %6105 = shalt.err (!%p6102_p5)
}
  0x66   :  { %101 = dma.hbm_to_vmem [thread:$0]  %s8466_s9, 1024, %s96_s28, [#allocation15], %s6145_s6, %s6145_s6, %s6146_s18  }
  0x67   :  { %6128 = dma.done.wait [#allocation6], 1024  }
  0x68   :  { %6129 = vsyncadd [#allocation6], 4294966272 }
  0x69   :  { %6130 = dma.done.wait [#allocation9], 9216  }
  0x6a   :  { %6131 = vsyncadd [#allocation9], 4294958080 }
  0x6b   :  { %6132 = dma.done.wait [#allocation12], 4096  }
  0x6c   :  { %6133 = vsyncadd [#allocation12], 4294963200 }
  0x6d   :  { %6134 = dma.done.wait [#allocation15], 1024  }
  0x6e   :  { %6135 = vsyncadd [#allocation15], 4294966272  ;;  %v8471_v0 = vmov 0   ;;  %v5330_v1 = vld [vmem:[#allocation8 + $0x4] ss:$24 sps:$4 sm:$0xff]   ;;  %v6320_v29 = vld [vmem:[#allocation5 + $0x8] sm:$0xff]  }
  0x6f   :  { %541 = vmatprep.mubr.bf16.mxu0 %v8471_v0  ;;  %581 = vmatprep.mubr.bf16.mxu1 %v8471_v0  ;;  %v5332_v2 = vld [vmem:[#allocation8] ss:$24 sps:$4 sm:$0xff]   ;;  %v5333_v3 = vld [vmem:[#allocation8 + $0x34] ss:$24 sps:$4 sm:$0xff]   ;;  %v5335_v4 = vld [vmem:[#allocation8 + $0x30] ss:$24 sps:$4 sm:$0xff]  }
  0x70   :  { %5328 = vset.pattern.permute.xlu0 %v8471_v0  ;;  %5329 = vset.pattern.permute.xlu1 %v8471_v0  ;;  %v5336_v5 = vld [vmem:[#allocation8 + $0x64] ss:$24 sps:$4 sm:$0xff]   ;;  %v5338_v6 = vld [vmem:[#allocation8 + $0x60] ss:$24 sps:$4 sm:$0xff]   ;;  %v5339_v7 = vld [vmem:[#allocation8 + $0x94] ss:$24 sps:$4 sm:$0xff]  }
  0x71   :  { %509 = vmatprep.subr.bf16.mxu0 %v5330_v1  ;;  %5182 = vmatprep.subr.bf16.mxu1 %v5330_v1  ;;  %v5341_v8 = vld [vmem:[#allocation8 + $0x90] ss:$24 sps:$4 sm:$0xff]   ;;  %v5342_v9 = vld [vmem:[#allocation8 + $0xc4] ss:$24 sps:$4 sm:$0xff]   ;;  %v5344_v10 = vld [vmem:[#allocation8 + $0xc0] ss:$24 sps:$4 sm:$0xff]  }
  0x72   :  { %510 = vmatpush1.bf16.msra.mxu0 %v5332_v2  ;;  %5190 = vmatpush1.bf16.msra.mxu1 %v5332_v2  ;;  %v5345_v11 = vld [vmem:[#allocation8 + $0xf4] ss:$24 sps:$4 sm:$0xff]   ;;  %v5347_v12 = vld [vmem:[#allocation8 + $0xf0] ss:$24 sps:$4 sm:$0xff]   ;;  %v5348_v13 = vld [vmem:[#allocation8 + $0x124] ss:$24 sps:$4 sm:$0xff]  }
  0x73   :  { %511 = vmatprep.subr.bf16.mxu0 %v5333_v3  ;;  %5183 = vmatprep.subr.bf16.mxu1 %v5333_v3  ;;  %v5350_v14 = vld [vmem:[#allocation8 + $0x120] ss:$24 sps:$4 sm:$0xff]   ;;  %v5351_v15 = vld [vmem:[#allocation8 + $0x154] ss:$24 sps:$4 sm:$0xff]   ;;  %v5353_v16 = vld [vmem:[#allocation8 + $0x150] ss:$24 sps:$4 sm:$0xff]  }
  0x74   :  { %v5358_v17 = vld [vmem:[#allocation8 + $0xc] ss:$24 sps:$4 sm:$0xff]   ;;  %v5356_v21 = vld [vmem:[#allocation8 + $0x8] ss:$24 sps:$4 sm:$0xff]   ;;  %v5364_v23 = vld [vmem:[#allocation8 + $0x3c] ss:$24 sps:$4 sm:$0xff]  }
  0x75   :  { %v5361_v18 = vld [vmem:[#allocation8 + $0x14] ss:$24 sps:$4 sm:$0xff]   ;;  %v6312_v19 = vld [vmem:[#allocation5] sm:$0xff]   ;;  %v5359_v22 = vld [vmem:[#allocation8 + $0x10] ss:$24 sps:$4 sm:$0xff]   ;;  %v8473_v59 = vmov 0.0  }
  0x76   :  { %512 = vmatpush1.bf16.msra.mxu0 %v5335_v4  ;;  %5191 = vmatpush1.bf16.msra.mxu1 %v5335_v4  ;;  %v6314_v20 = vld [vmem:[#allocation5 + $0x20] sm:$0xff]   ;;  %v5362_v25 = vld [vmem:[#allocation8 + $0x38] ss:$24 sps:$4 sm:$0xff]   ;;  %v5375_v28 = vld [vmem:[#allocation8 + $0x74] ss:$24 sps:$4 sm:$0xff]   ;;  %vm6152_vm4 = vmmov 0  }
  0x77   :  { %513 = vmatprep.subr.bf16.mxu0 %v5336_v5  ;;  %5184 = vmatprep.subr.bf16.mxu1 %v5336_v5  ;;  %v5367_v24 = vld [vmem:[#allocation8 + $0x44] ss:$24 sps:$4 sm:$0xff]   ;;  %v5365_v26 = vld [vmem:[#allocation8 + $0x40] ss:$24 sps:$4 sm:$0xff]   ;;  %v6322_v30 = vld [vmem:[#allocation5 + $0x28] sm:$0xff]  }
  0x78   :  { %v5372_v27 = vld [vmem:[#allocation8 + $0x6c] ss:$24 sps:$4 sm:$0xff]   ;;  %v5370_v31 = vld [vmem:[#allocation8 + $0x68] ss:$24 sps:$4 sm:$0xff]   ;;  %v5378_v33 = vld [vmem:[#allocation8 + $0x9c] ss:$24 sps:$4 sm:$0xff]  }
  0x79   :  { %v5373_v32 = vld [vmem:[#allocation8 + $0x70] ss:$24 sps:$4 sm:$0xff]   ;;  %v5381_v34 = vld [vmem:[#allocation8 + $0xa4] ss:$24 sps:$4 sm:$0xff]   ;;  %v5379_v36 = vld [vmem:[#allocation8 + $0xa0] ss:$24 sps:$4 sm:$0xff]  }
  0x7a   :  { %514 = vmatpush1.bf16.msra.mxu0 %v5338_v6  ;;  %5192 = vmatpush1.bf16.msra.mxu1 %v5338_v6  ;;  %v5376_v35 = vld [vmem:[#allocation8 + $0x98] ss:$24 sps:$4 sm:$0xff]   ;;  %v5386_v38 = vld [vmem:[#allocation8 + $0xcc] ss:$24 sps:$4 sm:$0xff]   ;;  %v5384_v41 = vld [vmem:[#allocation8 + $0xc8] ss:$24 sps:$4 sm:$0xff]  }
  0x7b   :  { %515 = vmatprep.subr.bf16.mxu0 %v5339_v7  ;;  %5185 = vmatprep.subr.bf16.mxu1 %v5339_v7  ;;  %v6326_v37 = vld [vmem:[#allocation5 + $0x10] sm:$0xff]   ;;  %v5395_v44 = vld [vmem:[#allocation8 + $0x104] ss:$24 sps:$4 sm:$0xff]   ;;  %v5393_v46 = vld [vmem:[#allocation8 + $0x100] ss:$24 sps:$4 sm:$0xff]  }
  0x7c   :  { %v5389_v39 = vld [vmem:[#allocation8 + $0xd4] ss:$24 sps:$4 sm:$0xff]   ;;  %v5387_v42 = vld [vmem:[#allocation8 + $0xd0] ss:$24 sps:$4 sm:$0xff]   ;;  %v6334_v48 = vld [vmem:[#allocation5 + $0x18] sm:$0xff]  }
  0x7d   :  { %v6330_v40 = vld [vmem:[#allocation5 + $0x30] sm:$0xff]   ;;  %v5400_v47 = vld [vmem:[#allocation8 + $0x12c] ss:$24 sps:$4 sm:$0xff]   ;;  %v6338_v50 = vld [vmem:[#allocation5 + $0x38] sm:$0xff]  }
  0x7e   :  { %516 = vmatpush1.bf16.msra.mxu0 %v5341_v8  ;;  %5193 = vmatpush1.bf16.msra.mxu1 %v5341_v8  ;;  %v5392_v43 = vld [vmem:[#allocation8 + $0xfc] ss:$24 sps:$4 sm:$0xff]   ;;  %v5390_v45 = vld [vmem:[#allocation8 + $0xf8] ss:$24 sps:$4 sm:$0xff]   ;;  %v5398_v51 = vld [vmem:[#allocation8 + $0x128] ss:$24 sps:$4 sm:$0xff]  }
  0x7f   :  { %517 = vmatprep.subr.bf16.mxu0 %v5342_v9  ;;  %5186 = vmatprep.subr.bf16.mxu1 %v5342_v9  ;;  %v5403_v49 = vld [vmem:[#allocation8 + $0x134] ss:$24 sps:$4 sm:$0xff]   ;;  %v5401_v52 = vld [vmem:[#allocation8 + $0x130] ss:$24 sps:$4 sm:$0xff]   ;;  %v5409_v54 = vld [vmem:[#allocation8 + $0x164] ss:$24 sps:$4 sm:$0xff]  }
  0x80   :  { %v5406_v53 = vld [vmem:[#allocation8 + $0x15c] ss:$24 sps:$4 sm:$0xff]   ;;  %v5404_v55 = vld [vmem:[#allocation8 + $0x158] ss:$24 sps:$4 sm:$0xff]   ;;  %v6350_v60 = vld [vmem:[#allocation10] ss:$12 sps:$4 sm:$0xff]  }
  0x81   :  { %v5407_v56 = vld [vmem:[#allocation8 + $0x160] ss:$24 sps:$4 sm:$0xff]   ;;  %v6342_v57 = vld [vmem:[#allocation10 + $0x4] ss:$12 sps:$4 sm:$0xff]   ;;  %v6346_v58 = vld [vmem:[#allocation10 + $0x8] ss:$12 sps:$4 sm:$0xff]  }
  0x82   :  { %518 = vmatpush1.bf16.msra.mxu0 %v5344_v10  ;;  %5194 = vmatpush1.bf16.msra.mxu1 %v5344_v10  ;;  %v6352_v61 = vld [vmem:[#allocation10 + $0x1c] ss:$12 sps:$4 sm:$0xff]   ;;  %v6358_v62 = vld [vmem:[#allocation10 + $0x20] ss:$12 sps:$4 sm:$0xff]   ;;  %v6362_v63 = vld [vmem:[#allocation10 + $0x18] ss:$12 sps:$4 sm:$0xff]  }
  0x83   :  { %519 = vmatprep.subr.bf16.mxu0 %v5345_v11  ;;  %5187 = vmatprep.subr.bf16.mxu1 %v5345_v11  ;;  %v6366_v1 = vld [vmem:[#allocation10 + $0x34] ss:$12 sps:$4 sm:$0xff]   ;;  %v6369_v2 = vld [vmem:[#allocation10 + $0x38] ss:$12 sps:$4 sm:$0xff]   ;;  %v6373_v3 = vld [vmem:[#allocation10 + $0x30] ss:$12 sps:$4 sm:$0xff]  }
  0x84   :  { %v6376_v4 = vld [vmem:[#allocation10 + $0x4c] ss:$12 sps:$4 sm:$0xff]   ;;  %v6382_v5 = vld [vmem:[#allocation10 + $0x50] ss:$12 sps:$4 sm:$0xff]   ;;  %v6386_v6 = vld [vmem:[#allocation10 + $0x48] ss:$12 sps:$4 sm:$0xff]  }
  0x85   :  { %v6390_v7 = vld [vmem:[#allocation10 + $0x64] ss:$12 sps:$4 sm:$0xff]   ;;  %v6400_v9 = vld [vmem:[%s8458_s1 + $0x8] sm:$0xff] }
  0x86   :  { %520 = vmatpush1.bf16.msra.mxu0 %v5347_v12  ;;  %5195 = vmatpush1.bf16.msra.mxu1 %v5347_v12  ;;  %v6395_v8 = vld [vmem:[%s8458_s1] sm:$0xff]  ;;  %8607 = vst [vmem:[#allocation23_spill] sm:$0xff] %v6400_v9  ;;  %v6402_v10 = vld [vmem:[#allocation10 + $0x68] ss:$12 sps:$4 sm:$0xff]   ;;  %vm8550_vm1 = vcmp.gt.s32.totalorder %v6400_v9, 0  ;;  %vm8470_vm10 = vcmp.gt.s32.totalorder %v6400_v9, 7 }
  0x87   :  { %521 = vmatprep.subr.bf16.mxu0 %v5348_v13  ;;  %5188 = vmatprep.subr.bf16.mxu1 %v5348_v13  ;;  %8606 = vst [vmem:[#allocation22_spill] sm:$0xff] %v6395_v8  ;;  %v6404_v11 = vld [vmem:[#allocation10 + $0x60] ss:$12 sps:$4 sm:$0xff]   ;;  %vm8552_vm0 = vcmp.gt.s32.totalorder %v6395_v8, 0  ;;  %v6407_v12 = vld [vmem:[#allocation10 + $0x7c] ss:$12 sps:$4 sm:$0xff]  }
  0x88   :  { %v1572_v13 = vsel %vm8552_vm0, 1, %v8471_v0  ;;  %vm1872_vm2 = vcmp.gt.s32.totalorder %v6395_v8, 1  ;;  %vm8483_vm3 = vcmp.gt.s32.totalorder %v6395_v8, 6  ;;  %vm2174_vm5 = vcmp.gt.s32.totalorder %v6395_v8, 2 }
  0x89   :  { %1575 = vperm.xlu0 %5328, %v1572_v13   ;;  %vm8551_vm6 = vcmp.gt.s32.totalorder %v6395_v8, 5  ;;  %vm2476_vm7 = vcmp.gt.s32.totalorder %v6395_v8, 3  ;;  %vm8549_vm8 = vcmp.gt.s32.totalorder %v6395_v8, 4  ;;  %vm8479_vm9 = vcmp.gt.s32.totalorder %v6395_v8, 7 }
  0x8a   :  { %522 = vmatpush1.bf16.msra.mxu0 %v5350_v14  ;;  %5196 = vmatpush1.bf16.msra.mxu1 %v5350_v14  ;;  %v6419_v14 = vld [vmem:[#allocation10 + $0x80] ss:$12 sps:$4 sm:$0xff]   ;;  %vm8540_vm11 = vcmp.gt.s32.totalorder %v6400_v9, 1  ;;  %vm8480_vm12 = vcmp.gt.s32.totalorder %v6400_v9, 6  ;;  %vm8543_vm13 = vcmp.gt.s32.totalorder %v6400_v9, 2  ;;  %vm8482_vm14 = vcmp.gt.s32.totalorder %v6400_v9, 5 }
  0x8b   :  { %523 = vmatprep.subr.bf16.mxu0 %v5351_v15  ;;  %5189 = vmatprep.subr.bf16.mxu1 %v5351_v15  ;;  %v6421_v15 = vld [vmem:[#allocation10 + $0x78] ss:$12 sps:$4 sm:$0xff]   ;;  %vm8544_vm15 = vcmp.gt.s32.totalorder %v6400_v9, 3 }
  0x8e   :  { %524 = vmatpush1.bf16.msra.mxu0 %v5353_v16  ;;  %5197 = vmatpush1.bf16.msra.mxu1 %v5353_v16  ;;  %v6425_v16 = vld [vmem:[#allocation10 + $0x94] ss:$12 sps:$4 sm:$0xff]  }
  0x8f   :  { %622 = vmatprep.subr.bf16.mxu1 %v5358_v17  ;;  %735 = vmatprep.subr.bf16.mxu0 %v5361_v18  ;;  %v6431_v17 = vld [vmem:[#allocation10 + $0x98] ss:$12 sps:$4 sm:$0xff]   ;;  %v6433_v18 = vld [vmem:[#allocation10 + $0x90] ss:$12 sps:$4 sm:$0xff]  }
  0x91   :  { %542 = vmatmul.mubr.bf16.vlgmr.msra.gmra.mrb[0].mxu0 %v6312_v19  ;;  %582 = vmatmul.mubr.bf16.vlgmr.msra.gmra.mrb[0].mxu1 %v6314_v20 }
  0x92   :  { %623 = vmatpush1.bf16.msra.mxu1 %v5356_v21  ;;  %736 = vmatpush1.bf16.msra.mxu0 %v5359_v22  ;;  %v1573_v21 = vsel %vm8550_vm1, 1, %v8471_v0  ;;  %v6450_v22 = vld [vmem:[#allocation10 + $0xb0] ss:$12 sps:$4 sm:$0xff]  }
  0x93   :  { %624 = vmatprep.subr.bf16.mxu1 %v5364_v23  ;;  %737 = vmatprep.subr.bf16.mxu0 %v5367_v24  ;;  %v6452_v23 = vld [vmem:[#allocation10 + $0xa8] ss:$12 sps:$4 sm:$0xff]   ;;  %v6456_v24 = vld [vmem:[#allocation11 + $0x4] ss:$12 sps:$4 sm:$0xff]  }
  0x94   :  { %551 = vmatprep.mubr.bf16.mxu0 %v8471_v0  ;;  %591 = vmatprep.mubr.bf16.mxu1 %v8471_v0 }
  0x95   :  { %1578 = vperm.xlu0 %5328, %v1573_v21  }
  0x96   :  { %625 = vmatpush1.bf16.msra.mxu1 %v5362_v25  ;;  %738 = vmatpush1.bf16.msra.mxu0 %v5365_v26  ;;  %v1888_v25 = vsel %vm8483_vm3, 1, %v8471_v0  ;;  %v2176_v26 = vsel %vm2174_vm5, 1, %v8471_v0 }
  0x97   :  { %626 = vmatprep.subr.bf16.mxu1 %v5372_v27  ;;  %739 = vmatprep.subr.bf16.mxu0 %v5375_v28  ;;  %v6491_v27 = vld [vmem:[#allocation11] ss:$12 sps:$4 sm:$0xff]   ;;  %v6493_v28 = vld [vmem:[#allocation11 + $0x1c] ss:$12 sps:$4 sm:$0xff]  }
  0x99   :  { %552 = vmatmul.mubr.bf16.gmra.mrb[4].mxu0 %v6320_v29  ;;  %592 = vmatmul.mubr.bf16.gmra.mrb[4].mxu1 %v6322_v30 }
  0x9a   :  { %627 = vmatpush1.bf16.msra.mxu1 %v5370_v31  ;;  %740 = vmatpush1.bf16.msra.mxu0 %v5373_v32  ;;  %v6506_v31 = vld [vmem:[#allocation11 + $0x34] ss:$12 sps:$4 sm:$0xff]   ;;  %v2478_v32 = vsel %vm2476_vm7, 1, %v8471_v0 }
  0x9b   :  { %628 = vmatprep.subr.bf16.mxu1 %v5378_v33  ;;  %741 = vmatprep.subr.bf16.mxu0 %v5381_v34  ;;  %v6516_v33 = vld [vmem:[#allocation11 + $0x30] ss:$12 sps:$4 sm:$0xff]   ;;  %v6519_v34 = vld [vmem:[#allocation11 + $0x4c] ss:$12 sps:$4 sm:$0xff]  }
  0x9c   :  { %561 = vmatprep.mubr.bf16.mxu0 %v8471_v0  ;;  %601 = vmatprep.mubr.bf16.mxu1 %v8471_v0 }
  0x9e   :  { %629 = vmatpush1.bf16.msra.mxu1 %v5376_v35  ;;  %742 = vmatpush1.bf16.msra.mxu0 %v5379_v36  ;;  %v2492_v35 = vsel %vm8549_vm8, 1, %v8471_v0  ;;  %v1586_v36 = vsel %vm8479_vm9, 1, %v8471_v0 }
  0x9f   :  { %630 = vmatprep.subr.bf16.mxu1 %v5386_v38  ;;  %743 = vmatprep.subr.bf16.mxu0 %v5389_v39  ;;  %v6535_v38 = vld [vmem:[#allocation11 + $0x64] ss:$12 sps:$4 sm:$0xff]   ;;  %v6540_v39 = vld [vmem:[#allocation11 + $0x60] ss:$12 sps:$4 sm:$0xff]  }
  0xa0   :  { %1589 = vperm.xlu1 %5329, %v1586_v36  }
  0xa1   :  { %562 = vmatmul.mubr.bf16.gmra.mrb[8].mxu0 %v6326_v37  ;;  %602 = vmatmul.mubr.bf16.gmra.mrb[8].mxu1 %v6330_v40 }
  0xa2   :  { %631 = vmatpush1.bf16.msra.mxu1 %v5384_v41  ;;  %744 = vmatpush1.bf16.msra.mxu0 %v5387_v42  ;;  %v1587_v41 = vsel %vm8470_vm10, 1, %v8471_v0  ;;  %v1875_v42 = vsel %vm8540_vm11, 1, %v8471_v0  ;;  %vm8481_vm10 = vcmp.gt.s32.totalorder %v6400_v9, 4 }
  0xa3   :  { %632 = vmatprep.subr.bf16.mxu1 %v5392_v43  ;;  %745 = vmatprep.subr.bf16.mxu0 %v5395_v44  ;;  %v6556_v43 = vld [vmem:[#allocation11 + $0x78] ss:$12 sps:$4 sm:$0xff]   ;;  %v6559_v44 = vld [vmem:[#allocation11 + $0x94] ss:$12 sps:$4 sm:$0xff]  }
  0xa4   :  { %571 = vmatprep.mubr.bf16.mxu0 %v8471_v0  ;;  %611 = vmatprep.mubr.bf16.mxu1 %v8471_v0 }
  0xa5   :  { %1592 = vperm.xlu1 %5329, %v1587_v41  }
  0xa6   :  { %633 = vmatpush1.bf16.msra.mxu1 %v5390_v45  ;;  %746 = vmatpush1.bf16.msra.mxu0 %v5393_v46  ;;  %v6564_v45 = vld [vmem:[#allocation11 + $0x90] ss:$12 sps:$4 sm:$0xff]   ;;  %v6568_v46 = vld [vmem:[#allocation11 + $0xac] ss:$12 sps:$4 sm:$0xff]  }
  0xa7   :  { %634 = vmatprep.subr.bf16.mxu1 %v5400_v47  ;;  %747 = vmatprep.subr.bf16.mxu0 %v5403_v49  ;;  %v1889_v47 = vsel %vm8480_vm12, 1, %v8471_v0  ;;  %v6580_v49 = vld [vmem:[#allocation11 + $0xa8] ss:$12 sps:$4 sm:$0xff]  }
  0xa9   :  { %572 = vmatmul.mubr.bf16.gmra.mrb[12].mxu0 %v6334_v48  ;;  %612 = vmatmul.mubr.bf16.gmra.mrb[12].mxu1 %v6338_v50 }
  0xaa   :  { %635 = vmatpush1.bf16.msra.mxu1 %v5398_v51  ;;  %748 = vmatpush1.bf16.msra.mxu0 %v5401_v52  ;;  %v2191_v51 = vsel %vm8482_vm14, 1, %v8471_v0  ;;  %v2479_v52 = vsel %vm8544_vm15, 1, %v8471_v0 }
  0xab   :  { %636 = vmatprep.subr.bf16.mxu1 %v5406_v53  ;;  %749 = vmatprep.subr.bf16.mxu0 %v5409_v54  ;;  %v6601_v53 = vld [vmem:[#allocation11 + $0x20] ss:$12 sps:$4 sm:$0xff]   ;;  %v6607_v54 = vld [vmem:[#allocation11 + $0x38] ss:$12 sps:$4 sm:$0xff]  }
  0xac   :  { %654 = vmatprep.mubr.bf16.mxu1 %v8471_v0  ;;  %767 = vmatprep.mubr.bf16.mxu0 %v8471_v0 }
  0xad   :  { %1880 = vperm.xlu1 %5329, %v1875_v42  }
  0xae   :  { %637 = vmatpush1.bf16.msra.mxu1 %v5404_v55  ;;  %750 = vmatpush1.bf16.msra.mxu0 %v5407_v56  ;;  %v2493_v55 = vsel %vm8481_vm10, 1, %v8471_v0  ;;  %v6615_v56 = vld [vmem:[#allocation11 + $0x50] ss:$12 sps:$4 sm:$0xff]  }
  0xaf   :  { %4798 = vmatprep.subr.bf16.mxu1 %v8473_v59  ;;  %1169 = vmatprep.subr.bf16.mxu0 %v6342_v57 }
  0xb1   :  { %655 = vmatmul.mubr.bf16.vlgmr.msra.gmra.mrb[16].mxu1 %v6312_v19  ;;  %768 = vmatmul.mubr.bf16.vlgmr.msra.gmra.mrb[16].mxu0 %v6312_v19  ;;  %v6435_v19 = vld [vmem:[#allocation10 + $0xac] ss:$12 sps:$4 sm:$0xff]  }
  0xb2   :  { %4799 = vmatpush3.bf16.msra.mxu1 %v6346_v58  ;;  %664 = vmatprep.mubr.bf16.mxu1 %v8471_v0 }
  0xb3   :  { %777 = vmatprep.mubr.bf16.mxu0 %v8471_v0  ;;  %1170 = vmatpush1.bf16.msra.mxu0 %v6350_v60 }
  0xb4   :  { %4800 = vmatprep.subr.bf16.mxu1 %v8473_v59  ;;  %1171 = vmatprep.subr.bf16.mxu0 %v6352_v61 }
  0xb5   :  { %1894 = vperm.xlu1 %5329, %v1889_v47  }
  0xb6   :  { %4801 = vmatpush3.bf16.msra.mxu1 %v6358_v62 }
  0xb7   :  { %1172 = vmatpush1.bf16.msra.mxu0 %v6362_v63  ;;  %4802 = vmatprep.subr.bf16.mxu1 %v8473_v59 }
  0xb8   :  { %1173 = vmatprep.subr.bf16.mxu0 %v6366_v1 }
  0xb9   :  { %665 = vmatmul.mubr.bf16.gmra.mrb[20].mxu1 %v6320_v29  ;;  %778 = vmatmul.mubr.bf16.gmra.mrb[20].mxu0 %v6320_v29  ;;  %v2190_v29 = vsel %vm8551_vm6, 1, %v8471_v0 }
  0xba   :  { %674 = vmatprep.mubr.bf16.mxu1 %v8471_v0  ;;  %787 = vmatprep.mubr.bf16.mxu0 %v8471_v0 }
  0xbb   :  { %4803 = vmatpush3.bf16.msra.mxu1 %v6369_v2  ;;  %1174 = vmatpush1.bf16.msra.mxu0 %v6373_v3 }
  0xbc   :  { %4804 = vmatprep.subr.bf16.mxu1 %v8473_v59  ;;  %1175 = vmatprep.subr.bf16.mxu0 %v6376_v4 }
  0xbf   :  { %4805 = vmatpush3.bf16.msra.mxu1 %v6382_v5  ;;  %1176 = vmatpush1.bf16.msra.mxu0 %v6386_v6 }
  0xc0   :  { %4806 = vmatprep.subr.bf16.mxu1 %v8473_v59  ;;  %1177 = vmatprep.subr.bf16.mxu0 %v6390_v7 }
  0xc1   :  { %675 = vmatmul.mubr.bf16.gmra.mrb[24].mxu1 %v6326_v37  ;;  %788 = vmatmul.mubr.bf16.gmra.mrb[24].mxu0 %v6326_v37  ;;  %v6532_v37 = vld [vmem:[#allocation11 + $0x48] ss:$12 sps:$4 sm:$0xff]  }
  0xc2   :  { %684 = vmatprep.mubr.bf16.mxu1 %v8471_v0  ;;  %797 = vmatprep.mubr.bf16.mxu0 %v8471_v0 }
  0xc3   :  { %4807 = vmatpush3.bf16.msra.mxu1 %v6402_v10  ;;  %1178 = vmatpush1.bf16.msra.mxu0 %v6404_v11 }
  0xc4   :  { %4808 = vmatprep.subr.bf16.mxu1 %v8473_v59  ;;  %1179 = vmatprep.subr.bf16.mxu0 %v6407_v12 }
  0xc7   :  { %4809 = vmatpush3.bf16.msra.mxu1 %v6419_v14  ;;  %1180 = vmatpush1.bf16.msra.mxu0 %v6421_v15 }
  0xc8   :  { %4810 = vmatprep.subr.bf16.mxu1 %v8473_v59  ;;  %1181 = vmatprep.subr.bf16.mxu0 %v6425_v16 }
  0xc9   :  { %685 = vmatmul.mubr.bf16.gmra.mrb[28].mxu1 %v6334_v48  ;;  %798 = vmatmul.mubr.bf16.gmra.mrb[28].mxu0 %v6334_v48  ;;  %v2177_v48 = vsel %vm8543_vm13, 1, %v8471_v0 }
  0xca   :  { %694 = vmatprep.mubr.bf16.mxu1 %v8471_v0  ;;  %807 = vmatprep.mubr.bf16.mxu0 %v8471_v0 }
  0xcb   :  { %4811 = vmatpush3.bf16.msra.mxu1 %v6431_v17  ;;  %1182 = vmatpush1.bf16.msra.mxu0 %v6433_v18 }
  0xcc   :  { %4812 = vmatprep.subr.bf16.mxu1 %v8473_v59  ;;  %1183 = vmatprep.subr.bf16.mxu0 %v6435_v19 }
  0xcd   :  { %2182 = vperm.xlu1 %5329, %v2177_v48  }
  0xcf   :  { %4813 = vmatpush3.bf16.msra.mxu1 %v6450_v22  ;;  %1184 = vmatpush1.bf16.msra.mxu0 %v6452_v23 }
  0xd0   :  { %1439 = vmatprep.subr.bf16.mxu1 %v6456_v24  ;;  %1613 = vmatprep.subr.bf16.mxu0 %v6342_v57  ;;  %v6619_v57 = vld [vmem:[#allocation11 + $0x68] ss:$12 sps:$4 sm:$0xff]  }
  0xd1   :  { %695 = vmatmul.mubr.bf16.gmra.mrb[32].mxu1 %v6314_v20  ;;  %808 = vmatmul.mubr.bf16.gmra.mrb[32].mxu0 %v6314_v20  ;;  %v1874_v20 = vsel %vm1872_vm2, 1, %v8471_v0 }
  0xd2   :  { %704 = vmatprep.mubr.bf16.mxu1 %v8471_v0  ;;  %817 = vmatprep.mubr.bf16.mxu0 %v8471_v0 }
  0xd3   :  { %1877 = vperm.xlu0 %5328, %v1874_v20   ;;  %2196 = vperm.xlu1 %5329, %v2191_v51  }
  0xd7   :  { %1891 = vperm.xlu0 %5328, %v1888_v25   ;;  %2484 = vperm.xlu1 %5329, %v2479_v52  }
  0xd9   :  { %705 = vmatmul.mubr.bf16.gmra.mrb[36].mxu1 %v6322_v30  ;;  %818 = vmatmul.mubr.bf16.gmra.mrb[36].mxu0 %v6322_v30  ;;  %v6502_v30 = vld [vmem:[#allocation11 + $0x18] ss:$12 sps:$4 sm:$0xff]  }
  0xda   :  { %714 = vmatprep.mubr.bf16.mxu1 %v8471_v0  ;;  %827 = vmatprep.mubr.bf16.mxu0 %v8471_v0 }
  0xdb   :  { %2179 = vperm.xlu0 %5328, %v2176_v26   ;;  %2498 = vperm.xlu1 %5329, %v2493_v55  }
  0xdf   :  { %2193 = vperm.xlu0 %5328, %v2190_v29  }
  0xe1   :  { %715 = vmatmul.mubr.bf16.gmra.mrb[40].mxu1 %v6330_v40  ;;  %828 = vmatmul.mubr.bf16.gmra.mrb[40].mxu0 %v6330_v40  ;;  %v6544_v40 = vld [vmem:[#allocation11 + $0x7c] ss:$12 sps:$4 sm:$0xff]  }
  0xe2   :  { %724 = vmatprep.mubr.bf16.mxu1 %v8471_v0  ;;  %837 = vmatprep.mubr.bf16.mxu0 %v8471_v0 }
  0xe3   :  { %2481 = vperm.xlu0 %5328, %v2478_v32  }
  0xe7   :  { %2495 = vperm.xlu0 %5328, %v2492_v35  }
  0xe9   :  { %725 = vmatmul.mubr.bf16.gmra.mrb[44].mxu1 %v6338_v50  ;;  %838 = vmatmul.mubr.bf16.gmra.mrb[44].mxu0 %v6338_v50  ;;  %v6586_v50 = vld [vmem:[#allocation11 + $0x8] ss:$12 sps:$4 sm:$0xff]  }
  0xea   :  { %1201 = vmatprep.mubr.bf16.mxu0 %v8471_v0  ;;  %4814 = vmatprep.mubr.msk.bf16.mxu1 %vm6152_vm4, %v8473_v59 }
  0xf1   :  { %1202 = vmatmul.mubr.bf16.vlgmr.msra.gmra.mrb[0].mxu0 %v8471_v0  ;;  %4815 = vmatmul.mubr.bf16.vlgmr.msra.gmra.mrb[48].mxu1 %v8471_v0 }
  0xf2   :  { %1440 = vmatpush1.bf16.msra.mxu1 %v6491_v27  ;;  %1471 = vmatprep.mubr.bf16.mxu1 %v8471_v0 }
  0xf3   :  { %1441 = vmatprep.subr.bf16.mxu1 %v6493_v28  ;;  %1614 = vmatpush1.bf16.msra.mxu0 %v6350_v60  ;;  %v6623_v60 = vld [vmem:[#allocation11 + $0x80] ss:$12 sps:$4 sm:$0xff]  }
  0xf4   :  { %1645 = vmatprep.mubr.bf16.mxu0 %v8471_v0  ;;  %1615 = vmatprep.subr.bf16.mxu0 %v6352_v61  ;;  %v6627_v61 = vld [vmem:[#allocation11 + $0x98] ss:$12 sps:$4 sm:$0xff]  }
  0xf6   :  { %1442 = vmatpush1.bf16.msra.mxu1 %v6502_v30 }
  0xf7   :  { %1443 = vmatprep.subr.bf16.mxu1 %v6506_v31  ;;  %1616 = vmatpush1.bf16.msra.mxu0 %v6362_v63  ;;  %v6631_v63 = vld [vmem:[#allocation11 + $0xb0] ss:$12 sps:$4 sm:$0xff]  }
  0xf8   :  { %1617 = vmatprep.subr.bf16.mxu0 %v6366_v1 }
  0xfa   :  { %1444 = vmatpush1.bf16.msra.mxu1 %v6516_v33 }
  0xfb   :  { %1445 = vmatprep.subr.bf16.mxu1 %v6519_v34  ;;  %1618 = vmatpush1.bf16.msra.mxu0 %v6373_v3 }
  0xfc   :  { %1619 = vmatprep.subr.bf16.mxu0 %v6376_v4  ;;  %v6671_v4 = vld [vmem:[%s8462_s5] sm:$0x7] }
  0xfe   :  { %1446 = vmatpush1.bf16.msra.mxu1 %v6532_v37 }
  0xff   :  { %1447 = vmatprep.subr.bf16.mxu1 %v6535_v38  ;;  %1620 = vmatpush1.bf16.msra.mxu0 %v6386_v6 }
 0x100   :  { %1621 = vmatprep.subr.bf16.mxu0 %v6390_v7 }
 0x102   :  { %1448 = vmatpush1.bf16.msra.mxu1 %v6540_v39 }
 0x103   :  { %1449 = vmatprep.subr.bf16.mxu1 %v6544_v40  ;;  %1622 = vmatpush1.bf16.msra.mxu0 %v6404_v11 }
 0x104   :  { %1623 = vmatprep.subr.bf16.mxu0 %v6407_v12 }
 0x106   :  { %1450 = vmatpush1.bf16.msra.mxu1 %v6556_v43 }
 0x107   :  { %1451 = vmatprep.subr.bf16.mxu1 %v6559_v44  ;;  %1624 = vmatpush1.bf16.msra.mxu0 %v6421_v15 }
 0x108   :  { %1625 = vmatprep.subr.bf16.mxu0 %v6425_v16 }
 0x10a   :  { %1452 = vmatpush1.bf16.msra.mxu1 %v6564_v45 }
 0x10b   :  { %1453 = vmatprep.subr.bf16.mxu1 %v6568_v46  ;;  %1626 = vmatpush1.bf16.msra.mxu0 %v6433_v18 }
 0x10c   :  { %1627 = vmatprep.subr.bf16.mxu0 %v6435_v19 }
 0x10e   :  { %1454 = vmatpush1.bf16.msra.mxu1 %v6580_v49 }
 0x10f   :  { %4818 = vmatprep.subr.bf16.mxu1 %v8473_v59  ;;  %1628 = vmatpush1.bf16.msra.mxu0 %v6452_v23 }
 0x110   :  { %1740 = vmatprep.subr.bf16.mxu0 %v6456_v24 }
 0x111   :  { %1472 = vmatmul.mubr.bf16.vlgmr.msra.gmra.mrb[52].mxu1 %v8471_v0 }
 0x112   :  { %4819 = vmatpush3.bf16.msra.mxu1 %v6586_v50  ;;  %4834 = vmatprep.mubr.msk.bf16.mxu1 %vm6152_vm4, %v8473_v59 }
 0x113   :  { %4820 = vmatprep.subr.bf16.mxu1 %v8473_v59 }
 0x116   :  { %4821 = vmatpush3.bf16.msra.mxu1 %v6601_v53 }
 0x117   :  { %4822 = vmatprep.subr.bf16.mxu1 %v8473_v59 }
 0x11a   :  { %4823 = vmatpush3.bf16.msra.mxu1 %v6607_v54 }
 0x11b   :  { %4824 = vmatprep.subr.bf16.mxu1 %v8473_v59 }
 0x11e   :  { %4825 = vmatpush3.bf16.msra.mxu1 %v6615_v56 }
 0x11f   :  { %4826 = vmatprep.subr.bf16.mxu1 %v8473_v59 }
 0x122   :  { %4827 = vmatpush3.bf16.msra.mxu1 %v6619_v57 }
 0x123   :  { %4828 = vmatprep.subr.bf16.mxu1 %v8473_v59 }
 0x126   :  { %4829 = vmatpush3.bf16.msra.mxu1 %v6623_v60 }
 0x127   :  { %4830 = vmatprep.subr.bf16.mxu1 %v8473_v59 }
 0x12a   :  { %4831 = vmatpush3.bf16.msra.mxu1 %v6627_v61 }
 0x12b   :  { %4832 = vmatprep.subr.bf16.mxu1 %v8473_v59 }
 0x12e   :  { %4833 = vmatpush3.bf16.msra.mxu1 %v6631_v63 }
 0x12f   :  { %4838 = vmatprep.subr.bf16.mxu1 %v8473_v59 }
 0x131   :  { %4835 = vmatmul.mubr.bf16.vlgmr.msra.gmra.mrb[56].mxu1 %v8471_v0 }
 0x132   :  { %4839 = vmatpush3.bf16.msra.mxu1 %v6346_v58  ;;  %4854 = vmatprep.mubr.msk.bf16.mxu1 %vm6152_vm4, %v8473_v59  ;;  %v191_v58 = vlaneseq }
 0x133   :  { %4840 = vmatprep.subr.bf16.mxu1 %v8473_v59 }
 0x136   :  { %4841 = vmatpush3.bf16.msra.mxu1 %v6358_v62  ;;  %v6655_v62 = vshrl.u32 %v191_v58, 7 }
 0x137   :  { %4842 = vmatprep.subr.bf16.mxu1 %v8473_v59 }
 0x138   :  { %v6658_v1 = vsub.s32 0, %v6655_v62  ;;  %v6666_v3 = vsub.s32 1, %v6655_v62 }
 0x13a   :  { %4843 = vmatpush3.bf16.msra.mxu1 %v6369_v2  ;;  %v6663_v2 = vld [vmem:[%s8460_s3] sm:$0x3f]  ;;  %v6683_v7 = vrot.slane %v6671_v4, %v6658_v1  ;;  %v6687_v11 = vrot.slane %v6671_v4, %v6666_v3 }
 0x13b   :  { %4844 = vmatprep.subr.bf16.mxu1 %v8473_v59  ;;  %v6679_v6 = vrot.slane %v6663_v2, %v6666_v3 }
 0x13e   :  { %4845 = vmatpush3.bf16.msra.mxu1 %v6382_v5  ;;  %v6675_v5 = vrot.slane %v6663_v2, %v6658_v1 }
 0x13f   :  { %4846 = vmatprep.subr.bf16.mxu1 %v8473_v59 }
 0x142   :  { %4847 = vmatpush3.bf16.msra.mxu1 %v6402_v10 }
 0x143   :  { %4848 = vmatprep.subr.bf16.mxu1 %v8473_v59 }
 0x146   :  { %4849 = vmatpush3.bf16.msra.mxu1 %v6419_v14 }
 0x147   :  { %4850 = vmatprep.subr.bf16.mxu1 %v8473_v59 }
 0x14a   :  { %4851 = vmatpush3.bf16.msra.mxu1 %v6431_v17 }
 0x14b   :  { %4852 = vmatprep.subr.bf16.mxu1 %v8473_v59 }
 0x14e   :  { %4853 = vmatpush3.bf16.msra.mxu1 %v6450_v22 }
 0x14f   :  { %4858 = vmatprep.subr.bf16.mxu1 %v8473_v59 }
 0x164   :  { %v583_v10 = vpop.f32.mrb[0].mxu1 }
 0x165   :  { %v584_v12 = vadd.f32 %v583_v10, %v6675_v5  ;;  %v585_v13 = vpop.f32.mrb[1].mxu1 }
 0x166   :  { %v586_v14 = vadd.f32 %v585_v13, %v6679_v6  ;;  %v587_v15 = vpop.f32.mrb[2].mxu1 }
 0x167   :  { %v588_v16 = vadd.f32 %v587_v15, %v6675_v5  ;;  %v589_v17 = vpop.f32.mrb[3].mxu1  ;;  %v6693_v18 = vadd.f32 %v6683_v7, %v584_v12 }
 0x168   :  { %v590_v19 = vadd.f32 %v589_v17, %v6679_v6  ;;  %v6697_v21 = vadd.f32 %v6687_v11, %v586_v14 }
 0x169   :  { %8608 = vst [vmem:[#allocation24_spill] sm:$0xff] %v6693_v18  ;;  %v6700_v22 = vadd.f32 %v6683_v7, %v588_v16 }
 0x16a   :  { %8609 = vst [vmem:[#allocation25_spill] sm:$0xff] %v6697_v21  ;;  %v6703_v23 = vadd.f32 %v6687_v11, %v590_v19 }
 0x16b   :  { %8610 = vst [vmem:[#allocation26_spill] sm:$0xff] %v6700_v22 }
 0x16c   :  { %8611 = vst [vmem:[#allocation27_spill] sm:$0xff] %v6703_v23  ;;  %v593_v24 = vpop.f32.mrb[4].mxu1 }
 0x16d   :  { %v594_v20 = vadd.f32 %v593_v24, %v6675_v5  ;;  %v595_v25 = vpop.f32.mrb[5].mxu1 }
 0x16e   :  { %v596_v26 = vadd.f32 %v595_v25, %v6679_v6  ;;  %v597_v29 = vpop.f32.mrb[6].mxu1 }
 0x16f   :  { %v598_v32 = vadd.f32 %v597_v29, %v6675_v5  ;;  %v599_v35 = vpop.f32.mrb[7].mxu1  ;;  %v6709_v36 = vadd.f32 %v6683_v7, %v594_v20 }
 0x170   :  { %v600_v41 = vadd.f32 %v599_v35, %v6679_v6  ;;  %v6713_v42 = vadd.f32 %v6687_v11, %v596_v26  ;;  %v209_v26 = vsub.s32 4, %v6655_v62  ;;  %v205_v35 = vsub.s32 3, %v6655_v62 }
 0x171   :  { %8612 = vst [vmem:[#allocation28_spill] sm:$0xff] %v6709_v36  ;;  %v6716_v47 = vadd.f32 %v6683_v7, %v598_v32 }
 0x172   :  { %8613 = vst [vmem:[#allocation29_spill] sm:$0xff] %v6713_v42  ;;  %v6719_v48 = vadd.f32 %v6687_v11, %v600_v41  ;;  %v213_v41 = vsub.s32 5, %v6655_v62 }
 0x173   :  { %8614 = vst [vmem:[#allocation30_spill] sm:$0xff] %v6716_v47 }
 0x174   :  { %8615 = vst [vmem:[#allocation31_spill] sm:$0xff] %v6719_v48  ;;  %v603_v51 = vpop.f32.mrb[8].mxu1 }
 0x175   :  { %v604_v52 = vadd.f32 %v603_v51, %v6675_v5  ;;  %v605_v55 = vpop.f32.mrb[9].mxu1 }
 0x176   :  { %v606_v58 = vadd.f32 %v605_v55, %v6679_v6  ;;  %v607_v10 = vpop.f32.mrb[10].mxu1 }
 0x177   :  { %v608_v12 = vadd.f32 %v607_v10, %v6675_v5  ;;  %v609_v13 = vpop.f32.mrb[11].mxu1  ;;  %v6725_v14 = vadd.f32 %v6683_v7, %v604_v52 }
 0x178   :  { %v610_v15 = vadd.f32 %v609_v13, %v6679_v6  ;;  %v6729_v16 = vadd.f32 %v6687_v11, %v606_v58 }
 0x179   :  { %8616 = vst [vmem:[#allocation32_spill] sm:$0xff] %v6725_v14  ;;  %v6732_v17 = vadd.f32 %v6683_v7, %v608_v12  ;;  %v6751_v12 = vrot.slane %v6663_v2, %v209_v26 }
 0x17a   :  { %8617 = vst [vmem:[#allocation33_spill] sm:$0xff] %v6729_v16  ;;  %v6735_v19 = vadd.f32 %v6687_v11, %v610_v15  ;;  %v6757_v15 = vrot.slane %v6663_v2, %v205_v35 }
 0x17b   :  { %8618 = vst [vmem:[#allocation34_spill] sm:$0xff] %v6732_v17 }
 0x17c   :  { %8619 = vst [vmem:[#allocation35_spill] sm:$0xff] %v6735_v19  ;;  %v613_v24 = vpop.f32.mrb[12].mxu1 }
 0x17d   :  { %v614_v20 = vadd.f32 %v613_v24, %v6675_v5  ;;  %v615_v25 = vpop.f32.mrb[13].mxu1  ;;  %v6760_v24 = vrot.slane %v6663_v2, %v213_v41 }
 0x17e   :  { %v616_v29 = vadd.f32 %v615_v25, %v6679_v6  ;;  %v617_v32 = vpop.f32.mrb[14].mxu1 }
 0x17f   :  { %v618_v51 = vadd.f32 %v617_v32, %v6675_v5  ;;  %v619_v52 = vpop.f32.mrb[15].mxu1  ;;  %v6744_v55 = vadd.f32 %v6683_v7, %v614_v20 }
 0x180   :  { %v620_v58 = vadd.f32 %v619_v52, %v6679_v6  ;;  %v6748_v10 = vadd.f32 %v6687_v11, %v616_v29 }
 0x181   :  { %8620 = vst [vmem:[#allocation36_spill] sm:$0xff] %v6744_v55  ;;  %v6754_v13 = vadd.f32 %v6683_v7, %v618_v51 }
 0x182   :  { %8621 = vst [vmem:[#allocation37_spill] sm:$0xff] %v6748_v10  ;;  %v6763_v20 = vadd.f32 %v6687_v11, %v620_v58  ;;  %v6779_v58 = vsub.s32 2, %v6655_v62 }
 0x183   :  { %8622 = vst [vmem:[#allocation38_spill] sm:$0xff] %v6754_v13 }
 0x184   :  { %8623 = vst [vmem:[#allocation39_spill] sm:$0xff] %v6763_v20  ;;  %v6765_v25 = vpop.f32.mrb[16].mxu1  ;;  %v769_v32 = vpop.f32.mrb[16].mxu0 }
 0x185   :  { %v658_v29 = vpop.f32.mrb[17].mxu1  ;;  %v6768_v52 = vadd.f32 %v769_v32, %v6751_v12  ;;  %v771_v26 = vpop.f32.mrb[17].mxu0 }
 0x186   :  { %v6771_v51 = vadd.f32 %v658_v29, %v6757_v15  ;;  %v6773_v0 = vpop.f32.mrb[18].mxu1  ;;  %v6776_v35 = vadd.f32 %v771_v26, %v6760_v24  ;;  %v773_v41 = vpop.f32.mrb[18].mxu0 }
 0x187   :  { %8624 = vst [vmem:[#allocation40_spill] sm:$0xff] %v6768_v52  ;;  %v662_v59 = vpop.f32.mrb[19].mxu1  ;;  %v6782_v9 = vadd.f32 %v773_v41, %v6751_v12  ;;  %v775_v8 = vpop.f32.mrb[19].mxu0  ;;  %v6792_v52 = vrot.slane %v6663_v2, %v6779_v58 }
 0x188   :  { %8625 = vst [vmem:[#allocation41_spill] sm:$0xff] %v6771_v51  ;;  %8626 = vst [vmem:[#allocation42_spill] sm:$0xff] %v6776_v35  ;;  %v6785_v32 = vadd.f32 %v662_v59, %v6757_v15  ;;  %v6788_v29 = vadd.f32 %v775_v8, %v6760_v24 }
 0x189   :  { %8627 = vst [vmem:[#allocation43_spill] sm:$0xff] %v6782_v9 }
 0x18a   :  { %8628 = vst [vmem:[#allocation44_spill] sm:$0xff] %v6785_v32  ;;  %8629 = vst [vmem:[#allocation45_spill] sm:$0xff] %v6788_v29 }
 0x18c   :  { %v666_v26 = vpop.f32.mrb[20].mxu1  ;;  %v779_v35 = vpop.f32.mrb[20].mxu0 }
 0x18d   :  { %v6795_v62 = vadd.f32 %v666_v26, %v6792_v52  ;;  %v668_v51 = vpop.f32.mrb[21].mxu1  ;;  %v6798_v41 = vadd.f32 %v779_v35, %v6751_v12  ;;  %v781_v9 = vpop.f32.mrb[21].mxu0 }
 0x18e   :  { %v6801_v59 = vadd.f32 %v668_v51, %v6757_v15  ;;  %v670_v32 = vpop.f32.mrb[22].mxu1  ;;  %v6804_v8 = vadd.f32 %v781_v9, %v6760_v24  ;;  %v783_v29 = vpop.f32.mrb[22].mxu0 }
 0x18f   :  { %8630 = vst [vmem:[#allocation46_spill] sm:$0xff] %v6798_v41  ;;  %v6807_v2 = vadd.f32 %v670_v32, %v6792_v52  ;;  %v672_v20 = vpop.f32.mrb[23].mxu1  ;;  %v6810_v26 = vadd.f32 %v783_v29, %v6751_v12  ;;  %v785_v13 = vpop.f32.mrb[23].mxu0 }
 0x190   :  { %8631 = vst [vmem:[#allocation47_spill] sm:$0xff] %v6801_v59  ;;  %8632 = vst [vmem:[#allocation48_spill] sm:$0xff] %v6804_v8  ;;  %v6813_v35 = vadd.f32 %v672_v20, %v6757_v15  ;;  %v6816_v10 = vadd.f32 %v785_v13, %v6760_v24 }
 0x191   :  { %8633 = vst [vmem:[#allocation49_spill] sm:$0xff] %v6810_v26 }
 0x192   :  { %8634 = vst [vmem:[#allocation50_spill] sm:$0xff] %v6813_v35  ;;  %8635 = vst [vmem:[#allocation51_spill] sm:$0xff] %v6816_v10 }
 0x194   :  { %v676_v51 = vpop.f32.mrb[24].mxu1  ;;  %v789_v55 = vpop.f32.mrb[24].mxu0 }
 0x195   :  { %v6819_v9 = vadd.f32 %v676_v51, %v6792_v52  ;;  %v678_v8 = vpop.f32.mrb[25].mxu1  ;;  %v6822_v32 = vadd.f32 %v789_v55, %v6751_v12  ;;  %v791_v41 = vpop.f32.mrb[25].mxu0 }
 0x196   :  { %v6825_v29 = vadd.f32 %v678_v8, %v6757_v15  ;;  %v680_v26 = vpop.f32.mrb[26].mxu1  ;;  %v6828_v20 = vadd.f32 %v791_v41, %v6760_v24  ;;  %v793_v35 = vpop.f32.mrb[26].mxu0 }
 0x197   :  { %8636 = vst [vmem:[#allocation52_spill] sm:$0xff] %v6819_v9  ;;  %8637 = vst [vmem:[#allocation53_spill] sm:$0xff] %v6822_v32  ;;  %v6831_v13 = vadd.f32 %v680_v26, %v6792_v52  ;;  %v682_v10 = vpop.f32.mrb[27].mxu1  ;;  %v6834_v51 = vadd.f32 %v793_v35, %v6751_v12  ;;  %v795_v59 = vpop.f32.mrb[27].mxu0 }
 0x198   :  { %8638 = vst [vmem:[#allocation54_spill] sm:$0xff] %v6825_v29  ;;  %8639 = vst [vmem:[#allocation55_spill] sm:$0xff] %v6828_v20  ;;  %v6837_v55 = vadd.f32 %v682_v10, %v6757_v15  ;;  %v6840_v19 = vadd.f32 %v795_v59, %v6760_v24 }
 0x199   :  { %8640 = vst [vmem:[#allocation56_spill] sm:$0xff] %v6831_v13  ;;  %8641 = vst [vmem:[#allocation57_spill] sm:$0xff] %v6834_v51 }
 0x19a   :  { %8642 = vst [vmem:[#allocation58_spill] sm:$0xff] %v6837_v55  ;;  %8643 = vst [vmem:[#allocation59_spill] sm:$0xff] %v6840_v19 }
 0x19c   :  { %v686_v8 = vpop.f32.mrb[28].mxu1  ;;  %v799_v17 = vpop.f32.mrb[28].mxu0 }
 0x19d   :  { %v6843_v41 = vadd.f32 %v686_v8, %v6792_v52  ;;  %v688_v16 = vpop.f32.mrb[29].mxu1  ;;  %v6846_v26 = vadd.f32 %v799_v17, %v6751_v12  ;;  %v801_v14 = vpop.f32.mrb[29].mxu0 }
 0x19e   :  { %v6849_v35 = vadd.f32 %v688_v16, %v6757_v15  ;;  %v690_v20 = vpop.f32.mrb[30].mxu1  ;;  %v6852_v10 = vadd.f32 %v801_v14, %v6760_v24  ;;  %v803_v51 = vpop.f32.mrb[30].mxu0 }
 0x19f   :  { %8644 = vst [vmem:[#allocation60_spill] sm:$0xff] %v6843_v41  ;;  %8645 = vst [vmem:[#allocation61_spill] sm:$0xff] %v6846_v26  ;;  %v6855_v59 = vadd.f32 %v690_v20, %v6792_v52  ;;  %v692_v19 = vpop.f32.mrb[31].mxu1  ;;  %v6858_v8 = vadd.f32 %v803_v51, %v6751_v12  ;;  %v805_v55 = vpop.f32.mrb[31].mxu0 }
 0x1a0   :  { %8646 = vst [vmem:[#allocation62_spill] sm:$0xff] %v6849_v35  ;;  %8647 = vst [vmem:[#allocation63_spill] sm:$0xff] %v6852_v10  ;;  %v6861_v17 = vadd.f32 %v692_v19, %v6757_v15  ;;  %v6864_v32 = vadd.f32 %v805_v55, %v6760_v24 }
 0x1a1   :  { %8648 = vst [vmem:[#allocation64_spill] sm:$0xff] %v6855_v59  ;;  %8649 = vst [vmem:[#allocation65_spill] sm:$0xff] %v6858_v8 }
 0x1a2   :  { %8650 = vst [vmem:[#allocation66_spill] sm:$0xff] %v6861_v17  ;;  %8651 = vst [vmem:[#allocation67_spill] sm:$0xff] %v6864_v32 }
 0x1a4   :  { %v696_v16 = vpop.f32.mrb[32].mxu1  ;;  %v809_v29 = vpop.f32.mrb[32].mxu0 }
 0x1a5   :  { %v6867_v14 = vadd.f32 %v696_v16, %v6792_v52  ;;  %v698_v48 = vpop.f32.mrb[33].mxu1  ;;  %v6870_v20 = vadd.f32 %v809_v29, %v6751_v12  ;;  %v811_v47 = vpop.f32.mrb[33].mxu0 }
 0x1a6   :  { %v6873_v51 = vadd.f32 %v698_v48, %v6757_v15  ;;  %v700_v42 = vpop.f32.mrb[34].mxu1  ;;  %v6876_v19 = vadd.f32 %v811_v47, %v6760_v24  ;;  %v813_v36 = vpop.f32.mrb[34].mxu0 }
 0x1a7   :  { %8652 = vst [vmem:[#allocation68_spill] sm:$0xff] %v6867_v14  ;;  %8653 = vst [vmem:[#allocation69_spill] sm:$0xff] %v6870_v20  ;;  %v6879_v55 = vadd.f32 %v700_v42, %v6792_v52  ;;  %v702_v32 = vpop.f32.mrb[35].mxu1  ;;  %v6882_v16 = vadd.f32 %v813_v36, %v6751_v12  ;;  %v815_v10 = vpop.f32.mrb[35].mxu0 }
 0x1a8   :  { %8654 = vst [vmem:[#allocation70_spill] sm:$0xff] %v6873_v51  ;;  %8655 = vst [vmem:[#allocation71_spill] sm:$0xff] %v6876_v19  ;;  %v6885_v29 = vadd.f32 %v702_v32, %v6757_v15  ;;  %v6888_v8 = vadd.f32 %v815_v10, %v6760_v24 }
 0x1a9   :  { %8656 = vst [vmem:[#allocation72_spill] sm:$0xff] %v6879_v55  ;;  %8657 = vst [vmem:[#allocation73_spill] sm:$0xff] %v6882_v16 }
 0x1aa   :  { %8658 = vst [vmem:[#allocation74_spill] sm:$0xff] %v6885_v29  ;;  %8659 = vst [vmem:[#allocation75_spill] sm:$0xff] %v6888_v8 }
 0x1ac   :  { %v706_v48 = vpop.f32.mrb[36].mxu1  ;;  %v819_v17 = vpop.f32.mrb[36].mxu0 }
 0x1ad   :  { %v6891_v47 = vadd.f32 %v706_v48, %v6792_v52  ;;  %v708_v26 = vpop.f32.mrb[37].mxu1  ;;  %v6894_v42 = vadd.f32 %v819_v17, %v6751_v12  ;;  %v821_v35 = vpop.f32.mrb[37].mxu0 }
 0x1ae   :  { %v6897_v36 = vadd.f32 %v708_v26, %v6757_v15  ;;  %v710_v55 = vpop.f32.mrb[38].mxu1  ;;  %v6900_v32 = vadd.f32 %v821_v35, %v6760_v24  ;;  %v823_v14 = vpop.f32.mrb[38].mxu0 }
 0x1af   :  { %8660 = vst [vmem:[#allocation76_spill] sm:$0xff] %v6891_v47  ;;  %8661 = vst [vmem:[#allocation77_spill] sm:$0xff] %v6894_v42  ;;  %v6903_v10 = vadd.f32 %v710_v55, %v6792_v52  ;;  %v712_v23 = vpop.f32.mrb[39].mxu1  ;;  %v6906_v48 = vadd.f32 %v823_v14, %v6751_v12  ;;  %v825_v47 = vpop.f32.mrb[39].mxu0 }
 0x1b0   :  { %8662 = vst [vmem:[#allocation78_spill] sm:$0xff] %v6897_v36  ;;  %8663 = vst [vmem:[#allocation79_spill] sm:$0xff] %v6900_v32  ;;  %v6909_v17 = vadd.f32 %v712_v23, %v6757_v15  ;;  %v6912_v22 = vadd.f32 %v825_v47, %v6760_v24 }
 0x1b1   :  { %8664 = vst [vmem:[#allocation80_spill] sm:$0xff] %v6903_v10  ;;  %8665 = vst [vmem:[#allocation81_spill] sm:$0xff] %v6906_v48 }
 0x1b2   :  { %8666 = vst [vmem:[#allocation82_spill] sm:$0xff] %v6909_v17  ;;  %8667 = vst [vmem:[#allocation83_spill] sm:$0xff] %v6912_v22 }
 0x1b4   :  { %v716_v26 = vpop.f32.mrb[40].mxu1  ;;  %v829_v21 = vpop.f32.mrb[40].mxu0 }
 0x1b5   :  { %v6915_v35 = vadd.f32 %v716_v26, %v6792_v52  ;;  %v718_v18 = vpop.f32.mrb[41].mxu1  ;;  %v6918_v55 = vadd.f32 %v829_v21, %v6751_v12  ;;  %v831_v10 = vpop.f32.mrb[41].mxu0 }
 0x1b6   :  { %v6921_v14 = vadd.f32 %v718_v18, %v6757_v15  ;;  %v720_v8 = vpop.f32.mrb[42].mxu1  ;;  %v6924_v23 = vadd.f32 %v831_v10, %v6760_v24  ;;  %v833_v19 = vpop.f32.mrb[42].mxu0 }
 0x1b7   :  { %8668 = vst [vmem:[#allocation84_spill] sm:$0xff] %v6915_v35  ;;  %v6927_v47 = vadd.f32 %v720_v8, %v6792_v52  ;;  %v722_v16 = vpop.f32.mrb[43].mxu1  ;;  %v6930_v26 = vadd.f32 %v833_v19, %v6751_v12  ;;  %v835_v35 = vpop.f32.mrb[43].mxu0 }
 0x1b8   :  { %8669 = vst [vmem:[#allocation85_spill] sm:$0xff] %v6924_v23  ;;  %v6933_v21 = vadd.f32 %v722_v16, %v6757_v15  ;;  %v6936_v29 = vadd.f32 %v835_v35, %v6760_v24  ;;  %v6952_v35 = vadd.f32 %v6683_v7, %v6675_v5 }
 0x1b9   :  { %8670 = vst [vmem:[#allocation86_spill] sm:$0xff] %v6927_v47 }
 0x1ba   :  { %8671 = vst [vmem:[#allocation87_spill] sm:$0xff] %v6936_v29  ;;  %8674 = vst [vmem:[#allocation90_spill] sm:$0xff] %v6952_v35 }
 0x1bc   :  { %v726_v18 = vpop.f32.mrb[44].mxu1  ;;  %v839_v20 = vpop.f32.mrb[44].mxu0 }
 0x1bd   :  { %v6939_v10 = vadd.f32 %v726_v18, %v6792_v52  ;;  %v728_v51 = vpop.f32.mrb[45].mxu1  ;;  %v6941_v59 = vpop.f32.mrb[45].mxu0  ;;  %v6956_v18 = vadd.f32 %v6687_v11, %v6679_v6 }
 0x1be   :  { %v730_v8 = vpop.f32.mrb[46].mxu1  ;;  %v6943_v47 = vpop.f32.mrb[46].mxu0 }
 0x1bf   :  { %8672 = vst [vmem:[#allocation88_spill] sm:$0xff] %v6939_v10  ;;  %v6946_v19 = vadd.f32 %v730_v8, %v6792_v52  ;;  %v732_v41 = vpop.f32.mrb[47].mxu1  ;;  %v6948_v16 = vpop.f32.mrb[47].mxu0  ;;  %8675 = vst [vmem:[#allocation91_spill] sm:$0xff] %v6956_v18 }
 0x1c1   :  { %8673 = vst [vmem:[#allocation89_spill] sm:$0xff] %v6946_v19 }
 0x1c4   :  { %v1203_v22 = vpop.f32.mrb[0].mxu0  ;;  %v1246_v32 = vpop.f32.mrb[48].mxu1 }
 0x1c5   :  { %v5199_v10 = vadd.f32 %v6952_v35, %v1203_v22  ;;  %v1205_v48 = vpop.f32.mrb[1].mxu0  ;;  %v4816_v17 = vpop.f32.mrb[49].mxu1 }
 0x1c6   :  { %v1207_v42 = vpop.f32.mrb[2].mxu0  ;;  %v1249_v8 = vpop.f32.mrb[50].mxu1  ;;  %v5201_v5 = vadd.f32 %v6956_v18, %v1205_v48 }
 0x1c7   :  { %v4488_v19 = vmul.f32 -1.442695, %v5199_v10  ;;  %v5203_v36 = vadd.f32 %v6952_v35, %v1207_v42  ;;  %v1209_v13 = vpop.f32.mrb[3].mxu0  ;;  %v4817_v9 = vpop.f32.mrb[51].mxu1 }
 0x1c8   :  { %v5205_v29 = vadd.f32 %v6956_v18, %v1209_v13  ;;  %v4490_v6 = vmul.f32 -1.442695, %v5201_v5  ;;  %v6964_v9 = vrot.slane %v6671_v4, %v6779_v58  ;;  %v6969_v13 = vld [vmem:[%s8464_s7] sm:$0x7] }
 0x1c9   :  { %5490 = vpow2.f32 %v4488_v19  ;;  %v4489_v7 = vmul.f32 -1.442695, %v5203_v36 }
 0x1ca   :  { %v4491_v11 = vmul.f32 -1.442695, %v5205_v29  ;;  %8676 = vst [vmem:[#allocation92_spill] sm:$0xff] %v6964_v9  ;;  %v1247_v36 = vadd.f32 %v1246_v32, %v6964_v9  ;;  %v661_v32 = vadd.f32 %v6773_v0, %v6792_v52 }
 0x1cb   :  { %5492 = vpow2.f32 %v4489_v7  ;;  %v657_v7 = vadd.f32 %v6765_v25, %v6792_v52 }
 0x1cc   :  { %5494 = vpow2.f32 %v4490_v6  ;;  %v1250_v6 = vadd.f32 %v1249_v8, %v6964_v9  ;;  %v840_v8 = vadd.f32 %v839_v20, %v6751_v12 }
 0x1cd   :  { %5496 = vpow2.f32 %v4491_v11 }
 0x1d3   :  { %v5491_v22 = vpop.eup %5490 }
 0x1d4   :  { %v1261_v17 = vadd.f32 1.0, %v5491_v22  ;;  %v6981_v22 = vrot.slane %v6969_v13, %v6666_v3 }
 0x1d5   :  { %v5493_v23 = vpop.eup %5492 }
 0x1d6   :  { %5498 = vrcp.f32 %v1261_v17  ;;  %v1262_v10 = vadd.f32 1.0, %v5493_v23  ;;  %v5495_v42 = vpop.eup %5494  ;;  %v6974_v23 = vrot.slane %v6969_v13, %v6658_v1 }
 0x1d7   :  { %v5497_v48 = vpop.eup %5496  ;;  %v1275_v29 = vadd.f32 1.0, %v5495_v42  ;;  %v729_v42 = vadd.f32 %v728_v51, %v6757_v15  ;;  %v844_v51 = vadd.f32 %v6943_v47, %v6751_v12 }
 0x1d8   :  { %5500 = vrcp.f32 %v1262_v10  ;;  %v1276_v19 = vadd.f32 1.0, %v5497_v48 }
 0x1d9   :  { %5502 = vrcp.f32 %v1275_v29 }
 0x1da   :  { %5504 = vrcp.f32 %v1276_v19 }
 0x1e0   :  { %v5499_v5 = vpop.eup %5498 }
 0x1e1   :  { %v1281_v4 = vmul.f32 %v5499_v5, %v1247_v36  ;;  %v733_v5 = vadd.f32 %v732_v41, %v6757_v15 }
 0x1e2   :  { %v5501_v11 = vpop.eup %5500 }
 0x1e3   :  { %v1283_v17 = vadd.f32 %v1281_v4, %v657_v7  ;;  %v1282_v10 = vmul.f32 %v5501_v11, %v1250_v6 }
 0x1e4   :  { %v1473_v1 = vpop.f32.mrb[52].mxu1 }
 0x1e5   :  { %5506 = vtanh.f32 %v1283_v17  ;;  %v1284_v25 = vadd.f32 %v1282_v10, %v661_v32  ;;  %v1474_v48 = vadd.f32 %v1473_v1, %v6974_v23  ;;  %v1475_v29 = vpop.f32.mrb[53].mxu1  ;;  %v6994_v32 = vpop.permute.xlu0 %1575 }
 0x1e6   :  { %v1476_v36 = vadd.f32 %v1475_v29, %v6981_v22  ;;  %v1477_v3 = vpop.f32.mrb[54].mxu1  ;;  %v5503_v17 = vpop.eup %5502  ;;  %vm1580_vm12 = vcmp.eq.s32.totalorder %v6994_v32, 1 }
 0x1e7   :  { %5508 = vtanh.f32 %v1284_v25  ;;  %v1523_v0 = vadd.f32 %v1474_v48, %v729_v42  ;;  %v1478_v52 = vadd.f32 %v1477_v3, %v6974_v23  ;;  %v1479_v19 = vpop.f32.mrb[55].mxu1  ;;  %v5505_v15 = vpop.eup %5504  ;;  %v1287_v41 = vsub.f32 1.0, %v5503_v17 }
 0x1e8   :  { %v1537_v7 = vadd.f32 %v1476_v36, %v840_v8  ;;  %v1480_v4 = vadd.f32 %v1479_v19, %v6981_v22  ;;  %v1291_v25 = vmul.f32 0.0, %v5503_v17  ;;  %v1288_v12 = vsub.f32 1.0, %v5505_v15 }
 0x1e9   :  { %v4516_v6 = vmul.f32 -1.442695, %v1523_v0  ;;  %v1524_v11 = vadd.f32 %v1478_v52, %v733_v5  ;;  %v6996_v48 = vpop.permute.xlu0 %1578  ;;  %v1292_v36 = vmul.f32 0.0, %v5505_v15 }
 0x1ea   :  { %v1538_v20 = vadd.f32 %v1480_v4, %v844_v51  ;;  %vm1581_vm9 = vcmp.eq.s32.totalorder %v6996_v48, 1  ;;  %v4518_v3 = vmul.f32 -1.442695, %v1537_v7 }
 0x1eb   :  { %5510 = vpow2.f32 %v4516_v6  ;;  %v4517_v10 = vmul.f32 -1.442695, %v1524_v11  ;;  %vm4520_vm10 = vmpackc.low %vm1581_vm9, %vm1580_vm12  ;;  %v8680_v6 = vmov 0.0   ;;  %v8681_v11 = vmov 0  }
 0x1ec   :  { %v4519_v0 = vmul.f32 -1.442695, %v1538_v20 }
 0x1ed   :  { %5512 = vpow2.f32 %v4517_v10  ;;  %v7192_v32 = vpop.permute.xlu0 %1877 }
 0x1ee   :  { %5514 = vpow2.f32 %v4518_v3  ;;  %v7100_v3 = vld [vmem:[#allocation10 + $0x34] ss:$12 sps:$4 sm:$0xff]   ;;  %8696 = vst [vmem:[#allocation110_spill] sm:$0xff] %v7192_v32 }
 0x1ef   :  { %v5507_v1 = vpop.eup %5506  ;;  %5516 = vpow2.f32 %v4519_v0  ;;  %v7104_v0 = vld [vmem:[#allocation10 + $0x30] ss:$12 sps:$4 sm:$0xff]  }
 0x1f0   :  { %v1289_v42 = vmul.f32 %v5507_v1, %v1287_v41 }
 0x1f1   :  { %v5509_v47 = vpop.eup %5508 }
 0x1f2   :  { %v6999_v29 = vadd.f32 %v1291_v25, %v1289_v42  ;;  %v1290_v8 = vmul.f32 %v5509_v47, %v1288_v12  ;;  %v7081_v25 = vld [vmem:[#allocation10] ss:$12 sps:$4 sm:$0xff]   ;;  %v7084_v12 = vld [vmem:[#allocation10 + $0x8] ss:$12 sps:$4 sm:$0xff]  }
 0x1f3   :  { %v7087_v47 = vld [vmem:[#allocation10 + $0x1c] ss:$12 sps:$4 sm:$0xff]  }
 0x1f4   :  { %8677 = vst [vmem:[#allocation93_spill] sm:$0xff] %v6999_v29  ;;  %v7002_v5 = vadd.f32 %v1292_v36, %v1290_v8  ;;  %v7094_v8 = vld [vmem:[#allocation10 + $0x18] ss:$12 sps:$4 sm:$0xff]   ;;  %v7097_v36 = vld [vmem:[#allocation10 + $0x20] ss:$12 sps:$4 sm:$0xff]  }
 0x1f5   :  { %v5511_v52 = vpop.eup %5510 }
 0x1f6   :  { %8678 = vst [vmem:[#allocation94_spill] sm:$0xff] %v7002_v5  ;;  %v7010_v19 = vpack.c.bf16 %v7002_v5, %v6999_v29  ;;  %v1531_v4 = vadd.f32 1.0, %v5511_v52  ;;  %v7107_v52 = vld [vmem:[#allocation10 + $0x38] ss:$12 sps:$4 sm:$0xff]  }
 0x1f7   :  { %v5513_v51 = vpop.eup %5512 }
 0x1f8   :  { %8679 = vst [vmem:[#allocation95_spill] sm:$0xff] %v7010_v19  ;;  %4522 = vmatmul.mubr.msk.bf16.vlgmr.msra.gmra.mrb[4].mxu0 %vm4520_vm10, %v7010_v19  ;;  %4855 = vmatmul.mubr.msk.bf16.vlgmr.msra.gmra.mrb[60].mxu1 %vm4520_vm10, %v7010_v19  ;;  %v1532_v7 = vadd.f32 1.0, %v5513_v51  ;;  %5518 = vrcp.f32 %v1531_v4  ;;  %v7110_v51 = vld [vmem:[#allocation10 + $0x4c] ss:$12 sps:$4 sm:$0xff]   ;;  %v7114_v4 = vld [vmem:[#allocation10 + $0x48] ss:$12 sps:$4 sm:$0xff]  }
 0x1f9   :  { %1741 = vmatpush1.bf16.msra.mxu0 %v6491_v27  ;;  %4859 = vmatpush3.bf16.msra.mxu1 %v6586_v50  ;;  %v5515_v27 = vpop.eup %5514 }
 0x1fa   :  { %1742 = vmatprep.subr.bf16.mxu0 %v6493_v28  ;;  %4860 = vmatprep.subr.bf16.mxu1 %v8680_v6  ;;  %5520 = vrcp.f32 %v1532_v7  ;;  %v7027_v28 = vrot.slane %v6969_v13, %v6779_v58  ;;  %v5517_v50 = vpop.eup %5516  ;;  %v7117_v7 = vld [vmem:[#allocation10 + $0x50] ss:$12 sps:$4 sm:$0xff]  }
 0x1fb   :  { %1772 = vmatprep.mubr.bf16.mxu0 %v8681_v11  ;;  %4874 = vmatprep.mubr.msk.bf16.mxu1 %vm6152_vm4, %v8680_v6  ;;  %v1546_v20 = vadd.f32 1.0, %v5517_v50  ;;  %v7124_v50 = vld [vmem:[#allocation10 + $0x60] ss:$12 sps:$4 sm:$0xff]  }
 0x1fd   :  { %1743 = vmatpush1.bf16.msra.mxu0 %v6502_v30  ;;  %4861 = vmatpush3.bf16.msra.mxu1 %v6601_v53  ;;  %v1545_v30 = vadd.f32 1.0, %v5515_v27  ;;  %v7120_v27 = vld [vmem:[#allocation10 + $0x64] ss:$12 sps:$4 sm:$0xff]  }
 0x1fe   :  { %1744 = vmatprep.subr.bf16.mxu0 %v6506_v31  ;;  %4862 = vmatprep.subr.bf16.mxu1 %v8680_v6 }
 0x1ff   :  { %5522 = vrcp.f32 %v1545_v30  ;;  %v7127_v30 = vld [vmem:[#allocation10 + $0x68] ss:$12 sps:$4 sm:$0xff]  }
 0x200   :  { %5524 = vrcp.f32 %v1546_v20  ;;  %v7134_v20 = vld [vmem:[#allocation10 + $0x78] ss:$12 sps:$4 sm:$0xff]  }
 0x201   :  { %1745 = vmatpush1.bf16.msra.mxu0 %v6516_v33  ;;  %4863 = vmatpush3.bf16.msra.mxu1 %v6607_v54  ;;  %v842_v33 = vadd.f32 %v6941_v59, %v6760_v24  ;;  %8686 = vst [vmem:[#allocation100_spill] sm:$0xff] %v7134_v20 }
 0x202   :  { %1746 = vmatprep.subr.bf16.mxu0 %v6519_v34  ;;  %4864 = vmatprep.subr.bf16.mxu1 %v8680_v6  ;;  %v5519_v58 = vpop.eup %5518 }
 0x204   :  { %v1516_v53 = vpop.f32.mrb[56].mxu1  ;;  %v5521_v15 = vpop.eup %5520 }
 0x205   :  { %v1517_v31 = vadd.f32 %v1516_v53, %v7027_v28  ;;  %v4836_v17 = vpop.f32.mrb[57].mxu1  ;;  %1747 = vmatpush1.bf16.msra.mxu0 %v6532_v37  ;;  %4865 = vmatpush3.bf16.msra.mxu1 %v6615_v56  ;;  %v846_v37 = vadd.f32 %v6948_v16, %v6760_v24  ;;  %v7059_v16 = vld [vmem:[#allocation10 + $0x4] ss:$12 sps:$4 sm:$0xff]   ;;  %v7130_v53 = vld [vmem:[#allocation10 + $0x7c] ss:$12 sps:$4 sm:$0xff]  }
 0x206   :  { %v1519_v13 = vpop.f32.mrb[58].mxu1  ;;  %1748 = vmatprep.subr.bf16.mxu0 %v6535_v38  ;;  %4866 = vmatprep.subr.bf16.mxu1 %v8680_v6  ;;  %8685 = vst [vmem:[#allocation99_spill] sm:$0xff] %v7130_v53  ;;  %v7140_v17 = vld [vmem:[#allocation10 + $0x94] ss:$12 sps:$4 sm:$0xff]  }
 0x207   :  { %v1551_v34 = vmul.f32 %v5519_v58, %v1517_v31  ;;  %v1520_v54 = vadd.f32 %v1519_v13, %v7027_v28  ;;  %v4837_v10 = vpop.f32.mrb[59].mxu1  ;;  %v7137_v31 = vld [vmem:[#allocation10 + $0x80] ss:$12 sps:$4 sm:$0xff]   ;;  %8688 = vst [vmem:[#allocation102_spill] sm:$0xff] %v7140_v17  ;;  %v7144_v58 = vld [vmem:[#allocation10 + $0x90] ss:$12 sps:$4 sm:$0xff]  }
 0x208   :  { %8687 = vst [vmem:[#allocation101_spill] sm:$0xff] %v7137_v31  ;;  %8689 = vst [vmem:[#allocation103_spill] sm:$0xff] %v7144_v58  ;;  %v7147_v13 = vld [vmem:[#allocation10 + $0x98] ss:$12 sps:$4 sm:$0xff]  }
 0x209   :  { %v1553_v56 = vadd.f32 %v1551_v34, %v842_v33  ;;  %v1552_v41 = vmul.f32 %v5521_v15, %v1520_v54  ;;  %1749 = vmatpush1.bf16.msra.mxu0 %v6540_v39  ;;  %4867 = vmatpush3.bf16.msra.mxu1 %v6619_v57  ;;  %v5523_v24 = vpop.eup %5522  ;;  %8690 = vst [vmem:[#allocation104_spill] sm:$0xff] %v7147_v13  ;;  %v7150_v33 = vld [vmem:[#allocation10 + $0xac] ss:$12 sps:$4 sm:$0xff]   ;;  %v7154_v34 = vld [vmem:[#allocation10 + $0xa8] ss:$12 sps:$4 sm:$0xff]  }
 0x20a   :  { %1750 = vmatprep.subr.bf16.mxu0 %v6544_v40  ;;  %4868 = vmatprep.subr.bf16.mxu1 %v8680_v6  ;;  %v5525_v39 = vpop.eup %5524  ;;  %v7055_v40 = vpop.permute.xlu1 %1589  ;;  %v1557_v57 = vsub.f32 1.0, %v5523_v24  ;;  %8691 = vst [vmem:[#allocation105_spill] sm:$0xff] %v7150_v33  ;;  %8692 = vst [vmem:[#allocation106_spill] sm:$0xff] %v7154_v34  ;;  %v7157_v54 = vld [vmem:[#allocation10 + $0xb0] ss:$12 sps:$4 sm:$0xff]  }
 0x20b   :  { %5526 = vtanh.f32 %v1553_v56  ;;  %v1554_v38 = vadd.f32 %v1552_v41, %v846_v37  ;;  %vm1594_vm10 = vcmp.eq.s32.totalorder %v7055_v40, 1  ;;  %8693 = vst [vmem:[#allocation107_spill] sm:$0xff] %v7157_v54  ;;  %v7160_v10 = vld [vmem:[#allocation11 + $0x4] ss:$12 sps:$4 sm:$0xff]  }
 0x20c   :  { %8694 = vst [vmem:[#allocation108_spill] sm:$0xff] %v7160_v10 }
 0x20d   :  { %5528 = vtanh.f32 %v1554_v38  ;;  %1751 = vmatpush1.bf16.msra.mxu0 %v6556_v43  ;;  %4869 = vmatpush3.bf16.msra.mxu1 %v6623_v60  ;;  %v1558_v60 = vsub.f32 1.0, %v5525_v39 }
 0x20e   :  { %1752 = vmatprep.subr.bf16.mxu0 %v6559_v44  ;;  %4870 = vmatprep.subr.bf16.mxu1 %v8680_v6  ;;  %v1561_v44 = vmul.f32 0.0, %v5523_v24  ;;  %v7065_v42 = vpop.permute.xlu1 %1592 }
 0x20f   :  { %vm1595_vm14 = vcmp.eq.s32.totalorder %v7065_v42, 1 }
 0x210   :  { %vm4530_vm3 = vmpackc.low %vm1595_vm14, %vm1594_vm10 }
 0x211   :  { %1753 = vmatpush1.bf16.msra.mxu0 %v6564_v45  ;;  %4871 = vmatpush3.bf16.msra.mxu1 %v6627_v61 }
 0x212   :  { %1754 = vmatprep.subr.bf16.mxu0 %v6568_v46  ;;  %4872 = vmatprep.subr.bf16.mxu1 %v8680_v6  ;;  %v1562_v46 = vmul.f32 0.0, %v5525_v39 }
 0x215   :  { %v5527_v43 = vpop.eup %5526  ;;  %1755 = vmatpush1.bf16.msra.mxu0 %v6580_v49  ;;  %4873 = vmatpush3.bf16.msra.mxu1 %v6631_v63 }
 0x216   :  { %v1559_v59 = vmul.f32 %v5527_v43, %v1557_v57  ;;  %1915 = vmatprep.subr.bf16.mxu0 %v7059_v16  ;;  %4878 = vmatprep.subr.bf16.mxu1 %v8680_v6 }
 0x217   :  { %v5529_v45 = vpop.eup %5528 }
 0x218   :  { %v1560_v61 = vmul.f32 %v5529_v45, %v1558_v60  ;;  %v7063_v1 = vadd.f32 %v1561_v44, %v1559_v59 }
 0x21a   :  { %8682 = vst [vmem:[#allocation96_spill] sm:$0xff] %v7063_v1  ;;  %v7069_v49 = vadd.f32 %v1562_v46, %v1560_v61 }
 0x21c   :  { %8683 = vst [vmem:[#allocation97_spill] sm:$0xff] %v7069_v49  ;;  %v7073_v63 = vpack.c.bf16 %v7069_v49, %v7063_v1 }
 0x21e   :  { %8684 = vst [vmem:[#allocation98_spill] sm:$0xff] %v7073_v63  ;;  %4532 = vmatmul.mubr.msk.bf16.vlgmr.msra.gmra.mrb[48].mxu0 %vm4530_vm3, %v7073_v63  ;;  %4875 = vmatmul.mubr.msk.bf16.vlgmr.msra.gmra.mrb[64].mxu1 %vm4530_vm3, %v7073_v63  ;;  %vm1882_vm3 = vcmp.eq.s32.totalorder %v7192_v32, 1 }
 0x21f   :  { %1916 = vmatpush1.bf16.msra.mxu0 %v7081_v25  ;;  %4879 = vmatpush3.bf16.msra.mxu1 %v7084_v12 }
 0x220   :  { %1917 = vmatprep.subr.bf16.mxu0 %v7087_v47  ;;  %4880 = vmatprep.subr.bf16.mxu1 %v8680_v6 }
 0x221   :  { %1947 = vmatprep.mubr.bf16.mxu0 %v8681_v11  ;;  %4894 = vmatprep.mubr.msk.bf16.mxu1 %vm6152_vm4, %v8680_v6 }
 0x223   :  { %1918 = vmatpush1.bf16.msra.mxu0 %v7094_v8  ;;  %4881 = vmatpush3.bf16.msra.mxu1 %v7097_v36 }
 0x224   :  { %1919 = vmatprep.subr.bf16.mxu0 %v7100_v3  ;;  %4882 = vmatprep.subr.bf16.mxu1 %v8680_v6 }
 0x227   :  { %1920 = vmatpush1.bf16.msra.mxu0 %v7104_v0  ;;  %4883 = vmatpush3.bf16.msra.mxu1 %v7107_v52 }
 0x228   :  { %1921 = vmatprep.subr.bf16.mxu0 %v7110_v51  ;;  %4884 = vmatprep.subr.bf16.mxu1 %v8680_v6 }
 0x22b   :  { %1922 = vmatpush1.bf16.msra.mxu0 %v7114_v4  ;;  %4885 = vmatpush3.bf16.msra.mxu1 %v7117_v7 }
 0x22c   :  { %1923 = vmatprep.subr.bf16.mxu0 %v7120_v27  ;;  %4886 = vmatprep.subr.bf16.mxu1 %v8680_v6 }
 0x22f   :  { %1924 = vmatpush1.bf16.msra.mxu0 %v7124_v50  ;;  %4887 = vmatpush3.bf16.msra.mxu1 %v7127_v30 }
 0x230   :  { %1925 = vmatprep.subr.bf16.mxu0 %v7130_v53  ;;  %4888 = vmatprep.subr.bf16.mxu1 %v8680_v6 }
 0x233   :  { %1926 = vmatpush1.bf16.msra.mxu0 %v7134_v20  ;;  %4889 = vmatpush3.bf16.msra.mxu1 %v7137_v31 }
 0x234   :  { %1927 = vmatprep.subr.bf16.mxu0 %v7140_v17  ;;  %4890 = vmatprep.subr.bf16.mxu1 %v8680_v6 }
 0x237   :  { %1928 = vmatpush1.bf16.msra.mxu0 %v7144_v58  ;;  %4891 = vmatpush3.bf16.msra.mxu1 %v7147_v13 }
 0x238   :  { %1929 = vmatprep.subr.bf16.mxu0 %v7150_v33  ;;  %4892 = vmatprep.subr.bf16.mxu1 %v8680_v6 }
 0x23b   :  { %1930 = vmatpush1.bf16.msra.mxu0 %v7154_v34  ;;  %4893 = vmatpush3.bf16.msra.mxu1 %v7157_v54 }
 0x23c   :  { %2042 = vmatprep.subr.bf16.mxu0 %v7160_v10  ;;  %4898 = vmatprep.subr.bf16.mxu1 %v8680_v6 }
 0x2cb   :  { %v1647_v15 = vpop.f32.mrb[4].mxu0  ;;  %v1690_v37 = vpop.f32.mrb[60].mxu1 }
 0x2cc   :  { %v5207_v56 = vadd.f32 %v6952_v35, %v1647_v15  ;;  %v1649_v41 = vpop.f32.mrb[5].mxu0  ;;  %v4856_v38 = vpop.f32.mrb[61].mxu1 }
 0x2cd   :  { %v1651_v24 = vpop.f32.mrb[6].mxu0  ;;  %v1693_v39 = vpop.f32.mrb[62].mxu1  ;;  %v5209_v59 = vadd.f32 %v6956_v18, %v1649_v41  ;;  %v1691_v41 = vadd.f32 %v1690_v37, %v6964_v9 }
 0x2ce   :  { %v4526_v57 = vmul.f32 -1.442695, %v5207_v56  ;;  %v5211_v43 = vadd.f32 %v6952_v35, %v1651_v24  ;;  %v1653_v44 = vpop.f32.mrb[7].mxu0  ;;  %v4857_v60 = vpop.f32.mrb[63].mxu1 }
 0x2cf   :  { %v5213_v46 = vadd.f32 %v6956_v18, %v1653_v44  ;;  %v4528_v61 = vmul.f32 -1.442695, %v5209_v59  ;;  %v1694_v44 = vadd.f32 %v1693_v39, %v6964_v9 }
 0x2d0   :  { %5530 = vpow2.f32 %v4526_v57  ;;  %v4527_v45 = vmul.f32 -1.442695, %v5211_v43 }
 0x2d1   :  { %v4529_v19 = vmul.f32 -1.442695, %v5213_v46 }
 0x2d2   :  { %5532 = vpow2.f32 %v4527_v45 }
 0x2d3   :  { %5534 = vpow2.f32 %v4528_v61 }
 0x2d4   :  { %5536 = vpow2.f32 %v4529_v19 }
 0x2da   :  { %v5531_v15 = vpop.eup %5530 }
 0x2db   :  { %v1705_v38 = vadd.f32 1.0, %v5531_v15 }
 0x2dc   :  { %v5533_v63 = vpop.eup %5532 }
 0x2dd   :  { %5538 = vrcp.f32 %v1705_v38  ;;  %v1706_v56 = vadd.f32 1.0, %v5533_v63  ;;  %v5535_v24 = vpop.eup %5534 }
 0x2de   :  { %v5537_v35 = vpop.eup %5536  ;;  %v1719_v60 = vadd.f32 1.0, %v5535_v24 }
 0x2df   :  { %5540 = vrcp.f32 %v1706_v56  ;;  %v1720_v57 = vadd.f32 1.0, %v5537_v35 }
 0x2e0   :  { %5542 = vrcp.f32 %v1719_v60 }
 0x2e1   :  { %5544 = vrcp.f32 %v1720_v57 }
 0x2e7   :  { %v5539_v43 = vpop.eup %5538 }
 0x2e8   :  { %v1725_v10 = vmul.f32 %v5539_v43, %v1691_v41 }
 0x2e9   :  { %v5541_v59 = vpop.eup %5540 }
 0x2ea   :  { %v1727_v19 = vadd.f32 %v1725_v10, %v6795_v62  ;;  %v1726_v45 = vmul.f32 %v5541_v59, %v1694_v44  ;;  %v5543_v15 = vpop.eup %5542 }
 0x2eb   :  { %v5545_v62 = vpop.eup %5544  ;;  %v1731_v57 = vsub.f32 1.0, %v5543_v15 }
 0x2ec   :  { %5546 = vtanh.f32 %v1727_v19  ;;  %v1728_v63 = vadd.f32 %v1726_v45, %v6807_v2  ;;  %v1582_v19 = vsel %vm1580_vm12, %v6999_v29, 0.0  ;;  %v7259_v29 = vld [vmem:[#allocation11 + $0x60] ss:$12 sps:$4 sm:$0xff]  }
 0x2ee   :  { %5548 = vtanh.f32 %v1728_v63 }
 0x2f1   :  { %v1774_v46 = vpop.f32.mrb[48].mxu0  ;;  %v7172_v61 = vpop.f32.mrb[64].mxu1 }
 0x2f2   :  { %v1775_v35 = vadd.f32 %v1774_v46, %v6974_v23  ;;  %v1776_v37 = vpop.f32.mrb[49].mxu0  ;;  %v4876_v38 = vpop.f32.mrb[65].mxu1  ;;  %v1735_v46 = vmul.f32 %v5543_v15, %v1582_v19 }
 0x2f3   :  { %v1777_v56 = vadd.f32 %v1776_v37, %v6981_v22  ;;  %v1778_v39 = vpop.f32.mrb[50].mxu0  ;;  %v7176_v24 = vpop.f32.mrb[66].mxu1  ;;  %v1732_v37 = vsub.f32 1.0, %v5545_v62 }
 0x2f4   :  { %v1824_v10 = vadd.f32 %v1775_v35, %v6921_v14  ;;  %v1779_v60 = vadd.f32 %v1778_v39, %v6974_v23  ;;  %v1780_v2 = vpop.f32.mrb[51].mxu0  ;;  %v4877_v41 = vpop.f32.mrb[67].mxu1 }
 0x2f5   :  { %v1838_v43 = vadd.f32 %v1777_v56, %v6918_v55  ;;  %v1781_v44 = vadd.f32 %v1780_v2, %v6981_v22  ;;  %v1583_v55 = vsel %vm1581_vm9, %v7002_v5, 0.0 }
 0x2f6   :  { %v5547_v59 = vpop.eup %5546  ;;  %v4536_v45 = vmul.f32 -1.442695, %v1824_v10  ;;  %v1825_v63 = vadd.f32 %v1779_v60, %v6933_v21  ;;  %v1736_v39 = vmul.f32 %v5545_v62, %v1583_v55  ;;  %v7194_v21 = vpop.permute.xlu1 %1880 }
 0x2f7   :  { %v1839_v14 = vadd.f32 %v1781_v44, %v6930_v26  ;;  %v1733_v35 = vmul.f32 %v5547_v59, %v1731_v57  ;;  %8697 = vst [vmem:[#allocation111_spill] sm:$0xff] %v7194_v21  ;;  %v4538_v15 = vmul.f32 -1.442695, %v1838_v43  ;;  %vm1883_vm12 = vcmp.eq.s32.totalorder %v7194_v21, 1  ;;  %v7212_v57 = vld [vmem:[#allocation11] ss:$12 sps:$4 sm:$0xff]  }
 0x2f8   :  { %v5549_v38 = vpop.eup %5548  ;;  %5550 = vpow2.f32 %v4536_v45  ;;  %v4537_v56 = vmul.f32 -1.442695, %v1825_v63  ;;  %v7215_v43 = vld [vmem:[#allocation11 + $0x8] ss:$12 sps:$4 sm:$0xff]  }
 0x2f9   :  { %v1734_v2 = vmul.f32 %v5549_v38, %v1732_v37  ;;  %v7190_v41 = vadd.f32 %v1735_v46, %v1733_v35  ;;  %v4539_v26 = vmul.f32 -1.442695, %v1839_v14  ;;  %v7218_v59 = vld [vmem:[#allocation11 + $0x1c] ss:$12 sps:$4 sm:$0xff]   ;;  %v7225_v46 = vld [vmem:[#allocation11 + $0x18] ss:$12 sps:$4 sm:$0xff]  }
 0x2fa   :  { %5552 = vpow2.f32 %v4537_v56  ;;  %v7228_v37 = vld [vmem:[#allocation11 + $0x20] ss:$12 sps:$4 sm:$0xff]   ;;  %v7235_v38 = vld [vmem:[#allocation11 + $0x30] ss:$12 sps:$4 sm:$0xff]   ;;  %v7309_v40 = vpop.permute.xlu1 %1894 }
 0x2fb   :  { %8695 = vst [vmem:[#allocation109_spill] sm:$0xff] %v7190_v41  ;;  %v7196_v10 = vadd.f32 %v1736_v39, %v1734_v2  ;;  %v7203_v48 = vsel %vm1882_vm3, %v7190_v41, %v1582_v19  ;;  %5554 = vpow2.f32 %v4538_v15  ;;  %v7231_v14 = vld [vmem:[#allocation11 + $0x34] ss:$12 sps:$4 sm:$0xff]   ;;  %v7241_v56 = vld [vmem:[#allocation11 + $0x4c] ss:$12 sps:$4 sm:$0xff]   ;;  %8713 = vst [vmem:[#allocation123_spill] sm:$0xff] %v7309_v40 }
 0x2fc   :  { %5556 = vpow2.f32 %v4539_v26  ;;  %v7245_v15 = vld [vmem:[#allocation11 + $0x48] ss:$12 sps:$4 sm:$0xff]   ;;  %v7248_v26 = vld [vmem:[#allocation11 + $0x50] ss:$12 sps:$4 sm:$0xff]  }
 0x2fd   :  { %8698 = vst [vmem:[#allocation112_spill] sm:$0xff] %v7196_v10  ;;  %v7208_v62 = vsel %vm1883_vm12, %v7196_v10, %v1583_v55  ;;  %v7238_v55 = vld [vmem:[#allocation11 + $0x38] ss:$12 sps:$4 sm:$0xff]   ;;  %v7262_v10 = vld [vmem:[#allocation11 + $0x68] ss:$12 sps:$4 sm:$0xff]  }
 0x2fe   :  { %v1914_v60 = vpack.c.bf16 %v7208_v62, %v7203_v48  ;;  %8699 = vst [vmem:[#allocation113_spill] sm:$0xff] %v7262_v10  ;;  %v7266_v21 = vld [vmem:[#allocation11 + $0x7c] ss:$12 sps:$4 sm:$0xff]  }
 0x300   :  { %1948 = vmatmul.mubr.bf16.vlgmr.msra.gmra.mrb[8].mxu0 %v1914_v60  ;;  %4895 = vmatmul.mubr.bf16.vlgmr.msra.gmra.mrb[68].mxu1 %v1914_v60  ;;  %v1818_v60 = vadd.f32 %v7172_v61, %v7027_v28  ;;  %v8700_v61 = vld [vmem:[#allocation85_spill] sm:$0xff] }
 0x301   :  { %2043 = vmatpush1.bf16.msra.mxu0 %v7212_v57  ;;  %4899 = vmatpush3.bf16.msra.mxu1 %v7215_v43  ;;  %8701 = vst [vmem:[#allocation85_spill] sm:$0xff] %v7266_v21 }
 0x302   :  { %v5551_v44 = vpop.eup %5550  ;;  %2044 = vmatprep.subr.bf16.mxu0 %v7218_v59  ;;  %4900 = vmatprep.subr.bf16.mxu1 %v8680_v6 }
 0x303   :  { %v1832_v19 = vadd.f32 1.0, %v5551_v44  ;;  %2074 = vmatprep.mubr.bf16.mxu0 %v8681_v11  ;;  %4914 = vmatprep.mubr.msk.bf16.mxu1 %vm6152_vm4, %v8680_v6 }
 0x304   :  { %v5553_v45 = vpop.eup %5552 }
 0x305   :  { %5558 = vrcp.f32 %v1832_v19  ;;  %v1833_v63 = vadd.f32 1.0, %v5553_v45  ;;  %2045 = vmatpush1.bf16.msra.mxu0 %v7225_v46  ;;  %4901 = vmatpush3.bf16.msra.mxu1 %v7228_v37  ;;  %v5555_v35 = vpop.eup %5554  ;;  %v7253_v19 = vld [vmem:[#allocation11 + $0x64] ss:$12 sps:$4 sm:$0xff]  }
 0x306   :  { %2046 = vmatprep.subr.bf16.mxu0 %v7231_v14  ;;  %4902 = vmatprep.subr.bf16.mxu1 %v8680_v6  ;;  %v5557_v39 = vpop.eup %5556  ;;  %v1846_v2 = vadd.f32 1.0, %v5555_v35  ;;  %v1821_v35 = vadd.f32 %v7176_v24, %v7027_v28  ;;  %v8702_v24 = vld [vmem:[#allocation87_spill] sm:$0xff] }
 0x307   :  { %5560 = vrcp.f32 %v1833_v63  ;;  %v1847_v44 = vadd.f32 1.0, %v5557_v39 }
 0x308   :  { %5562 = vrcp.f32 %v1846_v2 }
 0x309   :  { %2047 = vmatpush1.bf16.msra.mxu0 %v7235_v38  ;;  %4903 = vmatpush3.bf16.msra.mxu1 %v7238_v55  ;;  %5564 = vrcp.f32 %v1847_v44  ;;  %v7281_v44 = vld [vmem:[#allocation11 + $0x90] ss:$12 sps:$4 sm:$0xff]  }
 0x30a   :  { %2048 = vmatprep.subr.bf16.mxu0 %v7241_v56  ;;  %4904 = vmatprep.subr.bf16.mxu1 %v8680_v6  ;;  %8706 = vst [vmem:[#allocation116_spill] sm:$0xff] %v7281_v44 }
 0x30d   :  { %2049 = vmatpush1.bf16.msra.mxu0 %v7245_v15  ;;  %4905 = vmatpush3.bf16.msra.mxu1 %v7248_v26 }
 0x30e   :  { %2050 = vmatprep.subr.bf16.mxu0 %v7253_v19  ;;  %4906 = vmatprep.subr.bf16.mxu1 %v8680_v6 }
 0x30f   :  { %v5559_v45 = vpop.eup %5558 }
 0x310   :  { %v1852_v63 = vmul.f32 %v5559_v45, %v1818_v60  ;;  %v7271_v60 = vld [vmem:[#allocation11 + $0x78] ss:$12 sps:$4 sm:$0xff]   ;;  %v7274_v45 = vld [vmem:[#allocation11 + $0x80] ss:$12 sps:$4 sm:$0xff]  }
 0x311   :  { %v5561_v5 = vpop.eup %5560  ;;  %2051 = vmatpush1.bf16.msra.mxu0 %v7259_v29  ;;  %4907 = vmatpush3.bf16.msra.mxu1 %v7262_v10  ;;  %8703 = vst [vmem:[#allocation87_spill] sm:$0xff] %v7271_v60  ;;  %8704 = vst [vmem:[#allocation114_spill] sm:$0xff] %v7274_v45  ;;  %v7307_v10 = vpop.permute.xlu0 %1891 }
 0x312   :  { %v1854_v39 = vadd.f32 %v1852_v63, %v8700_v61  ;;  %v1853_v41 = vmul.f32 %v5561_v5, %v1821_v35  ;;  %2052 = vmatprep.subr.bf16.mxu0 %v7266_v21  ;;  %4908 = vmatprep.subr.bf16.mxu1 %v8680_v6  ;;  %v7277_v5 = vld [vmem:[#allocation11 + $0x94] ss:$12 sps:$4 sm:$0xff]   ;;  %v5563_v63 = vpop.eup %5562  ;;  %v7287_v35 = vld [vmem:[#allocation11 + $0xac] ss:$12 sps:$4 sm:$0xff]   ;;  %8712 = vst [vmem:[#allocation122_spill] sm:$0xff] %v7307_v10  ;;  %vm1896_vm9 = vcmp.eq.s32.totalorder %v7307_v10, 1 }
 0x313   :  { %8705 = vst [vmem:[#allocation115_spill] sm:$0xff] %v7277_v5  ;;  %8708 = vst [vmem:[#allocation118_spill] sm:$0xff] %v7287_v35  ;;  %v5565_v61 = vpop.eup %5564 }
 0x314   :  { %5566 = vtanh.f32 %v1854_v39  ;;  %v1855_v2 = vadd.f32 %v1853_v41, %v8702_v24  ;;  %v7284_v41 = vld [vmem:[#allocation11 + $0x98] ss:$12 sps:$4 sm:$0xff]   ;;  %v1858_v39 = vsub.f32 1.0, %v5563_v63  ;;  %v7291_v24 = vld [vmem:[#allocation11 + $0xa8] ss:$12 sps:$4 sm:$0xff]  }
 0x315   :  { %2053 = vmatpush1.bf16.msra.mxu0 %v7271_v60  ;;  %4909 = vmatpush3.bf16.msra.mxu1 %v7274_v45  ;;  %8707 = vst [vmem:[#allocation117_spill] sm:$0xff] %v7284_v41  ;;  %8709 = vst [vmem:[#allocation119_spill] sm:$0xff] %v7291_v24 }
 0x316   :  { %5568 = vtanh.f32 %v1855_v2  ;;  %2054 = vmatprep.subr.bf16.mxu0 %v7277_v5  ;;  %4910 = vmatprep.subr.bf16.mxu1 %v8680_v6  ;;  %v7294_v2 = vld [vmem:[#allocation11 + $0xb0] ss:$12 sps:$4 sm:$0xff]  }
 0x317   :  { %8710 = vst [vmem:[#allocation120_spill] sm:$0xff] %v7294_v2 }
 0x319   :  { %2055 = vmatpush1.bf16.msra.mxu0 %v7281_v44  ;;  %4911 = vmatpush3.bf16.msra.mxu1 %v7284_v41  ;;  %v1596_v41 = vsel %vm1594_vm10, %v7063_v1, 0.0  ;;  %vm1897_vm10 = vcmp.eq.s32.totalorder %v7309_v40, 1 }
 0x31a   :  { %2056 = vmatprep.subr.bf16.mxu0 %v7287_v35  ;;  %4912 = vmatprep.subr.bf16.mxu1 %v8680_v6  ;;  %v1859_v35 = vsub.f32 1.0, %v5565_v61  ;;  %v1862_v5 = vmul.f32 %v5563_v63, %v1596_v41 }
 0x31d   :  { %2057 = vmatpush1.bf16.msra.mxu0 %v7291_v24  ;;  %4913 = vmatpush3.bf16.msra.mxu1 %v7294_v2  ;;  %v1597_v24 = vsel %vm1595_vm14, %v7069_v49, 0.0 }
 0x31e   :  { %v5567_v32 = vpop.eup %5566  ;;  %2217 = vmatprep.subr.bf16.mxu0 %v7059_v16  ;;  %4918 = vmatprep.subr.bf16.mxu1 %v8680_v6  ;;  %v1863_v21 = vmul.f32 %v5565_v61, %v1597_v24 }
 0x31f   :  { %v1860_v44 = vmul.f32 %v5567_v32, %v1858_v39 }
 0x320   :  { %v5569_v45 = vpop.eup %5568 }
 0x321   :  { %v1861_v60 = vmul.f32 %v5569_v45, %v1859_v35  ;;  %v7305_v2 = vadd.f32 %v1862_v5, %v1860_v44  ;;  %v8716_v44 = vld [vmem:[#allocation90_spill] sm:$0xff] }
 0x323   :  { %8711 = vst [vmem:[#allocation121_spill] sm:$0xff] %v7305_v2  ;;  %v7311_v1 = vadd.f32 %v1863_v21, %v1861_v60  ;;  %v7318_v32 = vsel %vm1896_vm9, %v7305_v2, %v1596_v41  ;;  %v8715_v21 = vld [vmem:[#allocation108_spill] sm:$0xff] }
 0x325   :  { %8714 = vst [vmem:[#allocation124_spill] sm:$0xff] %v7311_v1  ;;  %v7323_v42 = vsel %vm1897_vm10, %v7311_v1, %v1597_v24 }
 0x326   :  { %v2041_v45 = vpack.c.bf16 %v7323_v42, %v7318_v32 }
 0x328   :  { %2075 = vmatmul.mubr.bf16.vlgmr.msra.gmra.mrb[52].mxu0 %v2041_v45  ;;  %4915 = vmatmul.mubr.bf16.vlgmr.msra.gmra.mrb[72].mxu1 %v2041_v45 }
 0x329   :  { %2218 = vmatpush1.bf16.msra.mxu0 %v7081_v25  ;;  %4919 = vmatpush3.bf16.msra.mxu1 %v7084_v12 }
 0x32a   :  { %2219 = vmatprep.subr.bf16.mxu0 %v7087_v47  ;;  %4920 = vmatprep.subr.bf16.mxu1 %v8680_v6 }
 0x32b   :  { %2249 = vmatprep.mubr.bf16.mxu0 %v8681_v11  ;;  %4934 = vmatprep.mubr.msk.bf16.mxu1 %vm6152_vm4, %v8680_v6 }
 0x32d   :  { %2220 = vmatpush1.bf16.msra.mxu0 %v7094_v8  ;;  %4921 = vmatpush3.bf16.msra.mxu1 %v7097_v36 }
 0x32e   :  { %2221 = vmatprep.subr.bf16.mxu0 %v7100_v3  ;;  %4922 = vmatprep.subr.bf16.mxu1 %v8680_v6 }
 0x331   :  { %2222 = vmatpush1.bf16.msra.mxu0 %v7104_v0  ;;  %4923 = vmatpush3.bf16.msra.mxu1 %v7107_v52 }
 0x332   :  { %2223 = vmatprep.subr.bf16.mxu0 %v7110_v51  ;;  %4924 = vmatprep.subr.bf16.mxu1 %v8680_v6 }
 0x335   :  { %2224 = vmatpush1.bf16.msra.mxu0 %v7114_v4  ;;  %4925 = vmatpush3.bf16.msra.mxu1 %v7117_v7 }
 0x336   :  { %2225 = vmatprep.subr.bf16.mxu0 %v7120_v27  ;;  %4926 = vmatprep.subr.bf16.mxu1 %v8680_v6 }
 0x339   :  { %2226 = vmatpush1.bf16.msra.mxu0 %v7124_v50  ;;  %4927 = vmatpush3.bf16.msra.mxu1 %v7127_v30 }
 0x33a   :  { %2227 = vmatprep.subr.bf16.mxu0 %v7130_v53  ;;  %4928 = vmatprep.subr.bf16.mxu1 %v8680_v6 }
 0x33d   :  { %2228 = vmatpush1.bf16.msra.mxu0 %v7134_v20  ;;  %4929 = vmatpush3.bf16.msra.mxu1 %v7137_v31  ;;  %v8722_v20 = vld [vmem:[#allocation81_spill] sm:$0xff] }
 0x33e   :  { %2229 = vmatprep.subr.bf16.mxu0 %v7140_v17  ;;  %4930 = vmatprep.subr.bf16.mxu1 %v8680_v6 }
 0x341   :  { %2230 = vmatpush1.bf16.msra.mxu0 %v7144_v58  ;;  %4931 = vmatpush3.bf16.msra.mxu1 %v7147_v13  ;;  %v8721_v58 = vld [vmem:[#allocation82_spill] sm:$0xff] }
 0x342   :  { %2231 = vmatprep.subr.bf16.mxu0 %v7150_v33  ;;  %4932 = vmatprep.subr.bf16.mxu1 %v8680_v6 }
 0x345   :  { %2232 = vmatpush1.bf16.msra.mxu0 %v7154_v34  ;;  %4933 = vmatpush3.bf16.msra.mxu1 %v7157_v54 }
 0x346   :  { %2344 = vmatprep.subr.bf16.mxu0 %v8715_v21  ;;  %4938 = vmatprep.subr.bf16.mxu1 %v8680_v6 }
 0x3d3   :  { %v1949_v60 = vpop.f32.mrb[8].mxu0  ;;  %v1992_v5 = vpop.f32.mrb[68].mxu1 }
 0x3d4   :  { %v5215_v41 = vadd.f32 %v8716_v44, %v1949_v60  ;;  %v1951_v63 = vpop.f32.mrb[9].mxu0  ;;  %v4896_v35 = vpop.f32.mrb[69].mxu1 }
 0x3d5   :  { %v1953_v61 = vpop.f32.mrb[10].mxu0  ;;  %v1995_v39 = vpop.f32.mrb[70].mxu1  ;;  %v5217_v2 = vadd.f32 %v6956_v18, %v1951_v63  ;;  %v1993_v63 = vadd.f32 %v1992_v5, %v6964_v9 }
 0x3d6   :  { %v4540_v24 = vmul.f32 -1.442695, %v5215_v41  ;;  %v5219_v45 = vadd.f32 %v8716_v44, %v1953_v61  ;;  %v1955_v49 = vpop.f32.mrb[11].mxu0  ;;  %v4897_v1 = vpop.f32.mrb[71].mxu1 }
 0x3d7   :  { %v5221_v10 = vadd.f32 %v6956_v18, %v1955_v49  ;;  %v4542_v21 = vmul.f32 -1.442695, %v5217_v2  ;;  %v1996_v49 = vadd.f32 %v1995_v39, %v6964_v9  ;;  %v8717_v2 = vld [vmem:[#allocation52_spill] sm:$0xff]  ;;  %v8720_v9 = vld [vmem:[#allocation77_spill] sm:$0xff] }
 0x3d8   :  { %5570 = vpow2.f32 %v4540_v24  ;;  %v4541_v40 = vmul.f32 -1.442695, %v5219_v45 }
 0x3d9   :  { %v4543_v54 = vmul.f32 -1.442695, %v5221_v10 }
 0x3da   :  { %5572 = vpow2.f32 %v4541_v40 }
 0x3db   :  { %5574 = vpow2.f32 %v4542_v21  ;;  %v8718_v21 = vld [vmem:[#allocation56_spill] sm:$0xff] }
 0x3dc   :  { %5576 = vpow2.f32 %v4543_v54 }
 0x3e2   :  { %v5571_v60 = vpop.eup %5570 }
 0x3e3   :  { %v2007_v35 = vadd.f32 1.0, %v5571_v60 }
 0x3e4   :  { %v5573_v34 = vpop.eup %5572 }
 0x3e5   :  { %5578 = vrcp.f32 %v2007_v35  ;;  %v2008_v41 = vadd.f32 1.0, %v5573_v34  ;;  %v5575_v61 = vpop.eup %5574 }
 0x3e6   :  { %v5577_v44 = vpop.eup %5576  ;;  %v2021_v1 = vadd.f32 1.0, %v5575_v61 }
 0x3e7   :  { %5580 = vrcp.f32 %v2008_v41  ;;  %v2022_v24 = vadd.f32 1.0, %v5577_v44 }
 0x3e8   :  { %5582 = vrcp.f32 %v2021_v1 }
 0x3e9   :  { %5584 = vrcp.f32 %v2022_v24 }
 0x3ef   :  { %v5579_v45 = vpop.eup %5578 }
 0x3f0   :  { %v2027_v33 = vmul.f32 %v5579_v45, %v1993_v63 }
 0x3f1   :  { %v5581_v10 = vpop.eup %5580 }
 0x3f2   :  { %v2029_v54 = vadd.f32 %v2027_v33, %v8717_v2  ;;  %v2028_v40 = vmul.f32 %v5581_v10, %v1996_v49  ;;  %v5583_v60 = vpop.eup %5582  ;;  %v8719_v10 = vld [vmem:[#allocation78_spill] sm:$0xff] }
 0x3f3   :  { %v5585_v5 = vpop.eup %5584  ;;  %v2033_v63 = vsub.f32 1.0, %v5583_v60  ;;  %v2037_v49 = vmul.f32 %v5583_v60, %v7203_v48 }
 0x3f4   :  { %5586 = vtanh.f32 %v2029_v54  ;;  %v2030_v34 = vadd.f32 %v2028_v40, %v8718_v21  ;;  %v2038_v31 = vmul.f32 %v5585_v5, %v7208_v62 }
 0x3f6   :  { %5588 = vtanh.f32 %v2030_v34  ;;  %v2034_v34 = vsub.f32 1.0, %v5585_v5 }
 0x3fb   :  { %v2076_v35 = vpop.f32.mrb[52].mxu0  ;;  %v7370_v41 = vpop.f32.mrb[72].mxu1 }
 0x3fc   :  { %v2077_v44 = vadd.f32 %v2076_v35, %v6974_v23  ;;  %v2078_v61 = vpop.f32.mrb[53].mxu0  ;;  %v4916_v1 = vpop.f32.mrb[73].mxu1 }
 0x3fd   :  { %v2079_v39 = vadd.f32 %v2078_v61, %v6981_v22  ;;  %v2080_v45 = vpop.f32.mrb[54].mxu0  ;;  %v7374_v33 = vpop.f32.mrb[74].mxu1 }
 0x3fe   :  { %v5587_v24 = vpop.eup %5586  ;;  %v2126_v2 = vadd.f32 %v2077_v44, %v8719_v10  ;;  %v2081_v54 = vadd.f32 %v2080_v45, %v6974_v23  ;;  %v2082_v40 = vpop.f32.mrb[55].mxu0 }
 0x3ff   :  { %v4917_v21 = vpop.f32.mrb[75].mxu1  ;;  %v2140_v35 = vadd.f32 %v2079_v39, %v8720_v9  ;;  %v2083_v1 = vadd.f32 %v2082_v40, %v6981_v22  ;;  %v2035_v18 = vmul.f32 %v5587_v24, %v2033_v63  ;;  %v7386_v10 = vpop.permute.xlu0 %2179  ;;  %v2120_v24 = vadd.f32 %v7370_v41, %v7027_v28  ;;  %v8730_v41 = vld [vmem:[#allocation87_spill] sm:$0xff] }
 0x400   :  { %v5589_v13 = vpop.eup %5588  ;;  %v4544_v61 = vmul.f32 -1.442695, %v2126_v2  ;;  %v2127_v17 = vadd.f32 %v2081_v54, %v8721_v58  ;;  %8724 = vst [vmem:[#allocation56_spill] sm:$0xff] %v7386_v10  ;;  %v7388_v21 = vpop.permute.xlu1 %2182  ;;  %vm2184_vm14 = vcmp.eq.s32.totalorder %v7386_v10, 1  ;;  %v8727_v54 = vld [vmem:[#allocation113_spill] sm:$0xff] }
 0x401   :  { %v2141_v60 = vadd.f32 %v2083_v1, %v8722_v20  ;;  %v2036_v53 = vmul.f32 %v5589_v13, %v2034_v34  ;;  %v7384_v44 = vadd.f32 %v2037_v49, %v2035_v18  ;;  %8725 = vst [vmem:[#allocation78_spill] sm:$0xff] %v7388_v21  ;;  %vm2185_vm11 = vcmp.eq.s32.totalorder %v7388_v21, 1  ;;  %v8783_v21 = vld [vmem:[#allocation61_spill] sm:$0xff] }
 0x402   :  { %5590 = vpow2.f32 %v4544_v61  ;;  %v4545_v45 = vmul.f32 -1.442695, %v2127_v17  ;;  %v4546_v58 = vmul.f32 -1.442695, %v2140_v35  ;;  %v2123_v34 = vadd.f32 %v7374_v33, %v7027_v28  ;;  %v8728_v35 = vld [vmem:[#allocation85_spill] sm:$0xff]  ;;  %v8729_v61 = vld [vmem:[#allocation79_spill] sm:$0xff] }
 0x403   :  { %8723 = vst [vmem:[#allocation52_spill] sm:$0xff] %v7384_v44  ;;  %v7390_v9 = vadd.f32 %v2038_v31, %v2036_v53  ;;  %v7398_v18 = vsel %vm2184_vm14, %v7384_v44, %v7203_v48  ;;  %v4547_v31 = vmul.f32 -1.442695, %v2141_v60  ;;  %v8734_v33 = vld [vmem:[#allocation116_spill] sm:$0xff]  ;;  %v8761_v44 = vld [vmem:[#allocation74_spill] sm:$0xff] }
 0x404   :  { %5592 = vpow2.f32 %v4545_v45 }
 0x405   :  { %8726 = vst [vmem:[#allocation77_spill] sm:$0xff] %v7390_v9  ;;  %v7404_v20 = vsel %vm2185_vm11, %v7390_v9, %v7208_v62  ;;  %5594 = vpow2.f32 %v4546_v58  ;;  %v8731_v58 = vld [vmem:[#allocation114_spill] sm:$0xff] }
 0x406   :  { %v2216_v53 = vpack.c.bf16 %v7404_v20, %v7398_v18  ;;  %5596 = vpow2.f32 %v4547_v31 }
 0x408   :  { %2250 = vmatmul.mubr.bf16.vlgmr.msra.gmra.mrb[12].mxu0 %v2216_v53  ;;  %4935 = vmatmul.mubr.bf16.vlgmr.msra.gmra.mrb[76].mxu1 %v2216_v53  ;;  %v8732_v53 = vld [vmem:[#allocation83_spill] sm:$0xff] }
 0x409   :  { %2345 = vmatpush1.bf16.msra.mxu0 %v7212_v57  ;;  %4939 = vmatpush3.bf16.msra.mxu1 %v7215_v43 }
 0x40a   :  { %2346 = vmatprep.subr.bf16.mxu0 %v7218_v59  ;;  %4940 = vmatprep.subr.bf16.mxu1 %v8680_v6 }
 0x40b   :  { %2376 = vmatprep.mubr.bf16.mxu0 %v8681_v11  ;;  %4954 = vmatprep.mubr.msk.bf16.mxu1 %vm6152_vm4, %v8680_v6 }
 0x40c   :  { %v5591_v17 = vpop.eup %5590 }
 0x40d   :  { %v2134_v13 = vadd.f32 1.0, %v5591_v17  ;;  %2347 = vmatpush1.bf16.msra.mxu0 %v7225_v46  ;;  %4941 = vmatpush3.bf16.msra.mxu1 %v7228_v37  ;;  %v8733_v17 = vld [vmem:[#allocation115_spill] sm:$0xff] }
 0x40e   :  { %v5593_v48 = vpop.eup %5592  ;;  %2348 = vmatprep.subr.bf16.mxu0 %v7231_v14  ;;  %4942 = vmatprep.subr.bf16.mxu1 %v8680_v6 }
 0x40f   :  { %5598 = vrcp.f32 %v2134_v13  ;;  %v2135_v62 = vadd.f32 1.0, %v5593_v48  ;;  %v5595_v5 = vpop.eup %5594  ;;  %v8735_v13 = vld [vmem:[#allocation117_spill] sm:$0xff]  ;;  %v8736_v48 = vld [vmem:[#allocation118_spill] sm:$0xff] }
 0x410   :  { %v5597_v63 = vpop.eup %5596  ;;  %v2148_v39 = vadd.f32 1.0, %v5595_v5  ;;  %v8737_v5 = vld [vmem:[#allocation119_spill] sm:$0xff] }
 0x411   :  { %5600 = vrcp.f32 %v2135_v62  ;;  %2349 = vmatpush1.bf16.msra.mxu0 %v7235_v38  ;;  %4943 = vmatpush3.bf16.msra.mxu1 %v7238_v55  ;;  %v2149_v49 = vadd.f32 1.0, %v5597_v63  ;;  %v8738_v63 = vld [vmem:[#allocation120_spill] sm:$0xff] }
 0x412   :  { %2350 = vmatprep.subr.bf16.mxu0 %v7241_v56  ;;  %4944 = vmatprep.subr.bf16.mxu1 %v8680_v6  ;;  %5602 = vrcp.f32 %v2148_v39 }
 0x413   :  { %5604 = vrcp.f32 %v2149_v49 }
 0x415   :  { %2351 = vmatpush1.bf16.msra.mxu0 %v7245_v15  ;;  %4945 = vmatpush3.bf16.msra.mxu1 %v7248_v26 }
 0x416   :  { %2352 = vmatprep.subr.bf16.mxu0 %v7253_v19  ;;  %4946 = vmatprep.subr.bf16.mxu1 %v8680_v6 }
 0x419   :  { %v5599_v2 = vpop.eup %5598  ;;  %2353 = vmatpush1.bf16.msra.mxu0 %v7259_v29  ;;  %4947 = vmatpush3.bf16.msra.mxu1 %v8727_v54 }
 0x41a   :  { %v2154_v40 = vmul.f32 %v5599_v2, %v2120_v24  ;;  %2354 = vmatprep.subr.bf16.mxu0 %v8728_v35  ;;  %4948 = vmatprep.subr.bf16.mxu1 %v8680_v6 }
 0x41b   :  { %v5601_v1 = vpop.eup %5600 }
 0x41c   :  { %v2156_v60 = vadd.f32 %v2154_v40, %v8729_v61  ;;  %v2155_v45 = vmul.f32 %v5601_v1, %v2123_v34  ;;  %v5603_v62 = vpop.eup %5602 }
 0x41d   :  { %2355 = vmatpush1.bf16.msra.mxu0 %v8730_v41  ;;  %4949 = vmatpush3.bf16.msra.mxu1 %v8731_v58  ;;  %v5605_v39 = vpop.eup %5604  ;;  %v2160_v24 = vsub.f32 1.0, %v5603_v62  ;;  %v2164_v34 = vmul.f32 %v5603_v62, %v7318_v32 }
 0x41e   :  { %5606 = vtanh.f32 %v2156_v60  ;;  %v2157_v31 = vadd.f32 %v2155_v45, %v8732_v53  ;;  %2356 = vmatprep.subr.bf16.mxu0 %v8733_v17  ;;  %4950 = vmatprep.subr.bf16.mxu1 %v8680_v6  ;;  %v2161_v2 = vsub.f32 1.0, %v5605_v39  ;;  %v2165_v60 = vmul.f32 %v5605_v39, %v7323_v42  ;;  %v7453_v53 = vpop.permute.xlu0 %2193 }
 0x41f   :  { %8740 = vst [vmem:[#allocation81_spill] sm:$0xff] %v7453_v53  ;;  %vm2198_vm13 = vcmp.eq.s32.totalorder %v7453_v53, 1  ;;  %v8786_v53 = vld [vmem:[#allocation65_spill] sm:$0xff] }
 0x420   :  { %5608 = vtanh.f32 %v2157_v31  ;;  %v7455_v31 = vpop.permute.xlu1 %2196 }
 0x421   :  { %2357 = vmatpush1.bf16.msra.mxu0 %v8734_v33  ;;  %4951 = vmatpush3.bf16.msra.mxu1 %v8735_v13  ;;  %8741 = vst [vmem:[#allocation113_spill] sm:$0xff] %v7455_v31  ;;  %vm2199_vm15 = vcmp.eq.s32.totalorder %v7455_v31, 1 }
 0x422   :  { %2358 = vmatprep.subr.bf16.mxu0 %v8736_v48  ;;  %4952 = vmatprep.subr.bf16.mxu1 %v8680_v6 }
 0x425   :  { %2359 = vmatpush1.bf16.msra.mxu0 %v8737_v5  ;;  %4953 = vmatpush3.bf16.msra.mxu1 %v8738_v63 }
 0x426   :  { %2517 = vmatprep.subr.bf16.mxu0 %v7059_v16  ;;  %4958 = vmatprep.subr.bf16.mxu1 %v8680_v6 }
 0x428   :  { %v5607_v49 = vpop.eup %5606 }
 0x429   :  { %v2162_v40 = vmul.f32 %v5607_v49, %v2160_v24 }
 0x42a   :  { %v5609_v1 = vpop.eup %5608 }
 0x42b   :  { %v2163_v61 = vmul.f32 %v5609_v1, %v2161_v2  ;;  %v7451_v45 = vadd.f32 %v2164_v34, %v2162_v40 }
 0x42d   :  { %8739 = vst [vmem:[#allocation82_spill] sm:$0xff] %v7451_v45  ;;  %v7457_v9 = vadd.f32 %v2165_v60, %v2163_v61  ;;  %v7465_v16 = vsel %vm2198_vm13, %v7451_v45, %v7318_v32  ;;  %v8754_v61 = vld [vmem:[#allocation91_spill] sm:$0xff] }
 0x42f   :  { %8742 = vst [vmem:[#allocation85_spill] sm:$0xff] %v7457_v9  ;;  %v7471_v62 = vsel %vm2199_vm15, %v7457_v9, %v7323_v42 }
 0x430   :  { %v2343_v39 = vpack.c.bf16 %v7471_v62, %v7465_v16 }
 0x432   :  { %2377 = vmatmul.mubr.bf16.vlgmr.msra.gmra.mrb[56].mxu0 %v2343_v39  ;;  %4955 = vmatmul.mubr.bf16.vlgmr.msra.gmra.mrb[80].mxu1 %v2343_v39 }
 0x433   :  { %2518 = vmatpush1.bf16.msra.mxu0 %v7081_v25  ;;  %4959 = vmatpush3.bf16.msra.mxu1 %v7084_v12  ;;  %v8743_v25 = vld [vmem:[#allocation99_spill] sm:$0xff]  ;;  %v8744_v12 = vld [vmem:[#allocation100_spill] sm:$0xff] }
 0x434   :  { %2519 = vmatprep.subr.bf16.mxu0 %v7087_v47  ;;  %4960 = vmatprep.subr.bf16.mxu1 %v8680_v6  ;;  %v8745_v47 = vld [vmem:[#allocation101_spill] sm:$0xff] }
 0x435   :  { %2549 = vmatprep.mubr.bf16.mxu0 %v8681_v11  ;;  %4974 = vmatprep.mubr.msk.bf16.mxu1 %vm6152_vm4, %v8680_v6 }
 0x437   :  { %2520 = vmatpush1.bf16.msra.mxu0 %v7094_v8  ;;  %4961 = vmatpush3.bf16.msra.mxu1 %v7097_v36  ;;  %v8746_v8 = vld [vmem:[#allocation102_spill] sm:$0xff]  ;;  %v8747_v36 = vld [vmem:[#allocation103_spill] sm:$0xff] }
 0x438   :  { %2521 = vmatprep.subr.bf16.mxu0 %v7100_v3  ;;  %4962 = vmatprep.subr.bf16.mxu1 %v8680_v6  ;;  %v8748_v3 = vld [vmem:[#allocation104_spill] sm:$0xff] }
 0x43b   :  { %2522 = vmatpush1.bf16.msra.mxu0 %v7104_v0  ;;  %4963 = vmatpush3.bf16.msra.mxu1 %v7107_v52  ;;  %v8749_v0 = vld [vmem:[#allocation105_spill] sm:$0xff]  ;;  %v8750_v52 = vld [vmem:[#allocation106_spill] sm:$0xff] }
 0x43c   :  { %2523 = vmatprep.subr.bf16.mxu0 %v7110_v51  ;;  %4964 = vmatprep.subr.bf16.mxu1 %v8680_v6  ;;  %v8751_v51 = vld [vmem:[#allocation107_spill] sm:$0xff] }
 0x43f   :  { %2524 = vmatpush1.bf16.msra.mxu0 %v7114_v4  ;;  %4965 = vmatpush3.bf16.msra.mxu1 %v7117_v7  ;;  %v8752_v4 = vld [vmem:[#allocation108_spill] sm:$0xff] }
 0x440   :  { %2525 = vmatprep.subr.bf16.mxu0 %v7120_v27  ;;  %4966 = vmatprep.subr.bf16.mxu1 %v8680_v6 }
 0x443   :  { %2526 = vmatpush1.bf16.msra.mxu0 %v7124_v50  ;;  %4967 = vmatpush3.bf16.msra.mxu1 %v7127_v30  ;;  %v8753_v50 = vld [vmem:[#allocation90_spill] sm:$0xff] }
 0x444   :  { %2527 = vmatprep.subr.bf16.mxu0 %v8743_v25  ;;  %4968 = vmatprep.subr.bf16.mxu1 %v8680_v6 }
 0x447   :  { %2528 = vmatpush1.bf16.msra.mxu0 %v8744_v12  ;;  %4969 = vmatpush3.bf16.msra.mxu1 %v8745_v47 }
 0x448   :  { %2529 = vmatprep.subr.bf16.mxu0 %v8746_v8  ;;  %4970 = vmatprep.subr.bf16.mxu1 %v8680_v6 }
 0x44b   :  { %2530 = vmatpush1.bf16.msra.mxu0 %v8747_v36  ;;  %4971 = vmatpush3.bf16.msra.mxu1 %v8748_v3 }
 0x44c   :  { %2531 = vmatprep.subr.bf16.mxu0 %v8749_v0  ;;  %4972 = vmatprep.subr.bf16.mxu1 %v8680_v6 }
 0x44f   :  { %2532 = vmatpush1.bf16.msra.mxu0 %v8750_v52  ;;  %4973 = vmatpush3.bf16.msra.mxu1 %v8751_v51 }
 0x450   :  { %2644 = vmatprep.subr.bf16.mxu0 %v8752_v4  ;;  %4978 = vmatprep.subr.bf16.mxu1 %v8680_v6 }
 0x4db   :  { %v2251_v7 = vpop.f32.mrb[12].mxu0  ;;  %v2294_v27 = vpop.f32.mrb[76].mxu1 }
 0x4dc   :  { %v5223_v30 = vadd.f32 %v8753_v50, %v2251_v7  ;;  %v2253_v32 = vpop.f32.mrb[13].mxu0  ;;  %v4936_v42 = vpop.f32.mrb[77].mxu1  ;;  %v8755_v7 = vld [vmem:[#allocation92_spill] sm:$0xff] }
 0x4dd   :  { %v2255_v24 = vpop.f32.mrb[14].mxu0  ;;  %v2297_v49 = vpop.f32.mrb[78].mxu1  ;;  %v5225_v60 = vadd.f32 %v8754_v61, %v2253_v32 }
 0x4de   :  { %v4548_v2 = vmul.f32 -1.442695, %v5223_v30  ;;  %v5227_v40 = vadd.f32 %v8753_v50, %v2255_v24  ;;  %v2257_v34 = vpop.f32.mrb[15].mxu0  ;;  %v4937_v1 = vpop.f32.mrb[79].mxu1  ;;  %v2295_v50 = vadd.f32 %v2294_v27, %v8755_v7  ;;  %v2298_v24 = vadd.f32 %v2297_v49, %v8755_v7 }
 0x4df   :  { %v5229_v25 = vadd.f32 %v8754_v61, %v2257_v34  ;;  %v4550_v12 = vmul.f32 -1.442695, %v5225_v60  ;;  %v8757_v61 = vld [vmem:[#allocation64_spill] sm:$0xff] }
 0x4e0   :  { %5610 = vpow2.f32 %v4548_v2  ;;  %v4549_v39 = vmul.f32 -1.442695, %v5227_v40  ;;  %v8756_v40 = vld [vmem:[#allocation60_spill] sm:$0xff] }
 0x4e1   :  { %v4551_v47 = vmul.f32 -1.442695, %v5229_v25 }
 0x4e2   :  { %5612 = vpow2.f32 %v4549_v39 }
 0x4e3   :  { %5614 = vpow2.f32 %v4550_v12 }
 0x4e4   :  { %5616 = vpow2.f32 %v4551_v47 }
 0x4ea   :  { %v5611_v8 = vpop.eup %5610 }
 0x4eb   :  { %v2309_v36 = vadd.f32 1.0, %v5611_v8 }
 0x4ec   :  { %v5613_v3 = vpop.eup %5612 }
 0x4ed   :  { %5618 = vrcp.f32 %v2309_v36  ;;  %v2310_v0 = vadd.f32 1.0, %v5613_v3  ;;  %v5615_v52 = vpop.eup %5614 }
 0x4ee   :  { %v5617_v51 = vpop.eup %5616  ;;  %v2323_v4 = vadd.f32 1.0, %v5615_v52 }
 0x4ef   :  { %5620 = vrcp.f32 %v2310_v0  ;;  %v2324_v30 = vadd.f32 1.0, %v5617_v51 }
 0x4f0   :  { %5622 = vrcp.f32 %v2323_v4 }
 0x4f1   :  { %5624 = vrcp.f32 %v2324_v30 }
 0x4f7   :  { %v5619_v32 = vpop.eup %5618 }
 0x4f8   :  { %v2329_v42 = vmul.f32 %v5619_v32, %v2295_v50 }
 0x4f9   :  { %v5621_v2 = vpop.eup %5620 }
 0x4fa   :  { %v2331_v34 = vadd.f32 %v2329_v42, %v8756_v40  ;;  %v2330_v1 = vmul.f32 %v5621_v2, %v2298_v24  ;;  %v5623_v39 = vpop.eup %5622  ;;  %v8758_v24 = vld [vmem:[#allocation70_spill] sm:$0xff] }
 0x4fb   :  { %v5625_v25 = vpop.eup %5624  ;;  %v2335_v12 = vsub.f32 1.0, %v5623_v39  ;;  %v2339_v0 = vmul.f32 %v5623_v39, %v7398_v18 }
 0x4fc   :  { %5626 = vtanh.f32 %v2331_v34  ;;  %v2332_v60 = vadd.f32 %v2330_v1, %v8757_v61  ;;  %v2336_v52 = vsub.f32 1.0, %v5625_v25  ;;  %v2340_v42 = vmul.f32 %v5625_v25, %v7404_v20  ;;  %v8759_v61 = vld [vmem:[#allocation69_spill] sm:$0xff] }
 0x4fd   :  { %v8762_v25 = vld [vmem:[#allocation73_spill] sm:$0xff] }
 0x4fe   :  { %5628 = vtanh.f32 %v2332_v60 }
 0x505   :  { %v2378_v47 = vpop.f32.mrb[56].mxu0  ;;  %v7518_v27 = vpop.f32.mrb[80].mxu1 }
 0x506   :  { %v5627_v8 = vpop.eup %5626  ;;  %v2379_v36 = vadd.f32 %v2378_v47, %v6974_v23  ;;  %v2380_v3 = vpop.f32.mrb[57].mxu0 }
 0x507   :  { %v4956_v49 = vpop.f32.mrb[81].mxu1  ;;  %v2381_v51 = vadd.f32 %v2380_v3, %v6981_v22  ;;  %v2382_v4 = vpop.f32.mrb[58].mxu0  ;;  %v2337_v30 = vmul.f32 %v5627_v8, %v2335_v12 }
 0x508   :  { %v7523_v50 = vpop.f32.mrb[82].mxu1  ;;  %v5629_v32 = vpop.eup %5628  ;;  %v2428_v2 = vadd.f32 %v2379_v36, %v8758_v24  ;;  %v2383_v40 = vadd.f32 %v2382_v4, %v6974_v23 }
 0x509   :  { %v2384_v34 = vpop.f32.mrb[59].mxu0  ;;  %v4957_v1 = vpop.f32.mrb[83].mxu1  ;;  %v2442_v60 = vadd.f32 %v2381_v51, %v8759_v61  ;;  %v2338_v47 = vmul.f32 %v5629_v32, %v2336_v52  ;;  %v7530_v49 = vadd.f32 %v2339_v0, %v2337_v30 }
 0x50a   :  { %v2385_v39 = vadd.f32 %v2384_v34, %v6981_v22  ;;  %v4552_v3 = vmul.f32 -1.442695, %v2428_v2  ;;  %v2429_v9 = vadd.f32 %v2383_v40, %v8761_v44  ;;  %v7533_v12 = vpop.permute.xlu0 %2481  ;;  %v7535_v8 = vpop.permute.xlu1 %2484 }
 0x50b   :  { %8760 = vst [vmem:[#allocation79_spill] sm:$0xff] %v7530_v49  ;;  %v7538_v24 = vadd.f32 %v2340_v42, %v2338_v47  ;;  %vm2486_vm8 = vcmp.eq.s32.totalorder %v7533_v12, 1  ;;  %vm2487_vm1 = vcmp.eq.s32.totalorder %v7535_v8, 1  ;;  %v4554_v4 = vmul.f32 -1.442695, %v2442_v60 }
 0x50c   :  { %v2443_v36 = vadd.f32 %v2385_v39, %v8762_v25  ;;  %5630 = vpow2.f32 %v4552_v3  ;;  %v4553_v51 = vmul.f32 -1.442695, %v2429_v9  ;;  %v7546_v0 = vsel %vm2486_vm8, %v7530_v49, %v7398_v18  ;;  %v7625_v39 = vld [vmem:[#allocation10] ss:$12 sps:$4 sm:$0xff]   ;;  %v7628_v47 = vld [vmem:[#allocation10 + $0x8] ss:$12 sps:$4 sm:$0xff]  }
 0x50d   :  { %8763 = vst [vmem:[#allocation87_spill] sm:$0xff] %v7538_v24  ;;  %v7552_v44 = vsel %vm2487_vm1, %v7538_v24, %v7404_v20  ;;  %v7641_v3 = vld [vmem:[#allocation10 + $0x20] ss:$12 sps:$4 sm:$0xff]  }
 0x50e   :  { %5632 = vpow2.f32 %v4553_v51  ;;  %v2516_v52 = vpack.c.bf16 %v7552_v44, %v7546_v0  ;;  %v4555_v9 = vmul.f32 -1.442695, %v2443_v36  ;;  %v7600_v42 = vpop.permute.xlu0 %2495  ;;  %v7644_v25 = vld [vmem:[#allocation10 + $0x34] ss:$12 sps:$4 sm:$0xff]   ;;  %v7648_v36 = vld [vmem:[#allocation10 + $0x30] ss:$12 sps:$4 sm:$0xff]  }
 0x50f   :  { %5634 = vpow2.f32 %v4554_v4  ;;  %vm2500_vm6 = vcmp.eq.s32.totalorder %v7600_v42, 1  ;;  %v7651_v51 = vld [vmem:[#allocation10 + $0x38] ss:$12 sps:$4 sm:$0xff]   ;;  %v7658_v4 = vld [vmem:[#allocation10 + $0x48] ss:$12 sps:$4 sm:$0xff]  }
 0x510   :  { %2550 = vmatmul.mubr.bf16.vlgmr.msra.gmra.mrb[60].mxu0 %v2516_v52  ;;  %4975 = vmatmul.mubr.bf16.vlgmr.msra.gmra.mrb[84].mxu1 %v2516_v52  ;;  %5636 = vpow2.f32 %v4555_v9  ;;  %v7654_v52 = vld [vmem:[#allocation10 + $0x4c] ss:$12 sps:$4 sm:$0xff]   ;;  %v7661_v9 = vld [vmem:[#allocation10 + $0x50] ss:$12 sps:$4 sm:$0xff]  }
 0x511   :  { %2645 = vmatpush1.bf16.msra.mxu0 %v7212_v57  ;;  %4979 = vmatpush3.bf16.msra.mxu1 %v7215_v43  ;;  %v7754_v42 = vld [vmem:[#allocation11 + $0x1c] ss:$12 sps:$4 sm:$0xff]  }
 0x512   :  { %2646 = vmatprep.subr.bf16.mxu0 %v7218_v59  ;;  %4980 = vmatprep.subr.bf16.mxu1 %v8680_v6 }
 0x513   :  { %2676 = vmatprep.mubr.bf16.mxu0 %v8681_v11  ;;  %4994 = vmatprep.mubr.msk.bf16.mxu1 %vm6152_vm4, %v8680_v6 }
 0x515   :  { %2647 = vmatpush1.bf16.msra.mxu0 %v7225_v46  ;;  %4981 = vmatpush3.bf16.msra.mxu1 %v7228_v37 }
 0x516   :  { %v5631_v18 = vpop.eup %5630  ;;  %2648 = vmatprep.subr.bf16.mxu0 %v7231_v14  ;;  %4982 = vmatprep.subr.bf16.mxu1 %v8680_v6 }
 0x517   :  { %v2436_v57 = vadd.f32 1.0, %v5631_v18  ;;  %v7664_v18 = vld [vmem:[#allocation10 + $0x64] ss:$12 sps:$4 sm:$0xff]  }
 0x518   :  { %v5633_v43 = vpop.eup %5632 }
 0x519   :  { %5638 = vrcp.f32 %v2436_v57  ;;  %v2437_v59 = vadd.f32 1.0, %v5633_v43  ;;  %2649 = vmatpush1.bf16.msra.mxu0 %v7235_v38  ;;  %4983 = vmatpush3.bf16.msra.mxu1 %v7238_v55  ;;  %v5635_v46 = vpop.eup %5634  ;;  %v2422_v38 = vadd.f32 %v7518_v27, %v7027_v28  ;;  %v7668_v57 = vld [vmem:[#allocation10 + $0x60] ss:$12 sps:$4 sm:$0xff]   ;;  %v7671_v43 = vld [vmem:[#allocation10 + $0x68] ss:$12 sps:$4 sm:$0xff]  }
 0x51a   :  { %2650 = vmatprep.subr.bf16.mxu0 %v7241_v56  ;;  %4984 = vmatprep.subr.bf16.mxu1 %v8680_v6  ;;  %v5637_v37 = vpop.eup %5636  ;;  %v2450_v14 = vadd.f32 1.0, %v5635_v46  ;;  %v7678_v46 = vld [vmem:[#allocation10 + $0x78] ss:$12 sps:$4 sm:$0xff]  }
 0x51b   :  { %5640 = vrcp.f32 %v2437_v59  ;;  %v2451_v55 = vadd.f32 1.0, %v5637_v37  ;;  %v7674_v59 = vld [vmem:[#allocation10 + $0x7c] ss:$12 sps:$4 sm:$0xff]   ;;  %v7681_v37 = vld [vmem:[#allocation10 + $0x80] ss:$12 sps:$4 sm:$0xff]  }
 0x51c   :  { %5642 = vrcp.f32 %v2450_v14  ;;  %v7684_v14 = vld [vmem:[#allocation10 + $0x94] ss:$12 sps:$4 sm:$0xff]  }
 0x51d   :  { %2651 = vmatpush1.bf16.msra.mxu0 %v7245_v15  ;;  %4985 = vmatpush3.bf16.msra.mxu1 %v7248_v26  ;;  %v2425_v26 = vadd.f32 %v7523_v50, %v7027_v28  ;;  %5644 = vrcp.f32 %v2451_v55  ;;  %v7691_v55 = vld [vmem:[#allocation10 + $0x98] ss:$12 sps:$4 sm:$0xff]  }
 0x51e   :  { %2652 = vmatprep.subr.bf16.mxu0 %v7253_v19  ;;  %4986 = vmatprep.subr.bf16.mxu1 %v8680_v6  ;;  %8770 = vst [vmem:[#allocation117_spill] sm:$0xff] %v7691_v55 }
 0x521   :  { %2653 = vmatpush1.bf16.msra.mxu0 %v7259_v29  ;;  %4987 = vmatpush3.bf16.msra.mxu1 %v8727_v54  ;;  %v8764_v29 = vld [vmem:[#allocation71_spill] sm:$0xff] }
 0x522   :  { %2654 = vmatprep.subr.bf16.mxu0 %v8728_v35  ;;  %4988 = vmatprep.subr.bf16.mxu1 %v8680_v6  ;;  %v8765_v35 = vld [vmem:[#allocation75_spill] sm:$0xff] }
 0x523   :  { %v5639_v56 = vpop.eup %5638 }
 0x524   :  { %v2456_v15 = vmul.f32 %v5639_v56, %v2422_v38  ;;  %v7688_v38 = vld [vmem:[#allocation10 + $0x90] ss:$12 sps:$4 sm:$0xff]   ;;  %v7694_v56 = vld [vmem:[#allocation10 + $0xac] ss:$12 sps:$4 sm:$0xff]  }
 0x525   :  { %v5641_v19 = vpop.eup %5640  ;;  %2655 = vmatpush1.bf16.msra.mxu0 %v8730_v41  ;;  %4989 = vmatpush3.bf16.msra.mxu1 %v8731_v58  ;;  %v7595_v58 = vld [vmem:[#allocation10 + $0x4] ss:$12 sps:$4 sm:$0xff]   ;;  %8769 = vst [vmem:[#allocation116_spill] sm:$0xff] %v7688_v38  ;;  %8771 = vst [vmem:[#allocation118_spill] sm:$0xff] %v7694_v56 }
 0x526   :  { %v2458_v20 = vadd.f32 %v2456_v15, %v8764_v29  ;;  %v2457_v54 = vmul.f32 %v5641_v19, %v2425_v26  ;;  %2656 = vmatprep.subr.bf16.mxu0 %v8733_v17  ;;  %4990 = vmatprep.subr.bf16.mxu1 %v8680_v6  ;;  %v5643_v41 = vpop.eup %5642  ;;  %8766 = vst [vmem:[#allocation114_spill] sm:$0xff] %v7595_v58  ;;  %v7698_v15 = vld [vmem:[#allocation10 + $0xa8] ss:$12 sps:$4 sm:$0xff]   ;;  %v7701_v26 = vld [vmem:[#allocation10 + $0xb0] ss:$12 sps:$4 sm:$0xff]  }
 0x527   :  { %v5645_v17 = vpop.eup %5644  ;;  %8772 = vst [vmem:[#allocation119_spill] sm:$0xff] %v7698_v15  ;;  %8773 = vst [vmem:[#allocation120_spill] sm:$0xff] %v7701_v26  ;;  %v7704_v19 = vld [vmem:[#allocation11 + $0x4] ss:$12 sps:$4 sm:$0xff]  }
 0x528   :  { %5646 = vtanh.f32 %v2458_v20  ;;  %v2459_v27 = vadd.f32 %v2457_v54, %v8765_v35  ;;  %v2467_v2 = vmul.f32 %v5645_v17, %v7471_v62  ;;  %8774 = vst [vmem:[#allocation99_spill] sm:$0xff] %v7704_v19  ;;  %v8775_v54 = vld [vmem:[#allocation24_spill] sm:$0xff] }
 0x529   :  { %2657 = vmatpush1.bf16.msra.mxu0 %v8734_v33  ;;  %4991 = vmatpush3.bf16.msra.mxu1 %v8735_v13  ;;  %v2462_v33 = vsub.f32 1.0, %v5643_v41  ;;  %v2463_v13 = vsub.f32 1.0, %v5645_v17  ;;  %v8776_v17 = vld [vmem:[#allocation25_spill] sm:$0xff] }
 0x52a   :  { %5648 = vtanh.f32 %v2459_v27  ;;  %2658 = vmatprep.subr.bf16.mxu0 %v8736_v48  ;;  %4992 = vmatprep.subr.bf16.mxu1 %v8680_v6  ;;  %v2466_v48 = vmul.f32 %v5643_v41, %v7465_v16 }
 0x52d   :  { %2659 = vmatpush1.bf16.msra.mxu0 %v8737_v5  ;;  %4993 = vmatpush3.bf16.msra.mxu1 %v8738_v63  ;;  %v7602_v5 = vpop.permute.xlu1 %2498 }
 0x52e   :  { %2793 = vmatprep.subr.bf16.mxu0 %v7595_v58  ;;  %4998 = vmatprep.subr.bf16.mxu1 %v8680_v6  ;;  %vm2501_vm0 = vcmp.eq.s32.totalorder %v7602_v5, 1  ;;  %v7764_v5 = vld [vmem:[#allocation11 + $0x20] ss:$12 sps:$4 sm:$0xff]  }
 0x532   :  { %v5647_v50 = vpop.eup %5646 }
 0x533   :  { %v2464_v30 = vmul.f32 %v5647_v50, %v2462_v33 }
 0x534   :  { %v5649_v32 = vpop.eup %5648 }
 0x535   :  { %v2465_v63 = vmul.f32 %v5649_v32, %v2463_v13  ;;  %v7605_v40 = vadd.f32 %v2466_v48, %v2464_v30  ;;  %v8777_v48 = vld [vmem:[#allocation26_spill] sm:$0xff] }
 0x537   :  { %8767 = vst [vmem:[#allocation83_spill] sm:$0xff] %v7605_v40  ;;  %v7607_v34 = vadd.f32 %v2467_v2, %v2465_v63  ;;  %v7615_v1 = vsel %vm2500_vm6, %v7605_v40, %v7465_v16  ;;  %v7631_v16 = vld [vmem:[#allocation10 + $0x1c] ss:$12 sps:$4 sm:$0xff]  }
 0x539   :  { %8768 = vst [vmem:[#allocation115_spill] sm:$0xff] %v7607_v34  ;;  %v7621_v61 = vsel %vm2501_vm0, %v7607_v34, %v7471_v62  ;;  %v7638_v62 = vld [vmem:[#allocation10 + $0x18] ss:$12 sps:$4 sm:$0xff]  }
 0x53a   :  { %v2643_v60 = vpack.c.bf16 %v7621_v61, %v7615_v1 }
 0x53c   :  { %2677 = vmatmul.mubr.bf16.vlgmr.msra.gmra.mrb[64].mxu0 %v2643_v60  ;;  %4995 = vmatmul.mubr.bf16.vlgmr.msra.gmra.mrb[88].mxu1 %v2643_v60  ;;  %v8778_v60 = vld [vmem:[#allocation27_spill] sm:$0xff] }
 0x53d   :  { %2794 = vmatpush1.bf16.msra.mxu0 %v7625_v39  ;;  %4999 = vmatpush3.bf16.msra.mxu1 %v7628_v47 }
 0x53e   :  { %2795 = vmatprep.subr.bf16.mxu0 %v7631_v16  ;;  %5000 = vmatprep.subr.bf16.mxu1 %v8680_v6 }
 0x53f   :  { %2825 = vmatprep.mubr.bf16.mxu0 %v8681_v11  ;;  %5014 = vmatprep.mubr.msk.bf16.mxu1 %vm6152_vm4, %v8680_v6 }
 0x541   :  { %2796 = vmatpush1.bf16.msra.mxu0 %v7638_v62  ;;  %5001 = vmatpush3.bf16.msra.mxu1 %v7641_v3 }
 0x542   :  { %2797 = vmatprep.subr.bf16.mxu0 %v7644_v25  ;;  %5002 = vmatprep.subr.bf16.mxu1 %v8680_v6 }
 0x545   :  { %2798 = vmatpush1.bf16.msra.mxu0 %v7648_v36  ;;  %5003 = vmatpush3.bf16.msra.mxu1 %v7651_v51 }
 0x546   :  { %2799 = vmatprep.subr.bf16.mxu0 %v7654_v52  ;;  %5004 = vmatprep.subr.bf16.mxu1 %v8680_v6 }
 0x549   :  { %2800 = vmatpush1.bf16.msra.mxu0 %v7658_v4  ;;  %5005 = vmatpush3.bf16.msra.mxu1 %v7661_v9 }
 0x54a   :  { %2801 = vmatprep.subr.bf16.mxu0 %v7664_v18  ;;  %5006 = vmatprep.subr.bf16.mxu1 %v8680_v6 }
 0x54d   :  { %2802 = vmatpush1.bf16.msra.mxu0 %v7668_v57  ;;  %5007 = vmatpush3.bf16.msra.mxu1 %v7671_v43 }
 0x54e   :  { %2803 = vmatprep.subr.bf16.mxu0 %v7674_v59  ;;  %5008 = vmatprep.subr.bf16.mxu1 %v8680_v6 }
 0x551   :  { %2804 = vmatpush1.bf16.msra.mxu0 %v7678_v46  ;;  %5009 = vmatpush3.bf16.msra.mxu1 %v7681_v37 }
 0x552   :  { %2805 = vmatprep.subr.bf16.mxu0 %v7684_v14  ;;  %5010 = vmatprep.subr.bf16.mxu1 %v8680_v6 }
 0x555   :  { %2806 = vmatpush1.bf16.msra.mxu0 %v7688_v38  ;;  %5011 = vmatpush3.bf16.msra.mxu1 %v7691_v55 }
 0x556   :  { %2807 = vmatprep.subr.bf16.mxu0 %v7694_v56  ;;  %5012 = vmatprep.subr.bf16.mxu1 %v8680_v6 }
 0x559   :  { %2808 = vmatpush1.bf16.msra.mxu0 %v7698_v15  ;;  %5013 = vmatpush3.bf16.msra.mxu1 %v7701_v26 }
 0x55a   :  { %2920 = vmatprep.subr.bf16.mxu0 %v7704_v19  ;;  %5018 = vmatprep.subr.bf16.mxu1 %v8680_v6 }
 0x5e3   :  { %v2551_v29 = vpop.f32.mrb[60].mxu0  ;;  %v2594_v20 = vpop.f32.mrb[84].mxu1 }
 0x5e4   :  { %v5232_v35 = vadd.f32 %v8775_v54, %v2551_v29  ;;  %v2553_v27 = vpop.f32.mrb[61].mxu0  ;;  %v4976_v41 = vpop.f32.mrb[85].mxu1 }
 0x5e5   :  { %v5235_v33 = vadd.f32 %v8776_v17, %v2553_v27  ;;  %v2555_v50 = vpop.f32.mrb[62].mxu0  ;;  %v2597_v13 = vpop.f32.mrb[86].mxu1 }
 0x5e6   :  { %v4556_v30 = vmul.f32 -1.442695, %v5232_v35  ;;  %v5238_v32 = vadd.f32 %v8777_v48, %v2555_v50  ;;  %v2557_v63 = vpop.f32.mrb[63].mxu0  ;;  %v4977_v2 = vpop.f32.mrb[87].mxu1  ;;  %v2595_v48 = vadd.f32 %v2594_v20, %v8755_v7 }
 0x5e7   :  { %v5241_v24 = vadd.f32 %v8778_v60, %v2557_v63  ;;  %v4558_v45 = vmul.f32 -1.442695, %v5235_v33 }
 0x5e8   :  { %5650 = vpow2.f32 %v4556_v30  ;;  %v4557_v49 = vmul.f32 -1.442695, %v5238_v32  ;;  %v8780_v32 = vld [vmem:[#allocation72_spill] sm:$0xff] }
 0x5e9   :  { %v4559_v34 = vmul.f32 -1.442695, %v5241_v24 }
 0x5ea   :  { %5652 = vpow2.f32 %v4557_v49  ;;  %v2598_v49 = vadd.f32 %v2597_v13, %v8755_v7 }
 0x5eb   :  { %5654 = vpow2.f32 %v4558_v45  ;;  %v8779_v45 = vld [vmem:[#allocation68_spill] sm:$0xff] }
 0x5ec   :  { %5656 = vpow2.f32 %v4559_v34 }
 0x5f2   :  { %v5651_v29 = vpop.eup %5650 }
 0x5f3   :  { %v2609_v54 = vadd.f32 1.0, %v5651_v29 }
 0x5f4   :  { %v5653_v41 = vpop.eup %5652 }
 0x5f5   :  { %5658 = vrcp.f32 %v2609_v54  ;;  %v2610_v27 = vadd.f32 1.0, %v5653_v41  ;;  %v5655_v35 = vpop.eup %5654 }
 0x5f6   :  { %v5657_v17 = vpop.eup %5656  ;;  %v2623_v50 = vadd.f32 1.0, %v5655_v35 }
 0x5f7   :  { %5660 = vrcp.f32 %v2610_v27  ;;  %v2624_v2 = vadd.f32 1.0, %v5657_v17 }
 0x5f8   :  { %5662 = vrcp.f32 %v2623_v50 }
 0x5f9   :  { %5664 = vrcp.f32 %v2624_v2 }
 0x5ff   :  { %v5659_v63 = vpop.eup %5658 }
 0x600   :  { %v2629_v30 = vmul.f32 %v5659_v63, %v2595_v48 }
 0x601   :  { %v5661_v24 = vpop.eup %5660 }
 0x602   :  { %v2631_v34 = vadd.f32 %v2629_v30, %v8779_v45  ;;  %v2630_v33 = vmul.f32 %v5661_v24, %v2598_v49  ;;  %v5663_v29 = vpop.eup %5662 }
 0x603   :  { %v5665_v54 = vpop.eup %5664  ;;  %v2635_v41 = vsub.f32 1.0, %v5663_v29  ;;  %v2639_v20 = vmul.f32 %v5663_v29, %v7546_v0 }
 0x604   :  { %5666 = vtanh.f32 %v2631_v34  ;;  %v2632_v60 = vadd.f32 %v2630_v33, %v8780_v32  ;;  %v2636_v35 = vsub.f32 1.0, %v5665_v54  ;;  %v2640_v49 = vmul.f32 %v5665_v54, %v7552_v44 }
 0x606   :  { %5668 = vtanh.f32 %v2632_v60  ;;  %v8782_v60 = vld [vmem:[#allocation62_spill] sm:$0xff] }
 0x60e   :  { %v5667_v27 = vpop.eup %5666 }
 0x60f   :  { %v2678_v17 = vpop.f32.mrb[64].mxu0  ;;  %v7717_v50 = vpop.f32.mrb[88].mxu1  ;;  %v2637_v13 = vmul.f32 %v5667_v27, %v2635_v41 }
 0x610   :  { %v5669_v48 = vpop.eup %5668  ;;  %v2679_v63 = vadd.f32 %v2678_v17, %v6974_v23  ;;  %v2680_v30 = vpop.f32.mrb[65].mxu0 }
 0x611   :  { %v4996_v2 = vpop.f32.mrb[89].mxu1  ;;  %v2681_v24 = vadd.f32 %v2680_v30, %v6981_v22  ;;  %v2682_v45 = vpop.f32.mrb[66].mxu0  ;;  %v2638_v33 = vmul.f32 %v5669_v48, %v2636_v35  ;;  %v7724_v32 = vadd.f32 %v2639_v20, %v2637_v13  ;;  %v8785_v30 = vld [vmem:[#allocation66_spill] sm:$0xff] }
 0x612   :  { %v7722_v34 = vpop.f32.mrb[90].mxu1  ;;  %v2728_v29 = vadd.f32 %v2679_v63, %v8782_v60  ;;  %v2683_v40 = vadd.f32 %v2682_v45, %v6974_v23  ;;  %v2684_v41 = vpop.f32.mrb[67].mxu0  ;;  %v7767_v48 = vld [vmem:[#allocation11 + $0x34] ss:$12 sps:$4 sm:$0xff]  }
 0x613   :  { %8781 = vst [vmem:[#allocation100_spill] sm:$0xff] %v7724_v32  ;;  %v4997_v27 = vpop.f32.mrb[91].mxu1  ;;  %v2742_v17 = vadd.f32 %v2681_v24, %v8783_v21  ;;  %v2685_v2 = vadd.f32 %v2684_v41, %v6981_v22  ;;  %v7730_v10 = vadd.f32 %v2640_v49, %v2638_v33  ;;  %v7738_v20 = vsel %vm2500_vm6, %v7724_v32, %v7546_v0  ;;  %v7751_v0 = vld [vmem:[#allocation11 + $0x8] ss:$12 sps:$4 sm:$0xff]   ;;  %v7771_v49 = vld [vmem:[#allocation11 + $0x30] ss:$12 sps:$4 sm:$0xff]  }
 0x614   :  { %v4560_v54 = vmul.f32 -1.442695, %v2728_v29  ;;  %v2729_v31 = vadd.f32 %v2683_v40, %v8785_v30  ;;  %v7748_v40 = vld [vmem:[#allocation11] ss:$12 sps:$4 sm:$0xff]   ;;  %v7774_v24 = vld [vmem:[#allocation11 + $0x38] ss:$12 sps:$4 sm:$0xff]  }
 0x615   :  { %8784 = vst [vmem:[#allocation101_spill] sm:$0xff] %v7730_v10  ;;  %v2743_v7 = vadd.f32 %v2685_v2, %v8786_v53  ;;  %v7744_v21 = vsel %vm2501_vm0, %v7730_v10, %v7552_v44  ;;  %v4562_v53 = vmul.f32 -1.442695, %v2742_v17  ;;  %v7761_v44 = vld [vmem:[#allocation11 + $0x18] ss:$12 sps:$4 sm:$0xff]   ;;  %vm4083_vm0 = vcmask 7168  }
 0x616   :  { %5670 = vpow2.f32 %v4560_v54  ;;  %v4561_v35 = vmul.f32 -1.442695, %v2729_v31  ;;  %v2792_v13 = vpack.c.bf16 %v7744_v21, %v7738_v20  ;;  %v7777_v33 = vld [vmem:[#allocation11 + $0x4c] ss:$12 sps:$4 sm:$0xff]   ;;  %v7781_v29 = vld [vmem:[#allocation11 + $0x48] ss:$12 sps:$4 sm:$0xff]  }
 0x617   :  { %v4563_v31 = vmul.f32 -1.442695, %v2743_v7  ;;  %v7784_v41 = vld [vmem:[#allocation11 + $0x50] ss:$12 sps:$4 sm:$0xff]   ;;  %v7791_v54 = vld [vmem:[#allocation11 + $0x60] ss:$12 sps:$4 sm:$0xff]  }
 0x618   :  { %5672 = vpow2.f32 %v4561_v35  ;;  %2826 = vmatmul.mubr.bf16.vlgmr.msra.gmra.mrb[68].mxu0 %v2792_v13  ;;  %5015 = vmatmul.mubr.bf16.vlgmr.msra.gmra.mrb[92].mxu1 %v2792_v13  ;;  %v7787_v27 = vld [vmem:[#allocation11 + $0x64] ss:$12 sps:$4 sm:$0xff]   ;;  %v7794_v30 = vld [vmem:[#allocation11 + $0x68] ss:$12 sps:$4 sm:$0xff]  }
 0x619   :  { %2921 = vmatpush1.bf16.msra.mxu0 %v7748_v40  ;;  %5019 = vmatpush3.bf16.msra.mxu1 %v7751_v0  ;;  %5674 = vpow2.f32 %v4562_v53  ;;  %v7797_v13 = vld [vmem:[#allocation11 + $0x7c] ss:$12 sps:$4 sm:$0xff]   ;;  %v2722_v53 = vadd.f32 %v7717_v50, %v7027_v28  ;;  %v7811_v10 = vld [vmem:[#allocation11 + $0x94] ss:$12 sps:$4 sm:$0xff]  }
 0x61a   :  { %2922 = vmatprep.subr.bf16.mxu0 %v7754_v42  ;;  %5020 = vmatprep.subr.bf16.mxu1 %v8680_v6  ;;  %5676 = vpow2.f32 %v4563_v31  ;;  %8787 = vst [vmem:[#allocation102_spill] sm:$0xff] %v7797_v13  ;;  %8789 = vst [vmem:[#allocation104_spill] sm:$0xff] %v7811_v10 }
 0x61b   :  { %2952 = vmatprep.mubr.bf16.mxu0 %v8681_v11  ;;  %5034 = vmatprep.mubr.msk.bf16.mxu1 %vm6152_vm4, %v8680_v6 }
 0x61d   :  { %2923 = vmatpush1.bf16.msra.mxu0 %v7761_v44  ;;  %5021 = vmatpush3.bf16.msra.mxu1 %v7764_v5 }
 0x61e   :  { %2924 = vmatprep.subr.bf16.mxu0 %v7767_v48  ;;  %5022 = vmatprep.subr.bf16.mxu1 %v8680_v6 }
 0x620   :  { %v5671_v7 = vpop.eup %5670 }
 0x621   :  { %v2736_v63 = vadd.f32 1.0, %v5671_v7  ;;  %2925 = vmatpush1.bf16.msra.mxu0 %v7771_v49  ;;  %5023 = vmatpush3.bf16.msra.mxu1 %v7774_v24 }
 0x622   :  { %v5673_v45 = vpop.eup %5672  ;;  %2926 = vmatprep.subr.bf16.mxu0 %v7777_v33  ;;  %5024 = vmatprep.subr.bf16.mxu1 %v8680_v6 }
 0x623   :  { %5678 = vrcp.f32 %v2736_v63  ;;  %v2737_v60 = vadd.f32 1.0, %v5673_v45  ;;  %v5675_v17 = vpop.eup %5674  ;;  %v7803_v63 = vld [vmem:[#allocation11 + $0x78] ss:$12 sps:$4 sm:$0xff]   ;;  %v7806_v45 = vld [vmem:[#allocation11 + $0x80] ss:$12 sps:$4 sm:$0xff]  }
 0x624   :  { %v5677_v2 = vpop.eup %5676  ;;  %v2750_v35 = vadd.f32 1.0, %v5675_v17  ;;  %8788 = vst [vmem:[#allocation103_spill] sm:$0xff] %v7803_v63  ;;  %v2725_v17 = vadd.f32 %v7722_v34, %v7027_v28  ;;  %v8793_v34 = vld [vmem:[#allocation67_spill] sm:$0xff] }
 0x625   :  { %5680 = vrcp.f32 %v2737_v60  ;;  %2927 = vmatpush1.bf16.msra.mxu0 %v7781_v29  ;;  %5025 = vmatpush3.bf16.msra.mxu1 %v7784_v41  ;;  %v2751_v31 = vadd.f32 1.0, %v5677_v2  ;;  %v8790_v2 = vld [vmem:[#allocation63_spill] sm:$0xff] }
 0x626   :  { %2928 = vmatprep.subr.bf16.mxu0 %v7787_v27  ;;  %5026 = vmatprep.subr.bf16.mxu1 %v8680_v6  ;;  %5682 = vrcp.f32 %v2750_v35 }
 0x627   :  { %5684 = vrcp.f32 %v2751_v31  ;;  %v7830_v31 = vld [vmem:[#allocation11 + $0xb0] ss:$12 sps:$4 sm:$0xff]  }
 0x628   :  { %8796 = vst [vmem:[#allocation90_spill] sm:$0xff] %v7830_v31 }
 0x629   :  { %2929 = vmatpush1.bf16.msra.mxu0 %v7791_v54  ;;  %5027 = vmatpush3.bf16.msra.mxu1 %v7794_v30 }
 0x62a   :  { %2930 = vmatprep.subr.bf16.mxu0 %v7797_v13  ;;  %5028 = vmatprep.subr.bf16.mxu1 %v8680_v6 }
 0x62d   :  { %v5679_v7 = vpop.eup %5678  ;;  %2931 = vmatpush1.bf16.msra.mxu0 %v7803_v63  ;;  %5029 = vmatpush3.bf16.msra.mxu1 %v7806_v45  ;;  %v7816_v63 = vld [vmem:[#allocation11 + $0x90] ss:$12 sps:$4 sm:$0xff]  }
 0x62e   :  { %v2756_v60 = vmul.f32 %v5679_v7, %v2722_v53  ;;  %2932 = vmatprep.subr.bf16.mxu0 %v7811_v10  ;;  %5030 = vmatprep.subr.bf16.mxu1 %v8680_v6  ;;  %8791 = vst [vmem:[#allocation105_spill] sm:$0xff] %v7816_v63  ;;  %v7819_v53 = vld [vmem:[#allocation11 + $0x98] ss:$12 sps:$4 sm:$0xff]  }
 0x62f   :  { %v5681_v50 = vpop.eup %5680  ;;  %8792 = vst [vmem:[#allocation106_spill] sm:$0xff] %v7819_v53  ;;  %v7823_v7 = vld [vmem:[#allocation11 + $0xac] ss:$12 sps:$4 sm:$0xff]  }
 0x630   :  { %v2758_v32 = vadd.f32 %v2756_v60, %v8790_v2  ;;  %v2757_v13 = vmul.f32 %v5681_v50, %v2725_v17  ;;  %8794 = vst [vmem:[#allocation107_spill] sm:$0xff] %v7823_v7  ;;  %v7827_v60 = vld [vmem:[#allocation11 + $0xa8] ss:$12 sps:$4 sm:$0xff]  }
 0x631   :  { %2933 = vmatpush1.bf16.msra.mxu0 %v7816_v63  ;;  %5031 = vmatpush3.bf16.msra.mxu1 %v7819_v53  ;;  %8795 = vst [vmem:[#allocation108_spill] sm:$0xff] %v7827_v60 }
 0x632   :  { %5686 = vtanh.f32 %v2758_v32  ;;  %v2759_v35 = vadd.f32 %v2757_v13, %v8793_v34  ;;  %2934 = vmatprep.subr.bf16.mxu0 %v7823_v7  ;;  %5032 = vmatprep.subr.bf16.mxu1 %v8680_v6  ;;  %v5683_v32 = vpop.eup %5682 }
 0x633   :  { %v5685_v13 = vpop.eup %5684  ;;  %v2762_v17 = vsub.f32 1.0, %v5683_v32 }
 0x634   :  { %5688 = vtanh.f32 %v2759_v35  ;;  %v2763_v2 = vsub.f32 1.0, %v5685_v13  ;;  %v2766_v35 = vmul.f32 %v5683_v32, %v7615_v1  ;;  %v8800_v32 = vld [vmem:[#allocation29_spill] sm:$0xff] }
 0x635   :  { %2935 = vmatpush1.bf16.msra.mxu0 %v7827_v60  ;;  %5033 = vmatpush3.bf16.msra.mxu1 %v7830_v31  ;;  %v2767_v60 = vmul.f32 %v5685_v13, %v7621_v61 }
 0x636   :  { %3069 = vmatprep.subr.bf16.mxu0 %v7595_v58  ;;  %5038 = vmatprep.subr.bf16.mxu1 %v8680_v6 }
 0x63c   :  { %v5687_v50 = vpop.eup %5686 }
 0x63d   :  { %v2764_v34 = vmul.f32 %v5687_v50, %v2762_v17 }
 0x63e   :  { %v5689_v7 = vpop.eup %5688 }
 0x63f   :  { %v2765_v53 = vmul.f32 %v5689_v7, %v2763_v2  ;;  %v7837_v63 = vadd.f32 %v2766_v35, %v2764_v34  ;;  %v8801_v35 = vld [vmem:[#allocation30_spill] sm:$0xff] }
 0x641   :  { %8797 = vst [vmem:[#allocation91_spill] sm:$0xff] %v7837_v63  ;;  %v7839_v10 = vadd.f32 %v2767_v60, %v2765_v53  ;;  %v7845_v58 = vsel %vm2486_vm8, %v7837_v63, %v7615_v1  ;;  %v8799_v1 = vld [vmem:[#allocation28_spill] sm:$0xff] }
 0x643   :  { %8798 = vst [vmem:[#allocation60_spill] sm:$0xff] %v7839_v10  ;;  %v7851_v17 = vsel %vm2487_vm1, %v7839_v10, %v7621_v61 }
 0x644   :  { %v2919_v7 = vpack.c.bf16 %v7851_v17, %v7845_v58 }
 0x646   :  { %2953 = vmatmul.mubr.bf16.vlgmr.msra.gmra.mrb[72].mxu0 %v2919_v7  ;;  %5035 = vmatmul.mubr.bf16.vlgmr.msra.gmra.mrb[96].mxu1 %v2919_v7 }
 0x647   :  { %3070 = vmatpush1.bf16.msra.mxu0 %v7625_v39  ;;  %5039 = vmatpush3.bf16.msra.mxu1 %v7628_v47 }
 0x648   :  { %3071 = vmatprep.subr.bf16.mxu0 %v7631_v16  ;;  %5040 = vmatprep.subr.bf16.mxu1 %v8680_v6 }
 0x649   :  { %3101 = vmatprep.mubr.bf16.mxu0 %v8681_v11  ;;  %5054 = vmatprep.mubr.msk.bf16.mxu1 %vm6152_vm4, %v8680_v6 }
 0x64b   :  { %3072 = vmatpush1.bf16.msra.mxu0 %v7638_v62  ;;  %5041 = vmatpush3.bf16.msra.mxu1 %v7641_v3 }
 0x64c   :  { %3073 = vmatprep.subr.bf16.mxu0 %v7644_v25  ;;  %5042 = vmatprep.subr.bf16.mxu1 %v8680_v6 }
 0x64f   :  { %3074 = vmatpush1.bf16.msra.mxu0 %v7648_v36  ;;  %5043 = vmatpush3.bf16.msra.mxu1 %v7651_v51 }
 0x650   :  { %3075 = vmatprep.subr.bf16.mxu0 %v7654_v52  ;;  %5044 = vmatprep.subr.bf16.mxu1 %v8680_v6 }
 0x653   :  { %3076 = vmatpush1.bf16.msra.mxu0 %v7658_v4  ;;  %5045 = vmatpush3.bf16.msra.mxu1 %v7661_v9 }
 0x654   :  { %3077 = vmatprep.subr.bf16.mxu0 %v7664_v18  ;;  %5046 = vmatprep.subr.bf16.mxu1 %v8680_v6 }
 0x657   :  { %3078 = vmatpush1.bf16.msra.mxu0 %v7668_v57  ;;  %5047 = vmatpush3.bf16.msra.mxu1 %v7671_v43 }
 0x658   :  { %3079 = vmatprep.subr.bf16.mxu0 %v7674_v59  ;;  %5048 = vmatprep.subr.bf16.mxu1 %v8680_v6 }
 0x65b   :  { %3080 = vmatpush1.bf16.msra.mxu0 %v7678_v46  ;;  %5049 = vmatpush3.bf16.msra.mxu1 %v7681_v37 }
 0x65c   :  { %3081 = vmatprep.subr.bf16.mxu0 %v7684_v14  ;;  %5050 = vmatprep.subr.bf16.mxu1 %v8680_v6 }
 0x65f   :  { %3082 = vmatpush1.bf16.msra.mxu0 %v7688_v38  ;;  %5051 = vmatpush3.bf16.msra.mxu1 %v7691_v55 }
 0x660   :  { %3083 = vmatprep.subr.bf16.mxu0 %v7694_v56  ;;  %5052 = vmatprep.subr.bf16.mxu1 %v8680_v6 }
 0x663   :  { %3084 = vmatpush1.bf16.msra.mxu0 %v7698_v15  ;;  %5053 = vmatpush3.bf16.msra.mxu1 %v7701_v26  ;;  %v8802_v26 = vld [vmem:[#allocation31_spill] sm:$0xff] }
 0x664   :  { %3196 = vmatprep.subr.bf16.mxu0 %v7704_v19  ;;  %5058 = vmatprep.subr.bf16.mxu1 %v8680_v6 }
 0x6eb   :  { %v2827_v12 = vpop.f32.mrb[68].mxu0  ;;  %v2870_v8 = vpop.f32.mrb[92].mxu1 }
 0x6ec   :  { %v5244_v61 = vadd.f32 %v8799_v1, %v2827_v12  ;;  %v2829_v53 = vpop.f32.mrb[69].mxu0  ;;  %v5016_v60 = vpop.f32.mrb[93].mxu1 }
 0x6ed   :  { %v5247_v13 = vadd.f32 %v8800_v32, %v2829_v53  ;;  %v2831_v50 = vpop.f32.mrb[70].mxu0  ;;  %v2873_v2 = vpop.f32.mrb[94].mxu1 }
 0x6ee   :  { %v4564_v34 = vmul.f32 -1.442695, %v5244_v61  ;;  %v5250_v7 = vadd.f32 %v8801_v35, %v2831_v50  ;;  %v2833_v10 = vpop.f32.mrb[71].mxu0  ;;  %v5017_v63 = vpop.f32.mrb[95].mxu1  ;;  %v8803_v35 = vld [vmem:[#allocation92_spill] sm:$0xff] }
 0x6ef   :  { %v5253_v15 = vadd.f32 %v8802_v26, %v2833_v10  ;;  %v4566_v56 = vmul.f32 -1.442695, %v5247_v13  ;;  %v2871_v63 = vadd.f32 %v2870_v8, %v8803_v35 }
 0x6f0   :  { %5690 = vpow2.f32 %v4564_v34  ;;  %v4565_v19 = vmul.f32 -1.442695, %v5250_v7  ;;  %v8805_v34 = vld [vmem:[#allocation80_spill] sm:$0xff] }
 0x6f1   :  { %v4567_v55 = vmul.f32 -1.442695, %v5253_v15 }
 0x6f2   :  { %5692 = vpow2.f32 %v4565_v19  ;;  %v2874_v19 = vadd.f32 %v2873_v2, %v8803_v35 }
 0x6f3   :  { %5694 = vpow2.f32 %v4566_v56  ;;  %v8804_v56 = vld [vmem:[#allocation76_spill] sm:$0xff] }
 0x6f4   :  { %5696 = vpow2.f32 %v4567_v55 }
 0x6fa   :  { %v5691_v12 = vpop.eup %5690 }
 0x6fb   :  { %v2885_v1 = vadd.f32 1.0, %v5691_v12 }
 0x6fc   :  { %v5693_v60 = vpop.eup %5692 }
 0x6fd   :  { %5698 = vrcp.f32 %v2885_v1  ;;  %v2886_v53 = vadd.f32 1.0, %v5693_v60  ;;  %v5695_v61 = vpop.eup %5694 }
 0x6fe   :  { %v5697_v32 = vpop.eup %5696  ;;  %v2899_v50 = vadd.f32 1.0, %v5695_v61 }
 0x6ff   :  { %5700 = vrcp.f32 %v2886_v53  ;;  %v2900_v38 = vadd.f32 1.0, %v5697_v32 }
 0x700   :  { %5702 = vrcp.f32 %v2899_v50 }
 0x701   :  { %5704 = vrcp.f32 %v2900_v38 }
 0x707   :  { %v5699_v10 = vpop.eup %5698 }
 0x708   :  { %v2905_v26 = vmul.f32 %v5699_v10, %v2871_v63 }
 0x709   :  { %v5701_v15 = vpop.eup %5700 }
 0x70a   :  { %v2907_v55 = vadd.f32 %v2905_v26, %v8804_v56  ;;  %v2906_v13 = vmul.f32 %v5701_v15, %v2874_v19  ;;  %v5703_v12 = vpop.eup %5702 }
 0x70b   :  { %v5705_v1 = vpop.eup %5704  ;;  %v2911_v60 = vsub.f32 1.0, %v5703_v12  ;;  %v2915_v8 = vmul.f32 %v5703_v12, %v7738_v20  ;;  %v8808_v12 = vld [vmem:[#allocation54_spill] sm:$0xff] }
 0x70c   :  { %5706 = vtanh.f32 %v2907_v55  ;;  %v2908_v7 = vadd.f32 %v2906_v13, %v8805_v34  ;;  %v2912_v61 = vsub.f32 1.0, %v5705_v1  ;;  %v2916_v2 = vmul.f32 %v5705_v1, %v7744_v21 }
 0x70e   :  { %5708 = vtanh.f32 %v2908_v7 }
 0x716   :  { %v5707_v53 = vpop.eup %5706 }
 0x717   :  { %v2913_v32 = vmul.f32 %v5707_v53, %v2911_v60 }
 0x718   :  { %v5709_v50 = vpop.eup %5708 }
 0x719   :  { %v2954_v63 = vpop.f32.mrb[72].mxu0  ;;  %v7900_v10 = vpop.f32.mrb[96].mxu1  ;;  %v2914_v26 = vmul.f32 %v5709_v50, %v2912_v61  ;;  %v7902_v38 = vadd.f32 %v2915_v8, %v2913_v32  ;;  %v8809_v61 = vld [vmem:[#allocation53_spill] sm:$0xff] }
 0x71a   :  { %v2955_v19 = vadd.f32 %v2954_v63, %v6974_v23  ;;  %v2956_v15 = vpop.f32.mrb[73].mxu0  ;;  %v5036_v56 = vpop.f32.mrb[97].mxu1 }
 0x71b   :  { %8806 = vst [vmem:[#allocation64_spill] sm:$0xff] %v7902_v38  ;;  %v2957_v55 = vadd.f32 %v2956_v15, %v6981_v22  ;;  %v2958_v13 = vpop.f32.mrb[74].mxu0  ;;  %v7906_v34 = vpop.f32.mrb[98].mxu1  ;;  %v7908_v7 = vadd.f32 %v2916_v2, %v2914_v26  ;;  %v7918_v63 = vsel %vm2198_vm13, %v7902_v38, %v7738_v20  ;;  %v8812_v15 = vld [vmem:[#allocation58_spill] sm:$0xff] }
 0x71c   :  { %v3004_v60 = vadd.f32 %v2955_v19, %v8808_v12  ;;  %v2959_v1 = vadd.f32 %v2958_v13, %v6974_v23  ;;  %v2960_v53 = vpop.f32.mrb[75].mxu0  ;;  %v5037_v35 = vpop.f32.mrb[99].mxu1 }
 0x71d   :  { %8807 = vst [vmem:[#allocation70_spill] sm:$0xff] %v7908_v7  ;;  %v3018_v8 = vadd.f32 %v2957_v55, %v8809_v61  ;;  %v2961_v32 = vadd.f32 %v2960_v53, %v6981_v22  ;;  %v7924_v26 = vsel %vm2199_vm15, %v7908_v7, %v7744_v21  ;;  %v8813_v55 = vld [vmem:[#allocation57_spill] sm:$0xff] }
 0x71e   :  { %v4568_v19 = vmul.f32 -1.442695, %v3004_v60  ;;  %v3005_v56 = vadd.f32 %v2959_v1, %v8812_v15  ;;  %v3068_v35 = vpack.c.bf16 %v7924_v26, %v7918_v63  ;;  %v2998_v15 = vadd.f32 %v7900_v10, %v7027_v28  ;;  %v8820_v10 = vld [vmem:[#allocation107_spill] sm:$0xff] }
 0x71f   :  { %v3019_v13 = vadd.f32 %v2961_v32, %v8813_v55  ;;  %v4570_v20 = vmul.f32 -1.442695, %v3018_v8  ;;  %v8814_v32 = vld [vmem:[#allocation102_spill] sm:$0xff] }
 0x720   :  { %5710 = vpow2.f32 %v4568_v19  ;;  %v4569_v12 = vmul.f32 -1.442695, %v3005_v56  ;;  %3102 = vmatmul.mubr.bf16.vlgmr.msra.gmra.mrb[76].mxu0 %v3068_v35  ;;  %5055 = vmatmul.mubr.bf16.vlgmr.msra.gmra.mrb[100].mxu1 %v3068_v35  ;;  %v8815_v19 = vld [vmem:[#allocation103_spill] sm:$0xff]  ;;  %v8816_v35 = vld [vmem:[#allocation104_spill] sm:$0xff] }
 0x721   :  { %3197 = vmatpush1.bf16.msra.mxu0 %v7748_v40  ;;  %5059 = vmatpush3.bf16.msra.mxu1 %v7751_v0  ;;  %v4571_v21 = vmul.f32 -1.442695, %v3019_v13 }
 0x722   :  { %5712 = vpow2.f32 %v4569_v12  ;;  %3198 = vmatprep.subr.bf16.mxu0 %v7754_v42  ;;  %5060 = vmatprep.subr.bf16.mxu1 %v8680_v6  ;;  %v3001_v12 = vadd.f32 %v7906_v34, %v7027_v28  ;;  %v8823_v34 = vld [vmem:[#allocation114_spill] sm:$0xff] }
 0x723   :  { %3228 = vmatprep.mubr.bf16.mxu0 %v8681_v11  ;;  %5074 = vmatprep.mubr.msk.bf16.mxu1 %vm6152_vm4, %v8680_v6  ;;  %5714 = vpow2.f32 %v4570_v20 }
 0x724   :  { %5716 = vpow2.f32 %v4571_v21  ;;  %v8817_v21 = vld [vmem:[#allocation105_spill] sm:$0xff] }
 0x725   :  { %3199 = vmatpush1.bf16.msra.mxu0 %v7761_v44  ;;  %5061 = vmatpush3.bf16.msra.mxu1 %v7764_v5 }
 0x726   :  { %3200 = vmatprep.subr.bf16.mxu0 %v7767_v48  ;;  %5062 = vmatprep.subr.bf16.mxu1 %v8680_v6 }
 0x729   :  { %3201 = vmatpush1.bf16.msra.mxu0 %v7771_v49  ;;  %5063 = vmatpush3.bf16.msra.mxu1 %v7774_v24 }
 0x72a   :  { %v5711_v60 = vpop.eup %5710  ;;  %3202 = vmatprep.subr.bf16.mxu0 %v7777_v33  ;;  %5064 = vmatprep.subr.bf16.mxu1 %v8680_v6 }
 0x72b   :  { %v3012_v1 = vadd.f32 1.0, %v5711_v60  ;;  %v8818_v60 = vld [vmem:[#allocation106_spill] sm:$0xff] }
 0x72c   :  { %v5713_v53 = vpop.eup %5712 }
 0x72d   :  { %5718 = vrcp.f32 %v3012_v1  ;;  %v3013_v61 = vadd.f32 1.0, %v5713_v53  ;;  %3203 = vmatpush1.bf16.msra.mxu0 %v7781_v29  ;;  %5065 = vmatpush3.bf16.msra.mxu1 %v7784_v41  ;;  %v5715_v8 = vpop.eup %5714  ;;  %v8819_v1 = vld [vmem:[#allocation55_spill] sm:$0xff] }
 0x72e   :  { %3204 = vmatprep.subr.bf16.mxu0 %v7787_v27  ;;  %5066 = vmatprep.subr.bf16.mxu1 %v8680_v6  ;;  %v5717_v50 = vpop.eup %5716  ;;  %v3026_v2 = vadd.f32 1.0, %v5715_v8  ;;  %v8821_v8 = vld [vmem:[#allocation59_spill] sm:$0xff] }
 0x72f   :  { %5720 = vrcp.f32 %v3013_v61  ;;  %v3027_v56 = vadd.f32 1.0, %v5717_v50 }
 0x730   :  { %5722 = vrcp.f32 %v3026_v2  ;;  %v8822_v2 = vld [vmem:[#allocation108_spill] sm:$0xff] }
 0x731   :  { %3205 = vmatpush1.bf16.msra.mxu0 %v7791_v54  ;;  %5067 = vmatpush3.bf16.msra.mxu1 %v7794_v30  ;;  %5724 = vrcp.f32 %v3027_v56 }
 0x732   :  { %3206 = vmatprep.subr.bf16.mxu0 %v8814_v32  ;;  %5068 = vmatprep.subr.bf16.mxu1 %v8680_v6 }
 0x735   :  { %3207 = vmatpush1.bf16.msra.mxu0 %v8815_v19  ;;  %5069 = vmatpush3.bf16.msra.mxu1 %v7806_v45 }
 0x736   :  { %3208 = vmatprep.subr.bf16.mxu0 %v8816_v35  ;;  %5070 = vmatprep.subr.bf16.mxu1 %v8680_v6 }
 0x737   :  { %v5719_v55 = vpop.eup %5718 }
 0x738   :  { %v3032_v13 = vmul.f32 %v5719_v55, %v2998_v15 }
 0x739   :  { %v5721_v20 = vpop.eup %5720  ;;  %3209 = vmatpush1.bf16.msra.mxu0 %v8817_v21  ;;  %5071 = vmatpush3.bf16.msra.mxu1 %v8818_v60 }
 0x73a   :  { %v3034_v53 = vadd.f32 %v3032_v13, %v8819_v1  ;;  %v3033_v61 = vmul.f32 %v5721_v20, %v3001_v12  ;;  %3210 = vmatprep.subr.bf16.mxu0 %v8820_v10  ;;  %5072 = vmatprep.subr.bf16.mxu1 %v8680_v6  ;;  %v5723_v15 = vpop.eup %5722 }
 0x73b   :  { %v5725_v55 = vpop.eup %5724  ;;  %v3038_v13 = vsub.f32 1.0, %v5723_v15  ;;  %v3042_v1 = vmul.f32 %v5723_v15, %v7845_v58 }
 0x73c   :  { %5726 = vtanh.f32 %v3034_v53  ;;  %v3035_v50 = vadd.f32 %v3033_v61, %v8821_v8  ;;  %v3039_v12 = vsub.f32 1.0, %v5725_v55  ;;  %v3043_v61 = vmul.f32 %v5725_v55, %v7851_v17 }
 0x73d   :  { %3211 = vmatpush1.bf16.msra.mxu0 %v8822_v2  ;;  %5073 = vmatpush3.bf16.msra.mxu1 %v7830_v31 }
 0x73e   :  { %5728 = vtanh.f32 %v3035_v50  ;;  %3345 = vmatprep.subr.bf16.mxu0 %v8823_v34  ;;  %5078 = vmatprep.subr.bf16.mxu1 %v8680_v6 }
 0x746   :  { %v5727_v56 = vpop.eup %5726 }
 0x747   :  { %v3040_v20 = vmul.f32 %v5727_v56, %v3038_v13 }
 0x748   :  { %v5729_v53 = vpop.eup %5728 }
 0x749   :  { %v3041_v7 = vmul.f32 %v5729_v53, %v3039_v12  ;;  %v7973_v8 = vadd.f32 %v3042_v1, %v3040_v20 }
 0x74b   :  { %v7975_v38 = vadd.f32 %v3043_v61, %v3041_v7  ;;  %v7981_v34 = vsel %vm2184_vm14, %v7973_v8, %v7845_v58  ;;  %v8826_v58 = vld [vmem:[#allocation116_spill] sm:$0xff]  ;;  %v8835_v7 = vld [vmem:[#allocation35_spill] sm:$0xff] }
 0x74d   :  { %v7987_v13 = vsel %vm2185_vm11, %v7975_v38, %v7851_v17 }
 0x74e   :  { %v3195_v15 = vpack.c.bf16 %v7987_v13, %v7981_v34 }
 0x750   :  { %3229 = vmatmul.mubr.bf16.vlgmr.msra.gmra.mrb[80].mxu0 %v3195_v15  ;;  %5075 = vmatmul.mubr.bf16.vlgmr.msra.gmra.mrb[104].mxu1 %v3195_v15 }
 0x751   :  { %3346 = vmatpush1.bf16.msra.mxu0 %v7625_v39  ;;  %5079 = vmatpush3.bf16.msra.mxu1 %v7628_v47  ;;  %v8827_v39 = vld [vmem:[#allocation117_spill] sm:$0xff]  ;;  %v8828_v47 = vld [vmem:[#allocation118_spill] sm:$0xff] }
 0x752   :  { %3347 = vmatprep.subr.bf16.mxu0 %v7631_v16  ;;  %5080 = vmatprep.subr.bf16.mxu1 %v8680_v6  ;;  %v8829_v16 = vld [vmem:[#allocation119_spill] sm:$0xff] }
 0x753   :  { %3377 = vmatprep.mubr.bf16.mxu0 %v8681_v11  ;;  %5094 = vmatprep.mubr.msk.bf16.mxu1 %vm6152_vm4, %v8680_v6 }
 0x755   :  { %3348 = vmatpush1.bf16.msra.mxu0 %v7638_v62  ;;  %5081 = vmatpush3.bf16.msra.mxu1 %v7641_v3  ;;  %v8830_v62 = vld [vmem:[#allocation120_spill] sm:$0xff]  ;;  %v8831_v3 = vld [vmem:[#allocation99_spill] sm:$0xff] }
 0x756   :  { %3349 = vmatprep.subr.bf16.mxu0 %v7644_v25  ;;  %5082 = vmatprep.subr.bf16.mxu1 %v8680_v6 }
 0x759   :  { %3350 = vmatpush1.bf16.msra.mxu0 %v7648_v36  ;;  %5083 = vmatpush3.bf16.msra.mxu1 %v7651_v51  ;;  %v8832_v51 = vld [vmem:[#allocation32_spill] sm:$0xff] }
 0x75a   :  { %3351 = vmatprep.subr.bf16.mxu0 %v7654_v52  ;;  %5084 = vmatprep.subr.bf16.mxu1 %v8680_v6 }
 0x75d   :  { %3352 = vmatpush1.bf16.msra.mxu0 %v7658_v4  ;;  %5085 = vmatpush3.bf16.msra.mxu1 %v7661_v9 }
 0x75e   :  { %3353 = vmatprep.subr.bf16.mxu0 %v7664_v18  ;;  %5086 = vmatprep.subr.bf16.mxu1 %v8680_v6  ;;  %v8833_v18 = vld [vmem:[#allocation33_spill] sm:$0xff] }
 0x761   :  { %3354 = vmatpush1.bf16.msra.mxu0 %v7668_v57  ;;  %5087 = vmatpush3.bf16.msra.mxu1 %v7671_v43 }
 0x762   :  { %3355 = vmatprep.subr.bf16.mxu0 %v7674_v59  ;;  %5088 = vmatprep.subr.bf16.mxu1 %v8680_v6 }
 0x765   :  { %3356 = vmatpush1.bf16.msra.mxu0 %v7678_v46  ;;  %5089 = vmatpush3.bf16.msra.mxu1 %v7681_v37  ;;  %v8834_v37 = vld [vmem:[#allocation34_spill] sm:$0xff] }
 0x766   :  { %3357 = vmatprep.subr.bf16.mxu0 %v7684_v14  ;;  %5090 = vmatprep.subr.bf16.mxu1 %v8680_v6 }
 0x769   :  { %3358 = vmatpush1.bf16.msra.mxu0 %v8826_v58  ;;  %5091 = vmatpush3.bf16.msra.mxu1 %v8827_v39 }
 0x76a   :  { %3359 = vmatprep.subr.bf16.mxu0 %v8828_v47  ;;  %5092 = vmatprep.subr.bf16.mxu1 %v8680_v6  ;;  %v8836_v47 = vld [vmem:[#allocation92_spill] sm:$0xff] }
 0x76d   :  { %3360 = vmatpush1.bf16.msra.mxu0 %v8829_v16  ;;  %5093 = vmatpush3.bf16.msra.mxu1 %v8830_v62 }
 0x76e   :  { %3472 = vmatprep.subr.bf16.mxu0 %v8831_v3  ;;  %5098 = vmatprep.subr.bf16.mxu1 %v8680_v6 }
 0x7f3   :  { %v3103_v25 = vpop.f32.mrb[76].mxu0  ;;  %v3146_v36 = vpop.f32.mrb[100].mxu1 }
 0x7f4   :  { %v5256_v52 = vadd.f32 %v8832_v51, %v3103_v25  ;;  %v3105_v4 = vpop.f32.mrb[77].mxu0  ;;  %v5056_v9 = vpop.f32.mrb[101].mxu1  ;;  %v3147_v16 = vadd.f32 %v3146_v36, %v8836_v47 }
 0x7f5   :  { %v5259_v57 = vadd.f32 %v8833_v18, %v3105_v4  ;;  %v3107_v43 = vpop.f32.mrb[78].mxu0  ;;  %v3149_v59 = vpop.f32.mrb[102].mxu1  ;;  %v8837_v4 = vld [vmem:[#allocation84_spill] sm:$0xff] }
 0x7f6   :  { %v4572_v46 = vmul.f32 -1.442695, %v5256_v52  ;;  %v5262_v14 = vadd.f32 %v8834_v37, %v3107_v43  ;;  %v3109_v31 = vpop.f32.mrb[79].mxu0  ;;  %v5057_v17 = vpop.f32.mrb[103].mxu1  ;;  %v3150_v51 = vadd.f32 %v3149_v59, %v8836_v47 }
 0x7f7   :  { %v5265_v55 = vadd.f32 %v8835_v7, %v3109_v31  ;;  %v4574_v12 = vmul.f32 -1.442695, %v5259_v57  ;;  %v8838_v57 = vld [vmem:[#allocation86_spill] sm:$0xff] }
 0x7f8   :  { %5730 = vpow2.f32 %v4572_v46  ;;  %v4573_v56 = vmul.f32 -1.442695, %v5262_v14 }
 0x7f9   :  { %v4575_v20 = vmul.f32 -1.442695, %v5265_v55 }
 0x7fa   :  { %5732 = vpow2.f32 %v4573_v56 }
 0x7fb   :  { %5734 = vpow2.f32 %v4574_v12 }
 0x7fc   :  { %5736 = vpow2.f32 %v4575_v20 }
 0x802   :  { %v5731_v1 = vpop.eup %5730 }
 0x803   :  { %v3161_v53 = vadd.f32 1.0, %v5731_v1 }
 0x804   :  { %v5733_v61 = vpop.eup %5732 }
 0x805   :  { %5738 = vrcp.f32 %v3161_v53  ;;  %v3162_v50 = vadd.f32 1.0, %v5733_v61  ;;  %v5735_v15 = vpop.eup %5734 }
 0x806   :  { %v5737_v58 = vpop.eup %5736  ;;  %v3175_v39 = vadd.f32 1.0, %v5735_v15 }
 0x807   :  { %5740 = vrcp.f32 %v3162_v50  ;;  %v3176_v62 = vadd.f32 1.0, %v5737_v58 }
 0x808   :  { %5742 = vrcp.f32 %v3175_v39 }
 0x809   :  { %5744 = vrcp.f32 %v3176_v62 }
 0x80f   :  { %v5739_v3 = vpop.eup %5738 }
 0x810   :  { %v3181_v25 = vmul.f32 %v5739_v3, %v3147_v16 }
 0x811   :  { %v5741_v52 = vpop.eup %5740 }
 0x812   :  { %v3183_v9 = vadd.f32 %v3181_v25, %v8837_v4  ;;  %v3182_v18 = vmul.f32 %v5741_v52, %v3150_v51  ;;  %v5743_v46 = vpop.eup %5742  ;;  %v8842_v52 = vld [vmem:[#allocation47_spill] sm:$0xff] }
 0x813   :  { %v5745_v37 = vpop.eup %5744  ;;  %v3187_v14 = vsub.f32 1.0, %v5743_v46  ;;  %v3191_v7 = vmul.f32 %v5743_v46, %v7918_v63  ;;  %v8843_v46 = vld [vmem:[#allocation46_spill] sm:$0xff] }
 0x814   :  { %5746 = vtanh.f32 %v3183_v9  ;;  %v3184_v43 = vadd.f32 %v3182_v18, %v8838_v57  ;;  %v3188_v36 = vsub.f32 1.0, %v5745_v37  ;;  %v3192_v59 = vmul.f32 %v5745_v37, %v7924_v26 }
 0x816   :  { %5748 = vtanh.f32 %v3184_v43 }
 0x81e   :  { %v5747_v31 = vpop.eup %5746 }
 0x81f   :  { %v3189_v17 = vmul.f32 %v5747_v31, %v3187_v14  ;;  %v8844_v31 = vld [vmem:[#allocation50_spill] sm:$0xff] }
 0x820   :  { %v5749_v55 = vpop.eup %5748 }
 0x821   :  { %v3190_v56 = vmul.f32 %v5749_v55, %v3188_v36  ;;  %v8036_v12 = vadd.f32 %v3191_v7, %v3189_v17 }
 0x823   :  { %v3230_v20 = vpop.f32.mrb[80].mxu0  ;;  %v8038_v1 = vpop.f32.mrb[104].mxu1  ;;  %v8040_v53 = vadd.f32 %v3192_v59, %v3190_v56  ;;  %v8050_v3 = vsel %vm1896_vm9, %v8036_v12, %v7918_v63 }
 0x824   :  { %v3231_v61 = vadd.f32 %v3230_v20, %v6974_v23  ;;  %v3232_v50 = vpop.f32.mrb[81].mxu0  ;;  %v5076_v15 = vpop.f32.mrb[105].mxu1 }
 0x825   :  { %8839 = vst [vmem:[#allocation69_spill] sm:$0xff] %v8040_v53  ;;  %v3233_v58 = vadd.f32 %v3232_v50, %v6981_v22  ;;  %v3234_v39 = vpop.f32.mrb[82].mxu0  ;;  %v8044_v16 = vpop.f32.mrb[106].mxu1  ;;  %v8056_v51 = vsel %vm1897_vm10, %v8040_v53, %v7924_v26  ;;  %v8845_v26 = vld [vmem:[#allocation49_spill] sm:$0xff] }
 0x826   :  { %v3280_v4 = vadd.f32 %v3231_v61, %v8842_v52  ;;  %v3235_v9 = vadd.f32 %v3234_v39, %v6974_v23  ;;  %v3236_v18 = vpop.f32.mrb[83].mxu0  ;;  %v5077_v57 = vpop.f32.mrb[107].mxu1  ;;  %v3344_v43 = vpack.c.bf16 %v8056_v51, %v8050_v3 }
 0x827   :  { %v3294_v37 = vadd.f32 %v3233_v58, %v8843_v46  ;;  %v3237_v63 = vadd.f32 %v3236_v18, %v6981_v22  ;;  %v5475_v18 = vld [vmem:[#allocation14 + $0x8] sm:$0xff]   ;;  %v5476_v57 = vld [vmem:[#allocation14 + $0x10] sm:$0xff]  }
 0x828   :  { %v4576_v14 = vmul.f32 -1.442695, %v3280_v4  ;;  %v3281_v36 = vadd.f32 %v3235_v9, %v8844_v31  ;;  %3378 = vmatmul.mubr.bf16.vlgmr.msra.gmra.mrb[84].mxu0 %v3344_v43  ;;  %5095 = vmatmul.mubr.bf16.vlgmr.msra.gmra.mrb[108].mxu1 %v3344_v43  ;;  %v5474_v9 = vld [vmem:[#allocation14] sm:$0xff]   ;;  %v5480_v46 = vld [vmem:[#allocation14 + $0x30] sm:$0xff]  }
 0x829   :  { %v3295_v17 = vadd.f32 %v3237_v63, %v8845_v26  ;;  %3473 = vmatpush1.bf16.msra.mxu0 %v7748_v40  ;;  %5099 = vmatpush3.bf16.msra.mxu1 %v7751_v0  ;;  %v4578_v55 = vmul.f32 -1.442695, %v3294_v37  ;;  %v5478_v43 = vld [vmem:[#allocation14 + $0x20] sm:$0xff]   ;;  %v5481_v37 = vld [vmem:[#allocation14 + $0x38] sm:$0xff]  }
 0x82a   :  { %5750 = vpow2.f32 %v4576_v14  ;;  %v4577_v7 = vmul.f32 -1.442695, %v3281_v36  ;;  %3474 = vmatprep.subr.bf16.mxu0 %v7754_v42  ;;  %5100 = vmatprep.subr.bf16.mxu1 %v8680_v6  ;;  %v8125_v63 = vld [vmem:[#allocation13] sm:$0xff]   ;;  %v8851_v36 = vld [vmem:[#allocation36_spill] sm:$0xff] }
 0x82b   :  { %3504 = vmatprep.mubr.bf16.mxu0 %v8681_v11  ;;  %5114 = vmatprep.mubr.msk.bf16.mxu1 %vm6152_vm4, %v8680_v6  ;;  %v4579_v40 = vmul.f32 -1.442695, %v3295_v17 }
 0x82c   :  { %5752 = vpow2.f32 %v4577_v7 }
 0x82d   :  { %3475 = vmatpush1.bf16.msra.mxu0 %v7761_v44  ;;  %5101 = vmatpush3.bf16.msra.mxu1 %v7764_v5  ;;  %5754 = vpow2.f32 %v4578_v55  ;;  %v8852_v55 = vld [vmem:[#allocation37_spill] sm:$0xff] }
 0x82e   :  { %3476 = vmatprep.subr.bf16.mxu0 %v7767_v48  ;;  %5102 = vmatprep.subr.bf16.mxu1 %v8680_v6  ;;  %5756 = vpow2.f32 %v4579_v40 }
 0x831   :  { %3477 = vmatpush1.bf16.msra.mxu0 %v7771_v49  ;;  %5103 = vmatpush3.bf16.msra.mxu1 %v7774_v24  ;;  %v3274_v24 = vadd.f32 %v8038_v1, %v7027_v28 }
 0x832   :  { %3478 = vmatprep.subr.bf16.mxu0 %v7777_v33  ;;  %5104 = vmatprep.subr.bf16.mxu1 %v8680_v6 }
 0x834   :  { %v5751_v11 = vpop.eup %5750 }
 0x835   :  { %v3288_v0 = vadd.f32 1.0, %v5751_v11  ;;  %3479 = vmatpush1.bf16.msra.mxu0 %v7781_v29  ;;  %5105 = vmatpush3.bf16.msra.mxu1 %v7784_v41 }
 0x836   :  { %v5753_v42 = vpop.eup %5752  ;;  %3480 = vmatprep.subr.bf16.mxu0 %v7787_v27  ;;  %5106 = vmatprep.subr.bf16.mxu1 %v8680_v6  ;;  %v3277_v27 = vadd.f32 %v8044_v16, %v7027_v28 }
 0x837   :  { %5758 = vrcp.f32 %v3288_v0  ;;  %v3289_v44 = vadd.f32 1.0, %v5753_v42  ;;  %v5755_v5 = vpop.eup %5754 }
 0x838   :  { %v5757_v48 = vpop.eup %5756  ;;  %v3302_v49 = vadd.f32 1.0, %v5755_v5 }
 0x839   :  { %5760 = vrcp.f32 %v3289_v44  ;;  %3481 = vmatpush1.bf16.msra.mxu0 %v7791_v54  ;;  %5107 = vmatpush3.bf16.msra.mxu1 %v7794_v30  ;;  %v3303_v33 = vadd.f32 1.0, %v5757_v48  ;;  %v8846_v30 = vld [vmem:[#allocation48_spill] sm:$0xff]  ;;  %v8853_v44 = vld [vmem:[#allocation38_spill] sm:$0xff] }
 0x83a   :  { %3482 = vmatprep.subr.bf16.mxu0 %v8814_v32  ;;  %5108 = vmatprep.subr.bf16.mxu1 %v8680_v6  ;;  %5762 = vrcp.f32 %v3302_v49 }
 0x83b   :  { %5764 = vrcp.f32 %v3303_v33 }
 0x83d   :  { %3483 = vmatpush1.bf16.msra.mxu0 %v8815_v19  ;;  %5109 = vmatpush3.bf16.msra.mxu1 %v7806_v45  ;;  %v8847_v19 = vld [vmem:[#allocation90_spill] sm:$0xff] }
 0x83e   :  { %3484 = vmatprep.subr.bf16.mxu0 %v8816_v35  ;;  %5110 = vmatprep.subr.bf16.mxu1 %v8680_v6  ;;  %v8848_v35 = vld [vmem:[#allocation51_spill] sm:$0xff] }
 0x841   :  { %v5759_v29 = vpop.eup %5758  ;;  %3485 = vmatpush1.bf16.msra.mxu0 %v8817_v21  ;;  %5111 = vmatpush3.bf16.msra.mxu1 %v8818_v60 }
 0x842   :  { %v3308_v41 = vmul.f32 %v5759_v29, %v3274_v24  ;;  %3486 = vmatprep.subr.bf16.mxu0 %v8820_v10  ;;  %5112 = vmatprep.subr.bf16.mxu1 %v8680_v6  ;;  %v8854_v24 = vld [vmem:[#allocation39_spill] sm:$0xff] }
 0x843   :  { %v5761_v54 = vpop.eup %5760 }
 0x844   :  { %v3310_v45 = vadd.f32 %v3308_v41, %v8846_v30  ;;  %v3309_v32 = vmul.f32 %v5761_v54, %v3277_v27  ;;  %v5763_v60 = vpop.eup %5762 }
 0x845   :  { %3487 = vmatpush1.bf16.msra.mxu0 %v8822_v2  ;;  %5113 = vmatpush3.bf16.msra.mxu1 %v8847_v19  ;;  %v5765_v56 = vpop.eup %5764  ;;  %v3314_v59 = vsub.f32 1.0, %v5763_v60  ;;  %v3318_v61 = vmul.f32 %v5763_v60, %v7981_v34 }
 0x846   :  { %5766 = vtanh.f32 %v3310_v45  ;;  %v3311_v21 = vadd.f32 %v3309_v32, %v8848_v35  ;;  %v3315_v10 = vsub.f32 1.0, %v5765_v56  ;;  %v3319_v58 = vmul.f32 %v5765_v56, %v7987_v13  ;;  %5118 = vmatprep.subr.bf16.mxu0 %v5474_v9 }
 0x848   :  { %5768 = vtanh.f32 %v3311_v21 }
 0x850   :  { %v5767_v20 = vpop.eup %5766 }
 0x851   :  { %v3316_v1 = vmul.f32 %v5767_v20, %v3314_v59 }
 0x852   :  { %v5769_v50 = vpop.eup %5768 }
 0x853   :  { %v3317_v15 = vmul.f32 %v5769_v50, %v3315_v10  ;;  %v8107_v39 = vadd.f32 %v3318_v61, %v3316_v1  ;;  %v8855_v61 = vld [vmem:[#allocation88_spill] sm:$0xff] }
 0x855   :  { %v8109_v2 = vadd.f32 %v3319_v58, %v3317_v15  ;;  %v8115_v62 = vsel %vm1882_vm3, %v8107_v39, %v7981_v34  ;;  %v5477_v34 = vld [vmem:[#allocation14 + $0x18] sm:$0xff]  }
 0x856   :  { %v8856_v58 = vld [vmem:[#allocation89_spill] sm:$0xff] }
 0x857   :  { %v8121_v52 = vsel %vm1883_vm12, %v8109_v2, %v7987_v13  ;;  %v5479_v13 = vld [vmem:[#allocation14 + $0x28] sm:$0xff]  }
 0x858   :  { %v3471_v4 = vpack.c.bf16 %v8121_v52, %v8115_v62 }
 0x85a   :  { %3505 = vmatmul.mubr.bf16.vlgmr.msra.gmra.mrb[88].mxu0 %v3471_v4  ;;  %5115 = vmatmul.mubr.bf16.vlgmr.msra.gmra.mrb[112].mxu1 %v3471_v4 }
 0x85b   :  { %5119 = vmatpush3.bf16.msra.mxu0 %v5474_v9 }
 0x85c   :  { %5120 = vmatprep.subr.bf16.mxu0 %v5475_v18 }
 0x85f   :  { %5121 = vmatpush3.bf16.msra.mxu0 %v5475_v18 }
 0x860   :  { %5122 = vmatprep.subr.bf16.mxu0 %v5476_v57 }
 0x863   :  { %5123 = vmatpush3.bf16.msra.mxu0 %v5476_v57 }
 0x864   :  { %5124 = vmatprep.subr.bf16.mxu0 %v5477_v34 }
 0x867   :  { %5125 = vmatpush3.bf16.msra.mxu0 %v5477_v34 }
 0x868   :  { %5126 = vmatprep.subr.bf16.mxu0 %v5478_v43 }
 0x86b   :  { %5127 = vmatpush3.bf16.msra.mxu0 %v5478_v43 }
 0x86c   :  { %5128 = vmatprep.subr.bf16.mxu0 %v5479_v13 }
 0x86f   :  { %5129 = vmatpush3.bf16.msra.mxu0 %v5479_v13 }
 0x870   :  { %5130 = vmatprep.subr.bf16.mxu0 %v5480_v46 }
 0x873   :  { %5131 = vmatpush3.bf16.msra.mxu0 %v5480_v46 }
 0x874   :  { %5132 = vmatprep.subr.bf16.mxu0 %v5481_v37 }
 0x877   :  { %5133 = vmatpush3.bf16.msra.mxu0 %v5481_v37 }
 0x878   :  { %5150 = vmatprep.subr.bf16.mxu0 %v8125_v63 }
 0x8fb   :  { %v3379_v14 = vpop.f32.mrb[84].mxu0  ;;  %v3422_v31 = vpop.f32.mrb[108].mxu1 }
 0x8fc   :  { %v5268_v26 = vadd.f32 %v8851_v36, %v3379_v14  ;;  %v3381_v17 = vpop.f32.mrb[85].mxu0  ;;  %v5096_v7 = vpop.f32.mrb[109].mxu1  ;;  %v3423_v60 = vadd.f32 %v3422_v31, %v8836_v47 }
 0x8fd   :  { %v5271_v40 = vadd.f32 %v8852_v55, %v3381_v17  ;;  %v3383_v11 = vpop.f32.mrb[86].mxu0  ;;  %v3425_v0 = vpop.f32.mrb[110].mxu1 }
 0x8fe   :  { %v4580_v42 = vmul.f32 -1.442695, %v5268_v26  ;;  %v5274_v5 = vadd.f32 %v8853_v44, %v3383_v11  ;;  %v3385_v48 = vpop.f32.mrb[87].mxu0  ;;  %v5097_v49 = vpop.f32.mrb[111].mxu1  ;;  %v3426_v10 = vadd.f32 %v3425_v0, %v8836_v47  ;;  %v8859_v0 = vld [vmem:[#allocation41_spill] sm:$0xff] }
 0x8ff   :  { %v5277_v33 = vadd.f32 %v8854_v24, %v3385_v48  ;;  %v4582_v41 = vmul.f32 -1.442695, %v5271_v40 }
 0x900   :  { %5770 = vpow2.f32 %v4580_v42  ;;  %v4581_v29 = vmul.f32 -1.442695, %v5274_v5  ;;  %v8860_v5 = vld [vmem:[#allocation40_spill] sm:$0xff] }
 0x901   :  { %v4583_v27 = vmul.f32 -1.442695, %v5277_v33  ;;  %v8861_v33 = vld [vmem:[#allocation44_spill] sm:$0xff] }
 0x902   :  { %5772 = vpow2.f32 %v4581_v29 }
 0x903   :  { %5774 = vpow2.f32 %v4582_v41  ;;  %v8862_v41 = vld [vmem:[#allocation43_spill] sm:$0xff] }
 0x904   :  { %5776 = vpow2.f32 %v4583_v27 }
 0x90a   :  { %v5771_v54 = vpop.eup %5770 }
 0x90b   :  { %v3437_v30 = vadd.f32 1.0, %v5771_v54 }
 0x90c   :  { %v5773_v45 = vpop.eup %5772 }
 0x90d   :  { %5778 = vrcp.f32 %v3437_v30  ;;  %v3438_v32 = vadd.f32 1.0, %v5773_v45  ;;  %v5775_v19 = vpop.eup %5774 }
 0x90e   :  { %v5777_v35 = vpop.eup %5776  ;;  %v3451_v21 = vadd.f32 1.0, %v5775_v19 }
 0x90f   :  { %5780 = vrcp.f32 %v3438_v32  ;;  %v3452_v56 = vadd.f32 1.0, %v5777_v35 }
 0x910   :  { %5782 = vrcp.f32 %v3451_v21 }
 0x911   :  { %5784 = vrcp.f32 %v3452_v56 }
 0x917   :  { %v5779_v59 = vpop.eup %5778 }
 0x918   :  { %v3457_v20 = vmul.f32 %v5779_v59, %v3423_v60 }
 0x919   :  { %v5781_v1 = vpop.eup %5780 }
 0x91a   :  { %v3459_v50 = vadd.f32 %v3457_v20, %v8855_v61  ;;  %v3458_v15 = vmul.f32 %v5781_v1, %v3426_v10  ;;  %v5783_v25 = vpop.eup %5782 }
 0x91b   :  { %v5785_v4 = vpop.eup %5784  ;;  %v3463_v9 = vsub.f32 1.0, %v5783_v25  ;;  %v3467_v43 = vmul.f32 %v5783_v25, %v8050_v3 }
 0x91c   :  { %5786 = vtanh.f32 %v3459_v50  ;;  %v3460_v16 = vadd.f32 %v3458_v15, %v8856_v58  ;;  %v3464_v57 = vsub.f32 1.0, %v5785_v4  ;;  %v3468_v47 = vmul.f32 %v5785_v4, %v8056_v51  ;;  %v8863_v50 = vld [vmem:[#allocation42_spill] sm:$0xff] }
 0x91e   :  { %5788 = vtanh.f32 %v3460_v16  ;;  %v8864_v16 = vld [vmem:[#allocation45_spill] sm:$0xff] }
 0x926   :  { %v5787_v18 = vpop.eup %5786 }
 0x927   :  { %v3465_v34 = vmul.f32 %v5787_v18, %v3463_v9 }
 0x928   :  { %v5789_v13 = vpop.eup %5788 }
 0x929   :  { %v3466_v46 = vmul.f32 %v5789_v13, %v3464_v57  ;;  %v8138_v37 = vadd.f32 %v3467_v43, %v3465_v34 }
 0x92b   :  { %8857 = vst [vmem:[#allocation74_spill] sm:$0xff] %v8138_v37  ;;  %v8140_v14 = vadd.f32 %v3468_v47, %v3466_v46 }
 0x92d   :  { %8858 = vst [vmem:[#allocation73_spill] sm:$0xff] %v8140_v14  ;;  %v3506_v31 = vpop.f32.mrb[88].mxu0  ;;  %v3549_v36 = vpop.f32.mrb[112].mxu1 }
 0x92e   :  { %v3507_v26 = vadd.f32 %v3506_v31, %v6974_v23  ;;  %v3508_v17 = vpop.f32.mrb[89].mxu0  ;;  %v5116_v7 = vpop.f32.mrb[113].mxu1  ;;  %v3550_v56 = vadd.f32 %v3549_v36, %v7027_v28 }
 0x92f   :  { %v3509_v55 = vadd.f32 %v3508_v17, %v6981_v22  ;;  %v3510_v40 = vpop.f32.mrb[90].mxu0  ;;  %v3552_v11 = vpop.f32.mrb[114].mxu1  ;;  %v3660_v17 = vpack.c.bf16 %v8109_v2, %v8107_v39  ;;  %v5483_v7 = vld [vmem:[#allocation13 + $0x8] sm:$0xff]  }
 0x930   :  { %v3556_v3 = vadd.f32 %v3507_v26, %v8859_v0  ;;  %v3511_v42 = vadd.f32 %v3510_v40, %v6974_v23  ;;  %v3512_v44 = vpop.f32.mrb[91].mxu0  ;;  %v5117_v51 = vpop.f32.mrb[115].mxu1  ;;  %v3553_v1 = vadd.f32 %v3552_v11, %v7027_v28  ;;  %v8866_v40 = vld [vmem:[#allocation60_spill] sm:$0xff]  ;;  %v5485_v0 = vld [vmem:[#allocation13 + $0x18] sm:$0xff]  }
 0x931   :  { %v3570_v48 = vadd.f32 %v3509_v55, %v8860_v5  ;;  %v3513_v49 = vadd.f32 %v3512_v44, %v6981_v22  ;;  %v3661_v55 = vpack.c.bf16 %v7975_v38, %v7973_v8  ;;  %v5486_v51 = vld [vmem:[#allocation13 + $0x20] sm:$0xff]  }
 0x932   :  { %v4584_v24 = vmul.f32 -1.442695, %v3556_v3  ;;  %v3557_v29 = vadd.f32 %v3511_v42, %v8861_v33  ;;  %v8867_v3 = vld [vmem:[#allocation83_spill] sm:$0xff]  ;;  %v8869_v5 = vld [vmem:[#allocation82_spill] sm:$0xff]  ;;  %v8872_v33 = vld [vmem:[#allocation124_spill] sm:$0xff] }
 0x933   :  { %v3571_v27 = vadd.f32 %v3513_v49, %v8862_v41  ;;  %v4586_v30 = vmul.f32 -1.442695, %v3570_v48  ;;  %v8868_v42 = vld [vmem:[#allocation115_spill] sm:$0xff]  ;;  %v8870_v48 = vld [vmem:[#allocation85_spill] sm:$0xff]  ;;  %v5488_v41 = vld [vmem:[#allocation13 + $0x30] sm:$0xff]  }
 0x934   :  { %5790 = vpow2.f32 %v4584_v24  ;;  %v4585_v54 = vmul.f32 -1.442695, %v3557_v29  ;;  %v3663_v44 = vpack.c.bf16 %v8868_v42, %v8867_v3  ;;  %v5487_v49 = vld [vmem:[#allocation13 + $0x28] sm:$0xff]   ;;  %v8871_v24 = vld [vmem:[#allocation121_spill] sm:$0xff] }
 0x935   :  { %v4587_v45 = vmul.f32 -1.442695, %v3571_v27  ;;  %v3665_v29 = vpack.c.bf16 %v8872_v33, %v8871_v24  ;;  %v5489_v27 = vld [vmem:[#allocation13 + $0x38] sm:$0xff]  }
 0x936   :  { %5792 = vpow2.f32 %v4585_v54  ;;  %v8873_v54 = vld [vmem:[#allocation98_spill] sm:$0xff] }
 0x937   :  { %5794 = vpow2.f32 %v4586_v30  ;;  %v8874_v30 = vld [vmem:[#allocation95_spill] sm:$0xff] }
 0x938   :  { %5796 = vpow2.f32 %v4587_v45  ;;  %v8875_v45 = vld [vmem:[#allocation109_spill] sm:$0xff] }
 0x93e   :  { %v5791_v32 = vpop.eup %5790 }
 0x93f   :  { %v3564_v23 = vadd.f32 1.0, %v5791_v32  ;;  %v8876_v32 = vld [vmem:[#allocation112_spill] sm:$0xff] }
 0x940   :  { %v5793_v19 = vpop.eup %5792 }
 0x941   :  { %5798 = vrcp.f32 %v3564_v23  ;;  %v3565_v35 = vadd.f32 1.0, %v5793_v19  ;;  %v5795_v21 = vpop.eup %5794  ;;  %v3636_v23 = vpack.c.bf16 %v8876_v32, %v8875_v45  ;;  %v8877_v19 = vld [vmem:[#allocation52_spill] sm:$0xff] }
 0x942   :  { %v5797_v22 = vpop.eup %5796  ;;  %v3578_v60 = vadd.f32 1.0, %v5795_v21 }
 0x943   :  { %5800 = vrcp.f32 %v3565_v35  ;;  %v3579_v59 = vadd.f32 1.0, %v5797_v22  ;;  %v8878_v35 = vld [vmem:[#allocation77_spill] sm:$0xff]  ;;  %v8879_v22 = vld [vmem:[#allocation79_spill] sm:$0xff] }
 0x944   :  { %5802 = vrcp.f32 %v3578_v60  ;;  %v3637_v21 = vpack.c.bf16 %v8878_v35, %v8877_v19  ;;  %v8880_v60 = vld [vmem:[#allocation87_spill] sm:$0xff] }
 0x945   :  { %5804 = vrcp.f32 %v3579_v59  ;;  %v8881_v59 = vld [vmem:[#allocation100_spill] sm:$0xff] }
 0x94b   :  { %v5799_v20 = vpop.eup %5798 }
 0x94c   :  { %v3584_v10 = vmul.f32 %v5799_v20, %v3550_v56  ;;  %v3638_v56 = vpack.c.bf16 %v8880_v60, %v8879_v22  ;;  %v8882_v20 = vld [vmem:[#allocation101_spill] sm:$0xff] }
 0x94d   :  { %v5801_v61 = vpop.eup %5800 }
 0x94e   :  { %v3586_v15 = vadd.f32 %v3584_v10, %v8863_v50  ;;  %v3585_v58 = vmul.f32 %v5801_v61, %v3553_v1  ;;  %v5803_v4 = vpop.eup %5802  ;;  %v3639_v10 = vpack.c.bf16 %v8882_v20, %v8881_v59  ;;  %v8883_v1 = vld [vmem:[#allocation64_spill] sm:$0xff]  ;;  %v8884_v61 = vld [vmem:[#allocation70_spill] sm:$0xff] }
 0x94f   :  { %v5805_v9 = vpop.eup %5804  ;;  %v3590_v18 = vsub.f32 1.0, %v5803_v4  ;;  %v3594_v13 = vmul.f32 %v5803_v4, %v8115_v62  ;;  %v5484_v62 = vld [vmem:[#allocation13 + $0x10] sm:$0xff]   ;;  %v3640_v50 = vpack.c.bf16 %v8884_v61, %v8883_v1 }
 0x950   :  { %5806 = vtanh.f32 %v3586_v15  ;;  %v3587_v25 = vadd.f32 %v3585_v58, %v8864_v16  ;;  %v3591_v34 = vsub.f32 1.0, %v5805_v9  ;;  %v3595_v28 = vmul.f32 %v5805_v9, %v8121_v52  ;;  %v8865_v52 = vld [vmem:[#allocation91_spill] sm:$0xff]  ;;  %v8194_v16 = vld [vmem:[%s8467_s10] ss:$0 sm:$0xff] }
 0x951   :  { %v3662_v11 = vpack.c.bf16 %v8866_v40, %v8865_v52  ;;  %v3641_v15 = vpack.c.bf16 %v8040_v53, %v8036_v12  ;;  %v3642_v58 = vpack.c.bf16 %v8140_v14, %v8138_v37 }
 0x952   :  { %5808 = vtanh.f32 %v3587_v25 }
 0x95a   :  { %v5807_v57 = vpop.eup %5806 }
 0x95b   :  { %v3592_v43 = vmul.f32 %v5807_v57, %v3590_v18 }
 0x95c   :  { %v5809_v46 = vpop.eup %5808 }
 0x95d   :  { %v3593_v47 = vmul.f32 %v5809_v46, %v3591_v34  ;;  %v8156_v31 = vadd.f32 %v3594_v13, %v3592_v43 }
 0x95f   :  { %v8158_v36 = vadd.f32 %v3595_v28, %v3593_v47 }
 0x961   :  { %v3659_v26 = vpack.c.bf16 %v8158_v36, %v8156_v31 }
 0x963   :  { %5134 = vmatprep.mubr.bf16.mxu0 %v3659_v26 }
 0x964   :  { %5135 = vmatmul.mubr.bf16.vlgmr.msra.gmra.mrb[92].mxu0 %v3660_v17 }
 0x965   :  { %5138 = vmatprep.mubr.bf16.mxu0 %v3661_v55  ;;  %5151 = vmatpush3.bf16.msra.mxu0 %v8125_v63  ;;  %v3664_v63 = vpack.c.bf16 %v8870_v48, %v8869_v5 }
 0x966   :  { %5152 = vmatprep.subr.bf16.mxu0 %v5483_v7 }
 0x969   :  { %5153 = vmatpush3.bf16.msra.mxu0 %v5483_v7 }
 0x96a   :  { %5154 = vmatprep.subr.bf16.mxu0 %v5484_v62 }
 0x96c   :  { %5139 = vmatmul.mubr.bf16.gmra.mrb[96].mxu0 %v3662_v11 }
 0x96d   :  { %5142 = vmatprep.mubr.bf16.mxu0 %v3663_v44  ;;  %5155 = vmatpush3.bf16.msra.mxu0 %v5484_v62  ;;  %v8206_v62 = vld [vmem:[%s8468_s11] ss:$0 sm:$0xff]  ;;  %s6153_s11 = smov [#allocation16]  }
 0x96e   :  { %5156 = vmatprep.subr.bf16.mxu0 %v5485_v0  ;;  %s4393_s15 = sshll.u32 %s6153_s11, 4  ;;  %s4394_s15 = int_to_ptr.vmem [resolvable:$true] %s4393_s15 }
 0x96f   :  { %s6106_s4 = scalar_lea.vmem %s4394_s15, 512  ;;  %p6111_p7 = scmp.lt.s32.totalorder %s4394_s15, %s4394_s15 }
 0x970   :  { %p6107_p6 = scmp.ne.s32.totalorder %s4394_s15, %s6106_s4  ;;  %p6112_p8 = scmp.lt.s32.totalorder %s6106_s4, %s6106_s4 }
 0x971   :  { %5157 = vmatpush3.bf16.msra.mxu0 %v5485_v0 }
 0x972   :  { %5158 = vmatprep.subr.bf16.mxu0 %v5486_v51  ;;  %p6113_p9 = por %p6112_p8, %p6111_p7 }
 0x974   :  { %5143 = vmatmul.mubr.bf16.gmra.mrb[100].mxu0 %v3664_v63  ;;  %p6114_p10 = pnand %p6113_p9, %p6107_p6 }
 0x975   :  { %5146 = vmatprep.mubr.bf16.mxu0 %v3665_v29  ;;  %5159 = vmatpush3.bf16.msra.mxu0 %v5486_v51 }
 0x976   :  { %5160 = vmatprep.subr.bf16.mxu0 %v5487_v49 }
 0x979   :  { %5161 = vmatpush3.bf16.msra.mxu0 %v5487_v49 }
 0x97a   :  { %5162 = vmatprep.subr.bf16.mxu0 %v5488_v41 }
 0x97c   :  { %5147 = vmatmul.mubr.bf16.gmra.mrb[104].mxu0 %v8873_v54 }
 0x97d   :  { %5163 = vmatpush3.bf16.msra.mxu0 %v5488_v41  ;;  %5166 = vmatprep.mubr.bf16.mxu0 %v8874_v30 }
 0x97e   :  { %5164 = vmatprep.subr.bf16.mxu0 %v5489_v27 }
 0x981   :  { %5165 = vmatpush3.bf16.msra.mxu0 %v5489_v27 }
 0x984   :  { %5167 = vmatmul.mubr.bf16.vlgmr.msra.gmra.mrb[92].mxu0 %v3636_v23 }
 0x985   :  { %5170 = vmatprep.mubr.bf16.mxu0 %v3637_v21 }
 0x98c   :  { %5171 = vmatmul.mubr.bf16.gmra.mrb[96].mxu0 %v3638_v56 }
 0x98d   :  { %5174 = vmatprep.mubr.bf16.mxu0 %v3639_v10 }
 0x994   :  { %5175 = vmatmul.mubr.bf16.gmra.mrb[100].mxu0 %v3640_v50 }
 0x995   :  { %5178 = vmatprep.mubr.bf16.mxu0 %v3641_v15 }
 0x99c   :  { %5179 = vmatmul.mubr.bf16.gmra.mrb[104].mxu0 %v3642_v58 }
 0xa57   :  { %v5168_v25 = vpop.f32.mrb[92].mxu0 }
 0xa58   :  { %v3982_v4 = vadd.f32 %v5168_v25, %v8194_v16  ;;  %v3910_v9 = vpop.f32.mrb[93].mxu0 }
 0xa59   :  { %v3980_v18 = vadd.f32 %v8194_v16, %v3910_v9  ;;  %v5169_v57 = vpop.f32.mrb[94].mxu0 }
 0xa5a   :  { %5810 = vtanh.f32 %v3982_v4  ;;  %v3913_v34 = vpop.f32.mrb[95].mxu0  ;;  %v3983_v13 = vadd.f32 %v5169_v57, %v8194_v16 }
 0xa5b   :  { %v3981_v43 = vadd.f32 %v8194_v16, %v3913_v34  ;;  %5812 = vtanh.f32 %v3980_v18 }
 0xa5d   :  { %5814 = vtanh.f32 %v3981_v43 }
 0xa5e   :  { %5816 = vtanh.f32 %v3983_v13 }
 0xa5f   :  { %v5172_v46 = vpop.f32.mrb[96].mxu0 }
 0xa60   :  { %v3986_v47 = vadd.f32 %v5172_v46, %v8194_v16  ;;  %v3926_v28 = vpop.f32.mrb[97].mxu0 }
 0xa61   :  { %v3984_v26 = vadd.f32 %v8194_v16, %v3926_v28  ;;  %v5173_v17 = vpop.f32.mrb[98].mxu0 }
 0xa62   :  { %5818 = vtanh.f32 %v3986_v47  ;;  %v3987_v7 = vadd.f32 %v5173_v17, %v8194_v16  ;;  %v3929_v55 = vpop.f32.mrb[99].mxu0 }
 0xa63   :  { %5820 = vtanh.f32 %v3984_v26  ;;  %v3985_v0 = vadd.f32 %v8194_v16, %v3929_v55 }
 0xa64   :  { %v5811_v11 = vpop.eup %5810  ;;  %5822 = vtanh.f32 %v3987_v7 }
 0xa65   :  { %v4021_v44 = vmul.f32 %v5811_v11, %v8206_v62  ;;  %v5813_v51 = vpop.eup %5812  ;;  %5824 = vtanh.f32 %v3985_v0 }
 0xa66   :  { %v4019_v23 = vmul.f32 %v5813_v51, %v8206_v62 }
 0xa67   :  { %v5815_v63 = vpop.eup %5814  ;;  %4039 = vadd.xlane.f32.xlu0 %v4021_v44  ;;  %v5176_v49 = vpop.f32.mrb[100].mxu0 }
 0xa68   :  { %v3990_v29 = vadd.f32 %v5176_v49, %v8194_v16  ;;  %v3942_v41 = vpop.f32.mrb[101].mxu0  ;;  %v4020_v27 = vmul.f32 %v5815_v63, %v8206_v62  ;;  %v5817_v21 = vpop.eup %5816 }
 0xa69   :  { %v3988_v54 = vadd.f32 %v8194_v16, %v3942_v41  ;;  %v5177_v30 = vpop.f32.mrb[102].mxu0  ;;  %v4022_v25 = vmul.f32 %v5817_v21, %v8206_v62 }
 0xa6a   :  { %5826 = vtanh.f32 %v3990_v29  ;;  %v3991_v56 = vadd.f32 %v5177_v30, %v8194_v16  ;;  %4037 = vadd.xlane.f32.xlu1 %v4020_v27  ;;  %v3945_v10 = vpop.f32.mrb[103].mxu0 }
 0xa6b   :  { %5828 = vtanh.f32 %v3988_v54  ;;  %4035 = vadd.xlane.f32.xlu0 %v4019_v23  ;;  %v3989_v15 = vadd.f32 %v8194_v16, %v3945_v10 }
 0xa6c   :  { %v5819_v50 = vpop.eup %5818  ;;  %5830 = vtanh.f32 %v3991_v56 }
 0xa6d   :  { %v5821_v58 = vpop.eup %5820  ;;  %v4025_v4 = vmul.f32 %v5819_v50, %v8206_v62  ;;  %5832 = vtanh.f32 %v3989_v15 }
 0xa6e   :  { %v5823_v9 = vpop.eup %5822  ;;  %v4023_v46 = vmul.f32 %v5821_v58, %v8206_v62 }
 0xa6f   :  { %4041 = vadd.xlane.f32.xlu0 %v4022_v25  ;;  %4047 = vadd.xlane.f32.xlu1 %v4025_v4  ;;  %v5180_v18 = vpop.f32.mrb[104].mxu0  ;;  %v4026_v47 = vmul.f32 %v5823_v9, %v8206_v62  ;;  %v5825_v28 = vpop.eup %5824 }
 0xa70   :  { %v3994_v57 = vadd.f32 %v5180_v18, %v8194_v16  ;;  %v3958_v34 = vpop.f32.mrb[105].mxu0  ;;  %v4024_v0 = vmul.f32 %v5825_v28, %v8206_v62 }
 0xa71   :  { %v3992_v43 = vadd.f32 %v8194_v16, %v3958_v34  ;;  %v5181_v13 = vpop.f32.mrb[106].mxu0 }
 0xa72   :  { %v3961_v26 = vpop.f32.mrb[107].mxu0  ;;  %v3995_v55 = vadd.f32 %v5181_v13, %v8194_v16 }
 0xa73   :  { %5834 = vtanh.f32 %v3992_v43  ;;  %v3993_v17 = vadd.f32 %v8194_v16, %v3961_v26  ;;  %4043 = vadd.xlane.f32.xlu1 %v4023_v46  ;;  %4049 = vadd.xlane.f32.xlu0 %v4026_v47  ;;  %v8885_v46 = vld [vmem:[#allocation22_spill] sm:$0xff] }
 0xa74   :  { %v5827_v7 = vpop.eup %5826  ;;  %5836 = vtanh.f32 %v3994_v57  ;;  %vm8886_vm1 = vcmp.gt.s32.totalorder %v8885_v46, 0  ;;  %vm8887_vm4 = vcmp.gt.s32.totalorder %v8885_v46, 5  ;;  %vm8890_vm8 = vcmp.gt.s32.totalorder %v8885_v46, 4 }
 0xa75   :  { %v5829_v11 = vpop.eup %5828  ;;  %5838 = vtanh.f32 %v3993_v17  ;;  %v4029_v44 = vmul.f32 %v5827_v7, %v8206_v62  ;;  %v8888_v7 = vld [vmem:[#allocation23_spill] sm:$0xff]  ;;  %vm8894_vm3 = vcmp.gt.s32.totalorder %v8885_v46, 6  ;;  %vm8898_vm14 = vcmp.gt.s32.totalorder %v8885_v46, 7 }
 0xa76   :  { %v5831_v51 = vpop.eup %5830  ;;  %5840 = vtanh.f32 %v3995_v55  ;;  %v4027_v63 = vmul.f32 %v5829_v11, %v8206_v62  ;;  %vm8889_vm6 = vcmp.gt.s32.totalorder %v8888_v7, 0  ;;  %vm8891_vm11 = vcmp.gt.s32.totalorder %v8888_v7, 3 }
 0xa77   :  { %4045 = vadd.xlane.f32.xlu0 %v4024_v0  ;;  %4055 = vadd.xlane.f32.xlu1 %v4029_v44  ;;  %v4030_v49 = vmul.f32 %v5831_v51, %v8206_v62  ;;  %v5833_v29 = vpop.eup %5832  ;;  %vm8892_vm13 = vcmp.gt.s32.totalorder %v8888_v7, 2  ;;  %vm8893_vm15 = vcmp.gt.s32.totalorder %v8888_v7, 1  ;;  %vm8895_vm12 = vcmp.gt.s32.totalorder %v8888_v7, 5 }
 0xa78   :  { %v4028_v16 = vmul.f32 %v5833_v29, %v8206_v62  ;;  %vm8896_vm9 = vcmp.gt.s32.totalorder %v8888_v7, 4  ;;  %vm8897_vm10 = vcmp.gt.s32.totalorder %v8888_v7, 6 }
 0xa7b   :  { %4051 = vadd.xlane.f32.xlu1 %v4027_v63  ;;  %4057 = vadd.xlane.f32.xlu0 %v4030_v49 }
 0xa7d   :  { %v5835_v41 = vpop.eup %5834 }
 0xa7e   :  { %v5837_v27 = vpop.eup %5836  ;;  %v4031_v54 = vmul.f32 %v5835_v41, %v8206_v62 }
 0xa7f   :  { %v5839_v30 = vpop.eup %5838  ;;  %4053 = vadd.xlane.f32.xlu0 %v4028_v16  ;;  %v4033_v56 = vmul.f32 %v5837_v27, %v8206_v62 }
 0xa80   :  { %4059 = vadd.xlane.f32.xlu1 %v4031_v54  ;;  %v4032_v23 = vmul.f32 %v5839_v30, %v8206_v62  ;;  %v5841_v21 = vpop.eup %5840 }
 0xa81   :  { %v4034_v10 = vmul.f32 %v5841_v21, %v8206_v62 }
 0xa83   :  { %4061 = vadd.xlane.f32.xlu0 %v4032_v23 }
 0xa84   :  { %4063 = vadd.xlane.f32.xlu1 %v4033_v56 }
 0xa87   :  { %4065 = vadd.xlane.f32.xlu0 %v4034_v10 }
 0xaf4   :  { %v4040_v50 = vpop.xlane.xlu0 %4039 }
 0xaf5   :  { %v4069_v62 = vsel %vm1872_vm2, %v4040_v50, -1e+30 }
 0xaf6   :  { %v4085_v51 = vsel %vm4083_vm0, %v4069_v62, -inf }
 0xaf7   :  { %v4038_v15 = vpop.xlane.xlu1 %4037 }
 0xaf8   :  { %v4036_v58 = vpop.xlane.xlu0 %4035  ;;  %v8249_v55 = vsel %vm8889_vm6, %v4038_v15, -1e+30 }
 0xaf9   :  { %v4067_v26 = vsel %vm8886_vm1, %v4036_v58, -1e+30  ;;  %v4099_v50 = vsel %vm4083_vm0, %v8249_v55, -inf  ;;  %vm8899_vm1 = vcmp.gt.s32.totalorder %v8888_v7, 7 }
 0xafa   :  { %v4084_v16 = vsel %vm4083_vm0, %v4067_v26, -inf }
 0xafc   :  { %v4042_v25 = vpop.xlane.xlu0 %4041  ;;  %v4048_v4 = vpop.xlane.xlu1 %4047 }
 0xafd   :  { %v8235_v47 = vsel %vm2476_vm7, %v4048_v4, -1e+30  ;;  %v8268_v27 = vsel %vm8893_vm15, %v4042_v25, -1e+30 }
 0xafe   :  { %v4088_v11 = vsel %vm4083_vm0, %v8235_v47, -inf }
 0xaff   :  { %v4089_v23 = vmax.f32 %v4085_v51, %v4088_v11 }
 0xb00   :  { %v4044_v9 = vpop.xlane.xlu1 %4043  ;;  %v4050_v18 = vpop.xlane.xlu0 %4049 }
 0xb01   :  { %v4071_v28 = vsel %vm2174_vm5, %v4044_v9, -1e+30  ;;  %v8259_v49 = vsel %vm8891_vm11, %v4050_v18, -1e+30  ;;  %v4100_v9 = vsel %vm4083_vm0, %v8268_v27, -inf  ;;  %vm8906_vm11 = vmmov %vm8892_vm13 }
 0xb02   :  { %v4086_v63 = vsel %vm4083_vm0, %v4071_v28, -inf  ;;  %v4103_v58 = vsel %vm4083_vm0, %v8259_v49, -inf }
 0xb03   :  { %v4087_v15 = vmax.f32 %v4084_v16, %v4086_v63  ;;  %v4104_v63 = vmax.f32 %v4100_v9, %v4103_v58 }
 0xb04   :  { %v4046_v57 = vpop.xlane.xlu0 %4045  ;;  %v4056_v34 = vpop.xlane.xlu1 %4055 }
 0xb05   :  { %v8245_v17 = vsel %vm8887_vm4, %v4056_v34, -1e+30  ;;  %v8263_v29 = vsel %vm8892_vm13, %v4046_v57, -1e+30  ;;  %vm8900_vm4 = vcmp.gt.s32.totalorder %v8885_v46, 0  ;;  %vm8907_vm13 = vmmov %vm8898_vm14 }
 0xb06   :  { %v4092_v54 = vsel %vm4083_vm0, %v8245_v17, -inf  ;;  %v4101_v25 = vsel %vm4083_vm0, %v8263_v29, -inf }
 0xb07   :  { %v4093_v18 = vmax.f32 %v4089_v23, %v4092_v54 }
 0xb08   :  { %v4052_v43 = vpop.xlane.xlu1 %4051  ;;  %v4058_v13 = vpop.xlane.xlu0 %4057 }
 0xb09   :  { %v4075_v0 = vsel %vm8890_vm8, %v4052_v43, -1e+30  ;;  %v8277_v56 = vsel %vm8895_vm12, %v4058_v13, -1e+30 }
 0xb0a   :  { %v4090_v21 = vsel %vm4083_vm0, %v4075_v0, -inf  ;;  %v4107_v11 = vsel %vm4083_vm0, %v8277_v56, -inf }
 0xb0b   :  { %v4091_v13 = vmax.f32 %v4087_v15, %v4090_v21  ;;  %v4108_v21 = vmax.f32 %v4104_v63, %v4107_v11 }
 0xb0c   :  { %v4054_v44 = vpop.xlane.xlu0 %4053 }
 0xb0d   :  { %v4060_v41 = vpop.xlane.xlu1 %4059  ;;  %v8281_v10 = vsel %vm8896_vm9, %v4054_v44, -1e+30 }
 0xb0e   :  { %v4079_v30 = vsel %vm8894_vm3, %v4060_v41, -1e+30  ;;  %v4105_v44 = vsel %vm4083_vm0, %v8281_v10, -inf  ;;  %v4102_v41 = vmax.f32 %v4099_v50, %v4101_v25 }
 0xb0f   :  { %v4094_v57 = vsel %vm4083_vm0, %v4079_v30, -inf }
 0xb10   :  { %v4062_v4 = vpop.xlane.xlu0 %4061  ;;  %v4095_v54 = vmax.f32 %v4091_v13, %v4094_v57  ;;  %v4106_v15 = vmax.f32 %v4102_v41, %v4105_v44 }
 0xb11   :  { %v8294_v34 = vsel %vm8897_vm10, %v4062_v4, -1e+30  ;;  %v4064_v43 = vpop.xlane.xlu1 %4063 }
 0xb12   :  { %v4081_v51 = vsel %vm8898_vm14, %v4064_v43, -1e+30  ;;  %v4109_v23 = vsel %vm4083_vm0, %v8294_v34, -inf }
 0xb13   :  { %v4096_v16 = vsel %vm4083_vm0, %v4081_v51, -inf  ;;  %v4110_v61 = vmax.f32 %v4106_v15, %v4109_v23 }
 0xb14   :  { %v4097_v4 = vmax.f32 %v4093_v18, %v4096_v16  ;;  %v4066_v14 = vpop.xlane.xlu0 %4065 }
 0xb15   :  { %v4082_v33 = vsel %vm8899_vm1, %v4066_v14, -1e+30 }
 0xb16   :  { %v4098_v53 = vmax.f32 %v4095_v54, %v4097_v4  ;;  %v4111_v48 = vsel %vm4083_vm0, %v4082_v33, -inf }
 0xb17   :  { %v4112_v43 = vmax.f32 %v4108_v21, %v4111_v48 }
 0xb18   :  { %v4128_v58 = vsub.f32 %v4081_v51, %v4098_v53  ;;  %v4114_v50 = vsub.f32 %v4067_v26, %v4098_v53  ;;  %v4116_v25 = vsub.f32 %v4069_v62, %v4098_v53  ;;  %v4118_v9 = vsub.f32 %v4071_v28, %v4098_v53 }
 0xb19   :  { %v4113_v57 = vmax.f32 %v4110_v61, %v4112_v43  ;;  %v4120_v13 = vsub.f32 %v8235_v47, %v4098_v53  ;;  %v4122_v37 = vsub.f32 %v4075_v0, %v4098_v53  ;;  %v4124_v44 = vsub.f32 %v8245_v17, %v4098_v53 }
 0xb1a   :  { %v4130_v18 = vmul.f32 1.442695, %v4114_v50  ;;  %v4134_v16 = vmul.f32 1.442695, %v4116_v25  ;;  %v4158_v11 = vmul.f32 1.442695, %v4128_v58  ;;  %v4126_v63 = vsub.f32 %v4079_v30, %v4098_v53 }
 0xb1b   :  { %v4138_v14 = vmul.f32 1.442695, %v4118_v9  ;;  %v4142_v41 = vmul.f32 1.442695, %v4120_v13  ;;  %v4115_v54 = vsub.f32 %v8249_v55, %v4113_v57  ;;  %v4146_v48 = vmul.f32 1.442695, %v4122_v37 }
 0xb1c   :  { %5842 = vpow2.f32 %v4130_v18  ;;  %v4117_v62 = vsub.f32 %v8268_v27, %v4113_v57  ;;  %v4150_v61 = vmul.f32 1.442695, %v4124_v44  ;;  %v4119_v47 = vsub.f32 %v8263_v29, %v4113_v57 }
 0xb1d   :  { %5844 = vpow2.f32 %v4134_v16  ;;  %v4154_v28 = vmul.f32 1.442695, %v4126_v63  ;;  %v4121_v26 = vsub.f32 %v8259_v49, %v4113_v57  ;;  %v4123_v53 = vsub.f32 %v8281_v10, %v4113_v57 }
 0xb1e   :  { %5846 = vpow2.f32 %v4158_v11  ;;  %v4132_v17 = vmul.f32 1.442695, %v4115_v54  ;;  %v4125_v0 = vsub.f32 %v8277_v56, %v4113_v57  ;;  %v4136_v55 = vmul.f32 1.442695, %v4117_v62 }
 0xb1f   :  { %5848 = vpow2.f32 %v4138_v14  ;;  %v4140_v37 = vmul.f32 1.442695, %v4119_v47  ;;  %v4127_v27 = vsub.f32 %v8294_v34, %v4113_v57  ;;  %v4144_v30 = vmul.f32 1.442695, %v4121_v26 }
 0xb20   :  { %5850 = vpow2.f32 %v4142_v41  ;;  %v4606_v29 = vsel %vm8900_vm4, 1.0, %v8680_v6  ;;  %v4148_v49 = vmul.f32 1.442695, %v4123_v53  ;;  %v4608_v10 = vsel %vm1872_vm2, 1.0, %v8680_v6  ;;  %vm8901_vm2 = vmmov %vm8890_vm8 }
 0xb21   :  { %5852 = vpow2.f32 %v4146_v48  ;;  %v4129_v51 = vsub.f32 %v4082_v33, %v4113_v57  ;;  %v4152_v56 = vmul.f32 1.442695, %v4125_v0  ;;  %v4610_v34 = vsel %vm2174_vm5, 1.0, %v8680_v6  ;;  %vm8905_vm8 = vmmov %vm8893_vm15 }
 0xb22   :  { %5854 = vpow2.f32 %v4150_v61  ;;  %v4156_v15 = vmul.f32 1.442695, %v4127_v27  ;;  %v4612_v58 = vsel %vm2476_vm7, 1.0, %v8680_v6  ;;  %v4614_v25 = vsel %vm8901_vm2, 1.0, %v8680_v6  ;;  %vm8903_vm7 = vmmov %vm8889_vm6 }
 0xb23   :  { %5856 = vpow2.f32 %v4154_v28  ;;  %v4160_v9 = vmul.f32 1.442695, %v4129_v51  ;;  %vm8902_vm5 = vcmp.gt.s32.totalorder %v8885_v46, 5  ;;  %v4607_v54 = vsel %vm8903_vm7, 1.0, %v8680_v6  ;;  %vm8904_vm6 = vmmov %vm8894_vm3 }
 0xb24   :  { %5858 = vpow2.f32 %v4132_v17  ;;  %v4616_v44 = vsel %vm8902_vm5, 1.0, %v8680_v6  ;;  %v4618_v47 = vsel %vm8904_vm6, 1.0, %v8680_v6  ;;  %v4609_v28 = vsel %vm8905_vm8, 1.0, %v8680_v6  ;;  %vm8909_vm3 = vmmov %vm8896_vm9 }
 0xb25   :  { %5860 = vpow2.f32 %v4136_v55  ;;  %v4611_v17 = vsel %vm8906_vm11, 1.0, %v8680_v6  ;;  %v4620_v27 = vsel %vm8907_vm13, 1.0, %v8680_v6  ;;  %vm8908_vm15 = vcmp.gt.s32.totalorder %v8888_v7, 3  ;;  %vm8910_vm9 = vmmov %vm8897_vm10 }
 0xb26   :  { %v5843_v23 = vpop.eup %5842  ;;  %5862 = vpow2.f32 %v4140_v37  ;;  %vm8911_vm10 = vmmov %vm8899_vm1 }
 0xb27   :  { %v5845_v4 = vpop.eup %5844  ;;  %v8326_v21 = vmul.f32 %v5843_v23, %v4606_v29  ;;  %5864 = vpow2.f32 %v4144_v30  ;;  %v4613_v30 = vsel %vm8908_vm15, 1.0, %v8680_v6 }
 0xb28   :  { %v5847_v43 = vpop.eup %5846  ;;  %v8331_v50 = vmul.f32 %v5845_v4, %v4608_v10  ;;  %5866 = vpow2.f32 %v4148_v49 }
 0xb29   :  { %v5849_v33 = vpop.eup %5848  ;;  %v4194_v57 = vsel %vm4083_vm0, %v8326_v21, 0.0  ;;  %5868 = vpow2.f32 %v4152_v56 }
 0xb2a   :  { %v5851_v13 = vpop.eup %5850  ;;  %v8338_v18 = vmul.f32 %v5849_v33, %v4610_v34  ;;  %v4195_v16 = vsel %vm4083_vm0, %v8331_v50, 0.0  ;;  %5870 = vpow2.f32 %v4156_v15  ;;  %v4615_v34 = vsel %vm8909_vm3, 1.0, %v8680_v6 }
 0xb2b   :  { %v5853_v11 = vpop.eup %5852  ;;  %v8345_v63 = vmul.f32 %v5851_v13, %v4612_v58  ;;  %v4196_v14 = vadd.f32 %v4195_v16, %v4194_v57  ;;  %5872 = vpow2.f32 %v4160_v9 }
 0xb2c   :  { %v5855_v41 = vpop.eup %5854  ;;  %v8350_v48 = vmul.f32 %v5853_v11, %v4614_v25  ;;  %v4197_v62 = vsel %vm4083_vm0, %v8338_v18, 0.0  ;;  %v8381_v25 = vmul.f32 %v5847_v43, %v4620_v27  ;;  %v4617_v11 = vsel %vm8895_vm12, 1.0, %v8680_v6 }
 0xb2d   :  { %v5857_v61 = vpop.eup %5856  ;;  %v4198_v26 = vadd.f32 %v4197_v62, %v4196_v14  ;;  %v8363_v0 = vmul.f32 %v5855_v41, %v4616_v44  ;;  %v4199_v55 = vsel %vm4083_vm0, %v8345_v63, 0.0 }
 0xb2e   :  { %v5859_v53 = vpop.eup %5858  ;;  %v8373_v51 = vmul.f32 %v5857_v61, %v4618_v47  ;;  %v4201_v56 = vsel %vm4083_vm0, %v8350_v48, 0.0  ;;  %v4619_v61 = vsel %vm8910_vm9, 1.0, %v8680_v6 }
 0xb2f   :  { %v5861_v37 = vpop.eup %5860  ;;  %v4200_v29 = vadd.f32 %v4199_v55, %v4198_v26  ;;  %v4179_v49 = vmul.f32 %v5859_v53, %v4607_v54  ;;  %v4203_v9 = vsel %vm4083_vm0, %v8363_v0, 0.0  ;;  %v4207_v26 = vsel %vm4083_vm0, %v8381_v25, 0.0 }
 0xb30   :  { %v5863_v10 = vpop.eup %5862  ;;  %v4181_v23 = vmul.f32 %v5861_v37, %v4609_v28  ;;  %v4205_v41 = vsel %vm4083_vm0, %v8373_v51, 0.0  ;;  %v4621_v37 = vsel %vm8911_vm10, 1.0, %v8680_v6 }
 0xb31   :  { %v5865_v4 = vpop.eup %5864  ;;  %v4202_v46 = vadd.f32 %v4201_v56, %v4200_v29  ;;  %v4183_v15 = vmul.f32 %v5863_v10, %v4611_v17  ;;  %v4209_v58 = vsel %vm4083_vm0, %v4179_v49, 0.0 }
 0xb32   :  { %v5867_v33 = vpop.eup %5866  ;;  %v4185_v57 = vmul.f32 %v5865_v4, %v4613_v30  ;;  %v4210_v13 = vsel %vm4083_vm0, %v4181_v23, 0.0 }
 0xb33   :  { %v5869_v16 = vpop.eup %5868  ;;  %v4204_v44 = vadd.f32 %v4203_v9, %v4202_v46  ;;  %v4211_v14 = vadd.f32 %v4210_v13, %v4209_v58  ;;  %v4187_v54 = vmul.f32 %v5867_v33, %v4615_v34  ;;  %v4212_v43 = vsel %vm4083_vm0, %v4183_v15, 0.0 }
 0xb34   :  { %v5871_v62 = vpop.eup %5870  ;;  %v4189_v53 = vmul.f32 %v5869_v16, %v4617_v11  ;;  %v4214_v17 = vsel %vm4083_vm0, %v4185_v57, 0.0 }
 0xb35   :  { %v4206_v47 = vadd.f32 %v4205_v41, %v4204_v44  ;;  %v4213_v28 = vadd.f32 %v4212_v43, %v4211_v14  ;;  %v5873_v55 = vpop.eup %5872  ;;  %v4191_v29 = vmul.f32 %v5871_v62, %v4619_v61  ;;  %v4216_v10 = vsel %vm4083_vm0, %v4187_v54, 0.0 }
 0xb36   :  { %v4193_v34 = vmul.f32 %v5873_v55, %v4621_v37  ;;  %v4218_v46 = vsel %vm4083_vm0, %v4189_v53, 0.0 }
 0xb37   :  { %v4208_v27 = vadd.f32 %v4207_v26, %v4206_v47  ;;  %v4215_v30 = vadd.f32 %v4214_v17, %v4213_v28  ;;  %v4220_v33 = vsel %vm4083_vm0, %v4191_v29, 0.0 }
 0xb38   :  { %v4222_v13 = vsel %vm4083_vm0, %v4193_v34, 0.0 }
 0xb39   :  { %v4224_v56 = vmax.f32 %v4208_v27, 1e-30  ;;  %v4217_v4 = vadd.f32 %v4216_v10, %v4215_v30 }
 0xb3b   :  { %5874 = vrcp.f32 %v4224_v56  ;;  %v4219_v58 = vadd.f32 %v4218_v46, %v4217_v4 }
 0xb3d   :  { %v4221_v9 = vadd.f32 %v4220_v33, %v4219_v58  ;;  %v8913_v33 = vld [vmem:[#allocation94_spill] sm:$0xff] }
 0xb3f   :  { %v4223_v16 = vadd.f32 %v4222_v13, %v4221_v9 }
 0xb41   :  { %v4225_v7 = vmax.f32 %v4223_v16, 1e-30 }
 0xb43   :  { %5876 = vrcp.f32 %v4225_v7 }
 0xb45   :  { %v5875_v6 = vpop.eup %5874 }
 0xb46   :  { %v4228_v11 = vmul.f32 %v5875_v6, %v8326_v21  ;;  %v4232_v44 = vmul.f32 %v5875_v6, %v8338_v18  ;;  %v4230_v14 = vmul.f32 %v5875_v6, %v8331_v50  ;;  %v4234_v41 = vmul.f32 %v5875_v6, %v8345_v63 }
 0xb47   :  { %v4236_v62 = vmul.f32 %v5875_v6, %v8350_v48  ;;  %v4238_v18 = vmul.f32 %v5875_v6, %v8363_v0  ;;  %v4240_v63 = vmul.f32 %v5875_v6, %v8373_v51  ;;  %v4242_v48 = vmul.f32 %v5875_v6, %v8381_v25  ;;  %v8912_v51 = vld [vmem:[#allocation93_spill] sm:$0xff] }
 0xb48   :  { %4246 = vperm.xlu1 %5329, %v4228_v11   ;;  %4266 = vperm.xlu0 %5328, %v4232_v44  }
 0xb4c   :  { %4256 = vperm.xlu1 %5329, %v4230_v14   ;;  %4276 = vperm.xlu0 %5328, %v4234_v41  }
 0xb4d   :  { %v5877_v43 = vpop.eup %5876 }
 0xb4e   :  { %v4231_v61 = vmul.f32 %v5877_v43, %v4181_v23  ;;  %v4233_v47 = vmul.f32 %v5877_v43, %v4183_v15  ;;  %v4229_v28 = vmul.f32 %v5877_v43, %v4179_v49  ;;  %v4235_v21 = vmul.f32 %v5877_v43, %v4185_v57 }
 0xb4f   :  { %v4237_v50 = vmul.f32 %v5877_v43, %v4187_v54  ;;  %v4239_v26 = vmul.f32 %v5877_v43, %v4189_v53  ;;  %v4241_v23 = vmul.f32 %v5877_v43, %v4191_v29  ;;  %v4243_v49 = vmul.f32 %v5877_v43, %v4193_v34 }
 0xb50   :  { %4286 = vperm.xlu0 %5328, %v4236_v62   ;;  %4261 = vperm.xlu1 %5329, %v4231_v61  }
 0xb54   :  { %4271 = vperm.xlu1 %5329, %v4233_v47   ;;  %4251 = vperm.xlu0 %5328, %v4229_v28  }
 0xb58   :  { %4281 = vperm.xlu1 %5329, %v4235_v21   ;;  %4296 = vperm.xlu0 %5328, %v4238_v18  }
 0xb5c   :  { %4291 = vperm.xlu1 %5329, %v4237_v50   ;;  %4306 = vperm.xlu0 %5328, %v4240_v63  }
 0xb60   :  { %4301 = vperm.xlu1 %5329, %v4239_v26   ;;  %4316 = vperm.xlu0 %5328, %v4242_v48  }
 0xb64   :  { %4311 = vperm.xlu1 %5329, %v4241_v23   ;;  %v8914_v23 = vld [vmem:[#allocation74_spill] sm:$0xff] }
 0xb68   :  { %4321 = vperm.xlu1 %5329, %v4243_v49   ;;  %v8915_v49 = vld [vmem:[#allocation96_spill] sm:$0xff] }
 0xbc7   :  { %v4247_v15 = vpop.permute.xlu1 %4246  ;;  %v4267_v57 = vpop.permute.xlu0 %4266 }
 0xbc8   :  { %v4324_v37 = vmul.f32 %v4247_v15, %v8912_v51  ;;  %v4354_v53 = vmul.f32 %v4247_v15, %v8156_v31  ;;  %v4328_v29 = vmul.f32 %v4267_v57, %v8877_v19  ;;  %v4358_v56 = vmul.f32 %v4267_v57, %v7973_v8  ;;  %v8916_v57 = vld [vmem:[#allocation70_spill] sm:$0xff] }
 0xbcb   :  { %v4257_v17 = vpop.permute.xlu1 %4256  ;;  %v4277_v0 = vpop.permute.xlu0 %4276 }
 0xbcc   :  { %v4326_v55 = vmul.f32 %v4257_v17, %v8875_v45  ;;  %v4356_v54 = vmul.f32 %v4257_v17, %v8107_v39  ;;  %v4330_v9 = vmul.f32 %v4277_v0, %v8879_v22  ;;  %v4360_v31 = vmul.f32 %v4277_v0, %v8865_v52 }
 0xbce   :  { %v4340_v30 = vadd.f32 %v4326_v55, %v4324_v37  ;;  %v4370_v10 = vadd.f32 %v4356_v54, %v4354_v53 }
 0xbcf   :  { %v4262_v27 = vpop.permute.xlu1 %4261  ;;  %v4287_v25 = vpop.permute.xlu0 %4286 }
 0xbd0   :  { %v4341_v46 = vadd.f32 %v4340_v30, %v4328_v29  ;;  %v4371_v58 = vadd.f32 %v4370_v10, %v4358_v56  ;;  %v4327_v13 = vmul.f32 %v4262_v27, %v8876_v32  ;;  %v4357_v16 = vmul.f32 %v4262_v27, %v8109_v2  ;;  %v8919_v27 = vld [vmem:[#allocation124_spill] sm:$0xff] }
 0xbd1   :  { %v4332_v14 = vmul.f32 %v4287_v25, %v8881_v59  ;;  %v4362_v41 = vmul.f32 %v4287_v25, %v8867_v3 }
 0xbd2   :  { %v4342_v6 = vadd.f32 %v4341_v46, %v4330_v9  ;;  %v4372_v8 = vadd.f32 %v4371_v58, %v4360_v31  ;;  %v8921_v58 = vld [vmem:[#allocation97_spill] sm:$0xff] }
 0xbd3   :  { %v4272_v4 = vpop.permute.xlu1 %4271  ;;  %v4252_v34 = vpop.permute.xlu0 %4251 }
 0xbd4   :  { %v4325_v45 = vmul.f32 %v4252_v34, %v8913_v33  ;;  %v4355_v39 = vmul.f32 %v4252_v34, %v8158_v36  ;;  %v4329_v52 = vmul.f32 %v4272_v4, %v8878_v35  ;;  %v4359_v32 = vmul.f32 %v4272_v4, %v7975_v38  ;;  %v8920_v34 = vld [vmem:[#allocation73_spill] sm:$0xff] }
 0xbd5   :  { %v4343_v62 = vadd.f32 %v4342_v6, %v4332_v14  ;;  %v4373_v61 = vadd.f32 %v4372_v8, %v4362_v41 }
 0xbd6   :  { %v4347_v11 = vadd.f32 %v4327_v13, %v4325_v45  ;;  %v4377_v44 = vadd.f32 %v4357_v16, %v4355_v39 }
 0xbd7   :  { %v4282_v7 = vpop.permute.xlu1 %4281  ;;  %v4297_v19 = vpop.permute.xlu0 %4296 }
 0xbd8   :  { %v4334_v36 = vmul.f32 %v4297_v19, %v8883_v1  ;;  %v4364_v22 = vmul.f32 %v4297_v19, %v8869_v5  ;;  %v4331_v59 = vmul.f32 %v4282_v7, %v8880_v60  ;;  %v4348_v21 = vadd.f32 %v4347_v11, %v4329_v52 }
 0xbd9   :  { %v4361_v3 = vmul.f32 %v4282_v7, %v8866_v40  ;;  %v4378_v1 = vadd.f32 %v4377_v44, %v4359_v32  ;;  %v8917_v40 = vld [vmem:[#allocation85_spill] sm:$0xff] }
 0xbda   :  { %v4344_v18 = vadd.f32 %v4343_v62, %v4334_v36  ;;  %v4374_v5 = vadd.f32 %v4373_v61, %v4364_v22  ;;  %v4349_v15 = vadd.f32 %v4348_v21, %v4331_v59 }
 0xbdb   :  { %v4292_v43 = vpop.permute.xlu1 %4291  ;;  %v4307_v2 = vpop.permute.xlu0 %4306  ;;  %v4379_v60 = vadd.f32 %v4378_v1, %v4361_v3 }
 0xbdc   :  { %v4336_v47 = vmul.f32 %v4307_v2, %v8036_v12  ;;  %v4366_v28 = vmul.f32 %v4307_v2, %v8871_v24  ;;  %v4333_v35 = vmul.f32 %v4292_v43, %v8882_v20  ;;  %v4363_v38 = vmul.f32 %v4292_v43, %v8868_v42  ;;  %v8918_v42 = vld [vmem:[#allocation69_spill] sm:$0xff] }
 0xbde   :  { %v4345_v26 = vadd.f32 %v4344_v18, %v4336_v47  ;;  %v4375_v48 = vadd.f32 %v4374_v5, %v4366_v28  ;;  %v4350_v20 = vadd.f32 %v4349_v15, %v4333_v35  ;;  %v4380_v37 = vadd.f32 %v4379_v60, %v4363_v38 }
 0xbdf   :  { %v4302_v50 = vpop.permute.xlu1 %4301  ;;  %v4317_v63 = vpop.permute.xlu0 %4316 }
 0xbe0   :  { %v4338_v12 = vmul.f32 %v4317_v63, %v8914_v23  ;;  %v4368_v24 = vmul.f32 %v4317_v63, %v8915_v49  ;;  %v4335_v17 = vmul.f32 %v4302_v50, %v8916_v57  ;;  %v4365_v0 = vmul.f32 %v4302_v50, %v8917_v40 }
 0xbe2   :  { %v4346_v55 = vadd.f32 %v4345_v26, %v4338_v12  ;;  %v4376_v54 = vadd.f32 %v4375_v48, %v4368_v24  ;;  %v4351_v30 = vadd.f32 %v4350_v20, %v4335_v17  ;;  %v4381_v10 = vadd.f32 %v4380_v37, %v4365_v0 }
 0xbe3   :  { %v4312_v51 = vpop.permute.xlu1 %4311 }
 0xbe4   :  { %4384 = vst [vmem:[#allocation16] sm:$0xff] %v4346_v55  ;;  %4386 = vst [vmem:[#allocation16 + $0x8] sm:$0xff] %v4376_v54  ;;  %v4337_v53 = vmul.f32 %v4312_v51, %v8918_v42  ;;  %v4367_v25 = vmul.f32 %v4312_v51, %v8919_v27 }
 0xbe6   :  { %v4352_v56 = vadd.f32 %v4351_v30, %v4337_v53  ;;  %v4382_v4 = vadd.f32 %v4381_v10, %v4367_v25 }
 0xbe7   :  { %v4322_v29 = vpop.permute.xlu1 %4321 }
 0xbe8   :  { %v4339_v46 = vmul.f32 %v4322_v29, %v8920_v34  ;;  %v4369_v33 = vmul.f32 %v4322_v29, %v8921_v58 }
 0xbea   :  { %v4353_v45 = vadd.f32 %v4352_v56, %v4339_v46  ;;  %v4383_v39 = vadd.f32 %v4382_v4, %v4369_v33 }
 0xbec   :  { %4385 = vst [vmem:[#allocation16 + $0x10] sm:$0xff] %v4353_v45  ;;  %4387 = vst [vmem:[#allocation16 + $0x18] sm:$0xff] %v4383_v39 }
 0xbed   :  { %6117 = shalt.err (!%p6114_p10)
}
 0xbee   :  { %s6118_s28 = scalar_lea.hbm %s8469_s12, 512 }
 0xbef   :  { %p6119_p11 = scmp.ne.s32.totalorder %s8469_s12, %s6118_s28  ;;  %p6122_p12 = scmp.lt.u32.totalorder %s6118_s28, %s8469_s12 }
 0xbf1   :  { %p6124_p13 = pnand %p6122_p12, %p6119_p11 }
 0xbf3   :  { %6127 = shalt.err (!%p6124_p13)
}
 0xbf4   :  { %s6154_s0 = smov 256   ;;  %s6155_s20 = smov 16  }
 0xbf5   :  { %4399 = dma.vmem_to_hbm [thread:$0]  %s4394_s15, 512, %s8469_s12, [#allocation7], %s6154_s0, %s6154_s0, %s6155_s20  }
 0xbf6   :  { %6136 = dma.done.wait [#allocation7], 512  }
 0xbf7   :  { %6137 = vsyncadd [#allocation7], 4294966784 }
 0xbf8   :  { %4403 = vsyncpa [#allocation6], 1 }
 0xbf9   :  { %4404 = vsyncpa [#allocation9], 1 }
 0xbfa   :  { %4405 = vsyncpa [#allocation12], 1 }
 0xbfb   :  { %4406 = vsyncpa [#allocation15], 1 }
 0xbfc   :  { %4407 = vsyncpa [#allocation7], 1 }

</bundles_post_ra>
